<compile_context>
chip_gen: v7x
topology: tpu7x:2x2x1
jax: 0.10.0
libtpu: 0.0.40
codegen_flags: <defaults>
</compile_context>

<pallas_src>
import jax
import jax.numpy as jnp
from jax.experimental import pallas as pl
from jax.experimental.pallas import tpu as pltpu

OUT_CHANNEL = 256


# ----------------------------------------------------------------------------
# Fused Pallas kernel: merged conv matmul -> per-branch BN+ReLU -> projection.
# ----------------------------------------------------------------------------
def _aspp_fused_kernel(x_ref, wconv_ref, scb_ref, shb_ref, wp_ref, scp_ref,
                       shimg_ref, o_ref, feat_ref):
    """x_ref:     (1, M, Kpad)       bf16  im2col'd pixels (1x1 tap + 9 taps per rate)
       wconv_ref: (Kpad, 4*Cout)     bf16  block-diagonal [w0 | wdil_r1 | wdil_r2 | wdil_r3]
       scb/shb:   (1, 4*Cout)        f32   folded BN affine for branches b0..b3
       wp_ref:    (4*Cout, Cout)     bf16  stacked projection weight (branches 0..3)
       scp_ref:   (1, Cout)          f32   projection BN scale
       shimg_ref: (1, 1, Cout)       f32   per-image shift = proj BN shift + pool-branch bias
       o_ref:     (1, M, Cout)       f32   output tile
       feat_ref:  (M, 4*Cout)        bf16  VMEM scratch: concatenated branch features."""
    # One MXU pass computes all four conv branches (K merged across all taps).
    pre = jnp.dot(x_ref[0], wconv_ref[...], preferred_element_type=jnp.float32)
    # Per-branch folded BatchNorm + ReLU; stage the bf16 feature slab in VMEM.
    feat_ref[...] = jnp.maximum(pre * scb_ref[...] + shb_ref[...],
                                0.0).astype(jnp.bfloat16)
    # Single projection matmul over K = 4*Cout (pool branch enters as a bias).
    acc = jnp.dot(feat_ref[...], wp_ref[...], preferred_element_type=jnp.float32)
    # Projection BN + ReLU (per-image shift already contains the pool-branch
    # contribution).  Dropout(0.5) is identity in eval mode.
    # TODO(synk): training-mode dropout / batch-stat BN not implemented.
    o_ref[0] = jnp.maximum(acc * scp_ref[...] + shimg_ref[0], 0.0).astype(o_ref.dtype)


# ----------------------------------------------------------------------------
# Parameter construction (deterministic, synthetic) + BN folding
# ----------------------------------------------------------------------------
def fold_bn(gamma, beta, mean, var, eps=1e-5):
    scale = gamma / jnp.sqrt(var + eps)
    shift = beta - mean * scale
    return scale.astype(jnp.float32), shift.astype(jnp.float32)


def make_params(key, in_channels, out_channels, n_rates=3):
    keys = jax.random.split(key, 4)

    def bn_params(i):
        c = jnp.arange(out_channels, dtype=jnp.float32)
        return fold_bn(1.0 + 0.01 * c + 0.001 * i, 0.02 * c - 0.005 * i,
                       0.001 * c, 1.0 + 0.01 * c)

    scales, shifts = zip(*[bn_params(i) for i in range(6)])  # [b0,b1,b2,b3,pool,proj]
    return {
        # b0 1x1 conv
        "w0": 0.05 * jax.random.normal(keys[0], (in_channels, out_channels), jnp.float32),
        # b1..b3 dilated 3x3 convs: (rate, kh, kw) flattened -> (n_rates*9, Cin, Cout)
        "w_dil": 0.05 * jax.random.normal(
            keys[1], (n_rates * 9, in_channels, out_channels), jnp.float32),
        # b4 pooling-branch 1x1 conv
        "w4": 0.05 * jax.random.normal(keys[2], (in_channels, out_channels), jnp.float32),
        # projection 1x1 conv over 5*Cout channels, split per source branch
        "wp": 0.05 * jax.random.normal(keys[3], (5, out_channels, out_channels), jnp.float32),
        "scale": jnp.stack(scales),   # (6, Cout)
        "shift": jnp.stack(shifts),   # (6, Cout)
    }


# ----------------------------------------------------------------------------
# _ASPP forward (eval mode: BN uses running stats, dropout off)
# ----------------------------------------------------------------------------
def aspp_forward(x_nchw, params, atrous_rates=(1, 2, 3), max_tile_m=1024):
    """x_nchw: (N, Cin, H, W) f32  ->  (N, Out_Channel, H, W) f32."""
    N, Cin, H, W = x_nchw.shape
    Cout = OUT_CHANNEL
    rates = tuple(int(r) for r in atrous_rates)
    n_rates = len(rates)
    n_br = 1 + n_rates          # conv branches computed in-kernel (b0..b3)
    R = max(rates)
    HW = H * W

    x_nhwc = jnp.transpose(x_nchw, (0, 2, 3, 1)).astype(jnp.float32)   # NHWC

    scale = params["scale"].astype(jnp.float32)   # (6, Cout)
    shift = params["shift"].astype(jnp.float32)

    # ---- Pool branch (plain JAX, (N, Cout)-sized) folded into the projection
    # epilogue as a per-image shift.  Bilinear upsample of the 1x1 pooled map
    # with align_corners=True is a pure broadcast.
    pooled = jnp.mean(x_nhwc, axis=(1, 2))                                     # (N, Cin)
    feat5 = jnp.maximum(pooled @ params["w4"] * scale[4] + shift[4], 0.0)       # (N, Cout)
    pool_bias = feat5 @ params["wp"][4]                                         # (N, Cout)
    shift_img = (shift[5][None, :] + pool_bias * scale[5][None, :])
    shift_img = shift_img.reshape(N, 1, Cout).astype(jnp.float32)               # (N,1,Cout)
    scale_p = scale[5].reshape(1, Cout)

    # ---- im2col for the 1x1 + dilated 3x3 branches (wrapper-side; tiny Cin,
    # so the duplicated tensor is only KBs and the kernel sees lane-dense K).
    # TODO(synk): for backbone-sized Cin switch to in-kernel halo'd tap builds
    # to avoid the (1 + 9*n_rates)x input duplication in HBM.
    xp = jnp.pad(x_nhwc, ((0, 0), (R, R), (R, R), (0, 0)))
    cols = [x_nhwc]                                                 # 1x1 branch tap
    for r in rates:
        for kh in range(3):
            for kw in range(3):
                dh, dw = (kh - 1) * r, (kw - 1) * r
                cols.append(xp[:, R + dh:R + dh + H, R + dw:R + dw + W, :])
    Ktot = Cin * (1 + 9 * n_rates)
    Kpad = ((Ktot + 127) // 128) * 128
    x_cols = jnp.concatenate(cols, axis=-1).reshape(N, HW, Ktot)
    if Kpad != Ktot:
        x_cols = jnp.pad(x_cols, ((0, 0), (0, 0), (0, Kpad - Ktot)))
    x_cols = x_cols.astype(jnp.bfloat16)                             # (N, HW, Kpad)

    # ---- Block-diagonal merged conv weight: (Kpad, n_br*Cout).
    w_conv = jnp.zeros((Kpad, n_br * Cout), jnp.float32)
    w_conv = w_conv.at[:Cin, :Cout].set(params["w0"])
    for ri in range(n_rates):
        rows = slice(Cin + ri * 9 * Cin, Cin + (ri + 1) * 9 * Cin)
        ccols = slice((1 + ri) * Cout, (2 + ri) * Cout)
        w_conv = w_conv.at[rows, ccols].set(
            params["w_dil"][ri * 9:(ri + 1) * 9].reshape(9 * Cin, Cout))
    w_conv = w_conv.astype(jnp.bfloat16)

    # ---- Per-branch BN affines laid out to match the (M, 4*Cout) feature slab.
    scale_b = jnp.concatenate([scale[i] for i in range(n_br)]).reshape(1, n_br * Cout)
    shift_b = jnp.concatenate([shift[i] for i in range(n_br)]).reshape(1, n_br * Cout)

    # ---- Stacked projection weight for branches 0..3: (4*Cout, Cout).
    wp_stack = params["wp"][:n_br].reshape(n_br * Cout, Cout).astype(jnp.bfloat16)

    # ---- Tile the flattened pixel axis; aim for MXU-deep M (>= 256 rows).
    M_t = HW
    if HW > max_tile_m and HW % 8 == 0:
        M_t = max_tile_m
        while HW % M_t != 0:
            M_t -= 8
    n_m = HW // M_t

    # ---- Derived VMEM budget: double-buffered operands + scratch + f32
    # intermediate of the merged conv matmul, with headroom; clamped for v7x.
    buf = 2 * (M_t * Kpad * 2                       # x tile (bf16)
               + Kpad * n_br * Cout * 2             # w_conv (bf16)
               + n_br * Cout * Cout * 2             # wp_stack (bf16)
               + M_t * Cout * 4                     # output tile (f32)
               + (2 * n_br * Cout + 2 * Cout) * 4)  # BN vectors (f32)
    scratch = M_t * n_br * Cout * 2 + 2 * M_t * n_br * Cout * 4
    vmem_limit = min(max(int(1.25 * (buf + scratch)) + (4 << 20), 16 << 20), 48 << 20)

    out = pl.pallas_call(
        _aspp_fused_kernel,
        out_shape=jax.ShapeDtypeStruct((N, HW, Cout), jnp.float32),
        grid=(N, n_m),
        in_specs=[
            pl.BlockSpec((1, M_t, Kpad), lambda n, m: (n, m, 0)),
            pl.BlockSpec((Kpad, n_br * Cout), lambda n, m: (0, 0)),
            pl.BlockSpec((1, n_br * Cout), lambda n, m: (0, 0)),
            pl.BlockSpec((1, n_br * Cout), lambda n, m: (0, 0)),
            pl.BlockSpec((n_br * Cout, Cout), lambda n, m: (0, 0)),
            pl.BlockSpec((1, Cout), lambda n, m: (0, 0)),
            pl.BlockSpec((1, 1, Cout), lambda n, m: (n, 0, 0)),
        ],
        out_specs=pl.BlockSpec((1, M_t, Cout), lambda n, m: (n, m, 0)),
        scratch_shapes=[pltpu.VMEM((M_t, n_br * Cout), jnp.bfloat16)],
        compiler_params=pltpu.CompilerParams(
            dimension_semantics=("parallel", "parallel"),
            vmem_limit_bytes=vmem_limit,
        ),
    )(x_cols, w_conv, scale_b, shift_b, wp_stack, scale_p, shift_img)

    out = out.reshape(N, H, W, Cout)
    return jnp.transpose(out, (0, 3, 1, 2))        # NCHW


# ----------------------------------------------------------------------------
if __name__ == "__main__":
    key = jax.random.PRNGKey(0)
    k_x, k_p = jax.random.split(key)

    N, Cin, H, W = 2, 4, 16, 16
    x = jax.random.normal(k_x, (N, Cin, H, W), jnp.float32)
    params = make_params(k_p, Cin, OUT_CHANNEL, n_rates=3)

    fwd = jax.jit(aspp_forward)
    out = fwd(x, params)
    out = jax.block_until_ready(out)

    assert out.shape == (N, OUT_CHANNEL, H, W), out.shape
    assert out.dtype == jnp.float32
    assert bool(jnp.all(jnp.isfinite(out)))
    print("KERNEL_OK")
</pallas_src>

<mosaic_0001>
module attributes {stable_mosaic.version = 11 : i64} {
  func.func @_aspp_fused_kernel(%arg0: i32, %arg1: i32, %arg2: memref<1x256x128xbf16, #tpu.memory_space<vmem>>, %arg3: memref<128x1024xbf16, #tpu.memory_space<vmem>>, %arg4: memref<1x1024xf32, #tpu.memory_space<vmem>>, %arg5: memref<1x1024xf32, #tpu.memory_space<vmem>>, %arg6: memref<1024x256xbf16, #tpu.memory_space<vmem>>, %arg7: memref<1x256xf32, #tpu.memory_space<vmem>>, %arg8: memref<1x1x256xf32, #tpu.memory_space<vmem>>, %arg9: memref<1x256x256xf32, #tpu.memory_space<vmem>>, %arg10: memref<256x1024xbf16, #tpu.memory_space<vmem>>) attributes {dimension_semantics = [#tpu.dimension_semantics<parallel>, #tpu.dimension_semantics<parallel>], iteration_bounds = array<i64: 2, 1>, scalar_prefetch = 0 : i64, scratch_operands = 1 : i64, tpu.core_type = #tpu.core_type<tc>, window_params = [{transform_indices = @transform_0, window_bounds = array<i64: 1, 256, 128>}, {pipeline_mode = #tpu.pipeline_mode<synchronous>, transform_indices = @transform_1, window_bounds = array<i64: 128, 1024>}, {pipeline_mode = #tpu.pipeline_mode<synchronous>, transform_indices = @transform_2, window_bounds = array<i64: 1, 1024>}, {pipeline_mode = #tpu.pipeline_mode<synchronous>, transform_indices = @transform_3, window_bounds = array<i64: 1, 1024>}, {pipeline_mode = #tpu.pipeline_mode<synchronous>, transform_indices = @transform_4, window_bounds = array<i64: 1024, 256>}, {pipeline_mode = #tpu.pipeline_mode<synchronous>, transform_indices = @transform_5, window_bounds = array<i64: 1, 256>}, {transform_indices = @transform_6, window_bounds = array<i64: 1, 1, 256>}, {transform_indices = @transform_7, window_bounds = array<i64: 1, 256, 256>}]} {
    %c0 = arith.constant 0 : index
    %c0_0 = arith.constant 0 : index
    %c0_1 = arith.constant 0 : index
    %0 = vector.load %arg2[%c0, %c0_0, %c0_1] : memref<1x256x128xbf16, #tpu.memory_space<vmem>>, vector<1x256x128xbf16>
    %1 = vector.shape_cast %0 : vector<1x256x128xbf16> to vector<256x128xbf16>
    %c0_2 = arith.constant 0 : index
    %c0_3 = arith.constant 0 : index
    %2 = vector.load %arg3[%c0_2, %c0_3] : memref<128x1024xbf16, #tpu.memory_space<vmem>>, vector<128x1024xbf16>
    %cst = arith.constant dense<0.000000e+00> : vector<256x1024xf32>
    %3 = tpu.matmul %1, %2, %cst {dimension_numbers = #tpu.dot_dimension_numbers<[1], [0], [0], [1], [0, 0, 1, 1], [], []>} : vector<256x128xbf16>, vector<128x1024xbf16>, vector<256x1024xf32> -> vector<256x1024xf32>
    %c0_4 = arith.constant 0 : index
    %c0_5 = arith.constant 0 : index
    %4 = vector.load %arg4[%c0_4, %c0_5] : memref<1x1024xf32, #tpu.memory_space<vmem>>, vector<1x1024xf32>
    %5 = vector.broadcast %4 : vector<1x1024xf32> to vector<256x1024xf32>
    %6 = arith.mulf %3, %5 : vector<256x1024xf32>
    %c0_6 = arith.constant 0 : index
    %c0_7 = arith.constant 0 : index
    %7 = vector.load %arg5[%c0_6, %c0_7] : memref<1x1024xf32, #tpu.memory_space<vmem>>, vector<1x1024xf32>
    %8 = vector.broadcast %7 : vector<1x1024xf32> to vector<256x1024xf32>
    %9 = arith.addf %6, %8 : vector<256x1024xf32>
    %cst_8 = arith.constant 0.000000e+00 : f32
    %10 = vector.broadcast %cst_8 : f32 to vector<256x1024xf32>
    %11 = arith.maximumf %9, %10 : vector<256x1024xf32>
    %12 = arith.truncf %11 : vector<256x1024xf32> to vector<256x1024xbf16>
    %c0_9 = arith.constant 0 : index
    %c0_10 = arith.constant 0 : index
    %13 = vector.load %arg10[%c0_9, %c0_10] : memref<256x1024xbf16, #tpu.memory_space<vmem>>, vector<256x1024xbf16>
    tpu.vector_store %arg10[%c0_9, %c0_10], %12 {strides = array<i32>} : memref<256x1024xbf16, #tpu.memory_space<vmem>>, vector<256x1024xbf16>,
    %c0_11 = arith.constant 0 : index
    %c0_12 = arith.constant 0 : index
    %14 = vector.load %arg10[%c0_11, %c0_12] : memref<256x1024xbf16, #tpu.memory_space<vmem>>, vector<256x1024xbf16>
    %c0_13 = arith.constant 0 : index
    %c0_14 = arith.constant 0 : index
    %15 = vector.load %arg6[%c0_13, %c0_14] : memref<1024x256xbf16, #tpu.memory_space<vmem>>, vector<1024x256xbf16>
    %cst_15 = arith.constant dense<0.000000e+00> : vector<256x256xf32>
    %16 = tpu.matmul %14, %15, %cst_15 {dimension_numbers = #tpu.dot_dimension_numbers<[1], [0], [0], [1], [0, 0, 1, 1], [], []>} : vector<256x1024xbf16>, vector<1024x256xbf16>, vector<256x256xf32> -> vector<256x256xf32>
    %c0_16 = arith.constant 0 : index
    %c0_17 = arith.constant 0 : index
    %17 = vector.load %arg7[%c0_16, %c0_17] : memref<1x256xf32, #tpu.memory_space<vmem>>, vector<1x256xf32>
    %18 = vector.broadcast %17 : vector<1x256xf32> to vector<256x256xf32>
    %19 = arith.mulf %16, %18 : vector<256x256xf32>
    %c0_18 = arith.constant 0 : index
    %c0_19 = arith.constant 0 : index
    %c0_20 = arith.constant 0 : index
    %20 = vector.load %arg8[%c0_18, %c0_19, %c0_20] : memref<1x1x256xf32, #tpu.memory_space<vmem>>, vector<1x1x256xf32>
    %21 = vector.shape_cast %20 : vector<1x1x256xf32> to vector<1x256xf32>
    %22 = vector.broadcast %21 : vector<1x256xf32> to vector<256x256xf32>
    %23 = arith.addf %19, %22 : vector<256x256xf32>
    %cst_21 = arith.constant 0.000000e+00 : f32
    %24 = vector.broadcast %cst_21 : f32 to vector<256x256xf32>
    %25 = arith.maximumf %23, %24 : vector<256x256xf32>
    %c0_22 = arith.constant 0 : index
    %c0_23 = arith.constant 0 : index
    %c0_24 = arith.constant 0 : index
    %26 = vector.load %arg9[%c0_22, %c0_23, %c0_24] : memref<1x256x256xf32, #tpu.memory_space<vmem>>, vector<1x256x256xf32>
    %27 = vector.shape_cast %26 : vector<1x256x256xf32> to vector<256x256xf32>
    %28 = vector.shape_cast %25 : vector<256x256xf32> to vector<1x256x256xf32>
    tpu.vector_store %arg9[%c0_22, %c0_23, %c0_24], %28 {strides = array<i32>} : memref<1x256x256xf32, #tpu.memory_space<vmem>>, vector<1x256x256xf32>,
    return
  }
  func.func @transform_0(%arg0: i32, %arg1: i32) -> (i32, i32, i32) {
    %c0_i32 = arith.constant 0 : i32
    %c0_i32_0 = arith.constant 0 : i32
    return %arg0, %arg1, %c0_i32 : i32, i32, i32
  }
  func.func @transform_1(%arg0: i32, %arg1: i32) -> (i32, i32) {
    %c0_i32 = arith.constant 0 : i32
    %c0_i32_0 = arith.constant 0 : i32
    %c0_i32_1 = arith.constant 0 : i32
    return %c0_i32, %c0_i32_0 : i32, i32
  }
  func.func @transform_2(%arg0: i32, %arg1: i32) -> (i32, i32) {
    %c0_i32 = arith.constant 0 : i32
    %c0_i32_0 = arith.constant 0 : i32
    %c0_i32_1 = arith.constant 0 : i32
    return %c0_i32, %c0_i32_0 : i32, i32
  }
  func.func @transform_3(%arg0: i32, %arg1: i32) -> (i32, i32) {
    %c0_i32 = arith.constant 0 : i32
    %c0_i32_0 = arith.constant 0 : i32
    %c0_i32_1 = arith.constant 0 : i32
    return %c0_i32, %c0_i32_0 : i32, i32
  }
  func.func @transform_4(%arg0: i32, %arg1: i32) -> (i32, i32) {
    %c0_i32 = arith.constant 0 : i32
    %c0_i32_0 = arith.constant 0 : i32
    %c0_i32_1 = arith.constant 0 : i32
    return %c0_i32, %c0_i32_0 : i32, i32
  }
  func.func @transform_5(%arg0: i32, %arg1: i32) -> (i32, i32) {
    %c0_i32 = arith.constant 0 : i32
    %c0_i32_0 = arith.constant 0 : i32
    %c0_i32_1 = arith.constant 0 : i32
    return %c0_i32, %c0_i32_0 : i32, i32
  }
  func.func @transform_6(%arg0: i32, %arg1: i32) -> (i32, i32, i32) {
    %c0_i32 = arith.constant 0 : i32
    %c0_i32_0 = arith.constant 0 : i32
    %c0_i32_1 = arith.constant 0 : i32
    return %arg0, %c0_i32, %c0_i32_0 : i32, i32, i32
  }
  func.func @transform_7(%arg0: i32, %arg1: i32) -> (i32, i32, i32) {
    %c0_i32 = arith.constant 0 : i32
    %c0_i32_0 = arith.constant 0 : i32
    return %arg0, %arg1, %c0_i32 : i32, i32, i32
  }
}

</mosaic_0001>

<bundles_post_ra>
// kernel: aspp_forward.1
= control target key start
LH: loop header
LB: loop body
LE: loop exit
PB: predicated region body
PF: predicated region fallthrough
CT: control target
= control target key end

     0   :  { %12 = vsyncpa [#allocation4], 0  ;;  %s7767_s0 = inlined_call_operand.vmem [shape: bf16[2,256,128], index: 0, kind: input, shape index: {}]   ;;  %s7768_s1 = inlined_call_operand.vmem [shape: bf16[128,1024], index: 1, kind: input, shape index: {}]   ;;  %s7769_s2 = inlined_call_operand.vmem [shape: f32[1,1024], index: 2, kind: input, shape index: {}]   ;;  %s7770_s3 = inlined_call_operand.vmem [shape: f32[1,1024], index: 3, kind: input, shape index: {}]   ;;  %s7771_s4 = inlined_call_operand.vmem [shape: bf16[1024,256], index: 4, kind: input, shape index: {}]   ;;  %s7772_s5 = inlined_call_operand.vmem [shape: f32[1,256], index: 5, kind: input, shape index: {}]   ;;  %s7773_s6 = inlined_call_operand.vmem [shape: f32[2,1,256], index: 6, kind: input, shape index: {}]   ;;  %s7774_s7 = inlined_call_operand.hbm [shape: f32[2,256,256], index: 7, kind: output, shape index: {}]  }
   0x1   :  { %14 = vsyncpa [#allocation4 + $0x1], 0  ;;  %s5598_s24 = smov 0   ;;  %s5600_s25 = smov 0  }
   0x2   :  { %s5602_s26 = smov 0   ;;  %s5604_s27 = smov 0  }
   0x3   :  { %s5606_s28 = smov 0   ;;  %s5608_s29 = smov 0  }
   0x4 LB: > { %s4774_s30 = sadd.s32 4294967295, %s5552_s29   ;;  %s4775_s8 = sadd.s32 4294967294, %s5552_s29   ;;  %s5552_s29 = sphi %s5608_s29, %s20_s29   ;;  %s5548_s28 = sphi %s5606_s28, %s7864_s28   ;;  %s5544_s27 = sphi %s5604_s27, %s7863_s27   ;;  %s5540_s26 = sphi %s5602_s26, %s7862_s26   ;;  %s5536_s25 = sphi %s5600_s25, %s7861_s25   ;;  %s5532_s24 = sphi %s5598_s24, %s7860_s24  }
   0x5   : > { %s32_s9 = sadd.s32 1, %s5548_s28  ;;  %s200_s10 = sadd.s32 1, %s5540_s26 }
   0x6   : > { %p34_p0 = scmp.ge.s32.totalorder %s32_s9, 2  ;;  %p210_p1 = scmp.ne.s32.totalorder %s5540_s26, %s5536_s25 }
   0x7   : > { %p211_p2 = scmp.eq.s32.totalorder %s4774_s30, 1  ;;  %p216_p3 = scmp.ne.s32.totalorder %s5536_s25, %s5532_s24 }
   0x8   : > { %s7866_s9 = smov (%p34_p0, %s32_s9), 0  ;;  %p217_p5 = scmp.eq.s32.totalorder %s4775_s8, 1 }
   0x9   : > { %p5638_p4 = por %p211_p2, %p210_p1  ;;  %s195_s12 = ssub.s32 %s5548_s28, %s7866_s9 }
   0xa   : > { %p4778_p6 = scmp.ge.s32.totalorder %s5552_s29, 1  ;;  %p198_p7 = scmp.eq.s32.totalorder %s195_s12, 0 }
   0xb   : > { %p5645_p8 = por %p217_p5, %p216_p3  ;;  %p270_p9 = scmp.lt.s32.totalorder %s5552_s29, 3 }
   0xc   : > { %s5651_s14 = scalar_select %p198_p7, %s5540_s26, %s200_s10  }
   0xd   : > { %p271_p10 = pnand %p4778_p6, %p270_p9 }
   0xf   : > { %274 = sbr.rel (%p271_p10) target bundleno = 1024 (0x400), region = 48 }
  0x16   : > { %v358_v0 = vld [vmem:[%s7768_s1] sm:$0xff]  ;;  %p311_p11 = scmp.lt.s32.totalorder %s5544_s27, 1  ;;  %v7777_v6 = vmov 0   ;;  %v359_v32 = vld [vmem:[%s7768_s1 + $0x8] sm:$0xff]  ;;  %s307_s22 = sand.u32 1, %s5536_s25  }
  0x17   : > { %v362_v1 = vld [vmem:[%s7768_s1 + $0x20] sm:$0xff]  ;;  %870 = vmatprep.mubr.bf16.mxu1 %v7777_v6  ;;  %1256 = vmatprep.mubr.bf16.mxu0 %v7777_v6  ;;  %v363_v33 = vld [vmem:[%s7768_s1 + $0x28] sm:$0xff]  ;;  %s4997_s30 = sshll.u32 %s5544_s27, 13  ;;  %s5555_s17 = smov [#allocation3]  }
  0x18   : > { %v366_v2 = vld [vmem:[%s7768_s1 + $0x40] sm:$0xff]  ;;  %v4800_v3 = vcombine.high %v358_v0, %v362_v1  ;;  %v4799_v4 = vcombine.low %v358_v0, %v362_v1  ;;  %s5675_s12 = scalar_select %p311_p11, %s5544_s27, 1  ;;  %v367_v35 = vld [vmem:[%s7768_s1 + $0x48] sm:$0xff]  ;;  %v4802_v38 = vcombine.high %v359_v32, %v363_v33  ;;  %v4801_v39 = vcombine.low %v359_v32, %v363_v33  ;;  %v400_v33 = vld [vmem:[%s7768_s1 + $0x150] sm:$0xff] }
  0x19   : > { %v370_v5 = vld [vmem:[%s7768_s1 + $0x60] sm:$0xff]  ;;  %v371_v36 = vld [vmem:[%s7768_s1 + $0x68] sm:$0xff]  ;;  %s7721_s27 = scalar_lea.sflag [#allocation4], %s307_s22 }
  0x1a   : > { %v4808_v7 = vcombine.high %v366_v2, %v370_v5  ;;  %v374_v8 = vld [vmem:[%s7768_s1 + $0x80] sm:$0xff]  ;;  %838 = vmatprep.subr.bf16.mxu1 %v4800_v3  ;;  %v4807_v10 = vcombine.low %v366_v2, %v370_v5  ;;  %s4996_s15 = sshll.u32 %s5675_s12, 7  ;;  %v375_v40 = vld [vmem:[%s7768_s1 + $0x88] sm:$0xff]  ;;  %v4810_v42 = vcombine.high %v367_v35, %v371_v36  ;;  %v4809_v43 = vcombine.low %v367_v35, %v371_v36 }
  0x1b   : > { %v378_v9 = vld [vmem:[%s7768_s1 + $0xa0] sm:$0xff]  ;;  %839 = vmatpush1.bf16.msra.mxu1 %v4799_v4  ;;  %s5684_s20 = scalar_lea.vmem %s7767_s0, %s4996_s15  ;;  %v379_v41 = vld [vmem:[%s7768_s1 + $0xa8] sm:$0xff]  ;;  %s4782_s15 = sshll.u32 %s5675_s12, 1 }
  0x1c   : > { %840 = vmatprep.subr.bf16.mxu1 %v4808_v7  ;;  %v4816_v11 = vcombine.high %v374_v8, %v378_v9  ;;  %v382_v12 = vld [vmem:[%s7768_s1 + $0xc0] sm:$0xff]  ;;  %v4815_v14 = vcombine.low %v374_v8, %v378_v9  ;;  %v383_v44 = vld [vmem:[%s7768_s1 + $0xc8] sm:$0xff]  ;;  %v4818_v47 = vcombine.high %v375_v40, %v379_v41  ;;  %v4817_v48 = vcombine.low %v375_v40, %v379_v41  ;;  %v5760_v55 = vld [vmem:[%s5684_s20 + $0x10] sm:$0xff]   ;;  %s323_s18 = scalar_lea.vmem %s7773_s6, %s4782_s15  ;;  %s4779_s12 = sshll.u32 %s307_s22, 9 }
  0x1d   : > { %v386_v13 = vld [vmem:[%s7768_s1 + $0xe0] sm:$0xff]  ;;  %v387_v45 = vld [vmem:[%s7768_s1 + $0xe8] sm:$0xff]  ;;  %v5777_v0 = vld [vmem:[%s5684_s20 + $0x18] sm:$0xff]   ;;  %s7464_s23 = scalar_lea.vmem [#allocation3], %s4779_s12  ;;  %s7712_s15 = scalar_lea.hbm %s7774_s7, %s4997_s30 }
  0x1e   : > { %v4824_v15 = vcombine.high %v382_v12, %v386_v13  ;;  %v390_v16 = vld [vmem:[%s7768_s1 + $0x100] sm:$0xff]  ;;  %v4823_v18 = vcombine.low %v382_v12, %v386_v13  ;;  %v5743_v46 = vld [vmem:[%s5684_s20 + $0x8] sm:$0xff]   ;;  %v4826_v51 = vcombine.high %v383_v44, %v387_v45  ;;  %v4825_v52 = vcombine.low %v383_v44, %v387_v45  ;;  %v5792_v8 = vld [vmem:[%s5684_s20 + $0x30] sm:$0xff]  }
  0x1f   : > { %841 = vmatpush1.bf16.msra.mxu1 %v4807_v10  ;;  %v394_v17 = vld [vmem:[%s7768_s1 + $0x120] sm:$0xff]  ;;  %v391_v49 = vld [vmem:[%s7768_s1 + $0x108] sm:$0xff]  ;;  %v5797_v9 = vld [vmem:[%s5684_s20 + $0x38] sm:$0xff]  }
  0x20   : > { %842 = vmatprep.subr.bf16.mxu1 %v4816_v11  ;;  %v4832_v19 = vcombine.high %v390_v16, %v394_v17  ;;  %v398_v20 = vld [vmem:[%s7768_s1 + $0x140] sm:$0xff]  ;;  %v4831_v22 = vcombine.low %v390_v16, %v394_v17  ;;  %v395_v50 = vld [vmem:[%s7768_s1 + $0x128] sm:$0xff]  ;;  %v360_v10 = vld [vmem:[%s7768_s1 + $0x10] sm:$0xff] }
  0x21   : > { %v402_v21 = vld [vmem:[%s7768_s1 + $0x160] sm:$0xff]  ;;  %v399_v53 = vld [vmem:[%s7768_s1 + $0x148] sm:$0xff]  ;;  %v4834_v56 = vcombine.high %v391_v49, %v395_v50  ;;  %v4833_v57 = vcombine.low %v391_v49, %v395_v50  ;;  %v364_v11 = vld [vmem:[%s7768_s1 + $0x30] sm:$0xff] }
  0x22   : > { %v4840_v23 = vcombine.high %v398_v20, %v402_v21  ;;  %v406_v24 = vld [vmem:[%s7768_s1 + $0x180] sm:$0xff]  ;;  %v4839_v26 = vcombine.low %v398_v20, %v402_v21  ;;  %v403_v54 = vld [vmem:[%s7768_s1 + $0x168] sm:$0xff]  ;;  %v4804_v12 = vcombine.high %v360_v10, %v364_v11  ;;  %v4803_v13 = vcombine.low %v360_v10, %v364_v11  ;;  %v372_v16 = vld [vmem:[%s7768_s1 + $0x70] sm:$0xff] }
  0x23   : > { %843 = vmatpush1.bf16.msra.mxu1 %v4815_v14  ;;  %v410_v25 = vld [vmem:[%s7768_s1 + $0x1a0] sm:$0xff]  ;;  %v407_v58 = vld [vmem:[%s7768_s1 + $0x188] sm:$0xff]  ;;  %v4842_v60 = vcombine.high %v399_v53, %v403_v54  ;;  %v4841_v61 = vcombine.low %v399_v53, %v403_v54  ;;  %v380_v20 = vld [vmem:[%s7768_s1 + $0xb0] sm:$0xff] }
  0x24   : > { %844 = vmatprep.subr.bf16.mxu1 %v4824_v15  ;;  %v4848_v27 = vcombine.high %v406_v24, %v410_v25  ;;  %v414_v28 = vld [vmem:[%s7768_s1 + $0x1c0] sm:$0xff]  ;;  %v4847_v30 = vcombine.low %v406_v24, %v410_v25  ;;  %v411_v59 = vld [vmem:[%s7768_s1 + $0x1a8] sm:$0xff]  ;;  %1224 = vmatprep.subr.bf16.mxu0 %v4804_v12  ;;  %v368_v15 = vld [vmem:[%s7768_s1 + $0x50] sm:$0xff] }
  0x25   : > { %v418_v29 = vld [vmem:[%s7768_s1 + $0x1e0] sm:$0xff]  ;;  %v415_v62 = vld [vmem:[%s7768_s1 + $0x1c8] sm:$0xff]  ;;  %v4850_v1 = vcombine.high %v407_v58, %v411_v59  ;;  %v4849_v2 = vcombine.low %v407_v58, %v411_v59  ;;  %1225 = vmatpush1.bf16.msra.mxu0 %v4803_v13  ;;  %v4812_v17 = vcombine.high %v368_v15, %v372_v16  ;;  %v384_v24 = vld [vmem:[%s7768_s1 + $0xd0] sm:$0xff] }
  0x26   : > { %v4856_v31 = vcombine.high %v414_v28, %v418_v29  ;;  %v4855_v34 = vcombine.low %v414_v28, %v418_v29  ;;  %v5726_v37 = vld [vmem:[%s5684_s20] sm:$0xff]   ;;  %v419_v63 = vld [vmem:[%s7768_s1 + $0x1e8] sm:$0xff]  ;;  %v388_v25 = vld [vmem:[%s7768_s1 + $0xf0] sm:$0xff] }
  0x27   : > { %845 = vmatpush1.bf16.msra.mxu1 %v4823_v18  ;;  %v4858_v3 = vcombine.high %v415_v62, %v419_v63  ;;  %v4857_v4 = vcombine.low %v415_v62, %v419_v63  ;;  %v5782_v5 = vld [vmem:[%s5684_s20 + $0x20] sm:$0xff]   ;;  %v5787_v7 = vld [vmem:[%s5684_s20 + $0x28] sm:$0xff]   ;;  %v4811_v18 = vcombine.low %v368_v15, %v372_v16  ;;  %1226 = vmatprep.subr.bf16.mxu0 %v4812_v17  ;;  %v392_v28 = vld [vmem:[%s7768_s1 + $0x110] sm:$0xff] }
  0x28   : > { %846 = vmatprep.subr.bf16.mxu1 %v4832_v19  ;;  %v5808_v14 = vld [vmem:[%s5684_s20 + $0x40] sm:$0xff]   ;;  %v376_v19 = vld [vmem:[%s7768_s1 + $0x90] sm:$0xff]  ;;  %v5859_v41 = vld [vmem:[%s5684_s20 + $0x58] sm:$0xff]  }
  0x29   : > { %v4820_v21 = vcombine.high %v376_v19, %v380_v20  ;;  %1227 = vmatpush1.bf16.msra.mxu0 %v4811_v18  ;;  %v396_v29 = vld [vmem:[%s7768_s1 + $0x130] sm:$0xff]  ;;  %v361_v49 = vld [vmem:[%s7768_s1 + $0x18] sm:$0xff]  ;;  %v5266_v53 = vld [vmem:[%s7771_s4 + $0x104] ss:$8 sps:$4 sm:$0xff]  }
  0x2a   : > { %v5842_v32 = vld [vmem:[%s5684_s20 + $0x50] sm:$0xff]   ;;  %v365_v50 = vld [vmem:[%s7768_s1 + $0x38] sm:$0xff]  ;;  %v5889_v54 = vld [vmem:[%s5684_s20 + $0x68] sm:$0xff]  }
  0x2b   : > { %847 = vmatpush1.bf16.msra.mxu1 %v4831_v22  ;;  %v4819_v22 = vcombine.low %v376_v19, %v380_v20  ;;  %1228 = vmatprep.subr.bf16.mxu0 %v4820_v21  ;;  %v420_v44 = vld [vmem:[%s7768_s1 + $0x1f0] sm:$0xff]  ;;  %v5270_v59 = vld [vmem:[%s7771_s4 + $0x120] ss:$8 sps:$4 sm:$0xff]   ;;  %v369_v62 = vld [vmem:[%s7768_s1 + $0x58] sm:$0xff] }
  0x2c   : > { %848 = vmatprep.subr.bf16.mxu1 %v4840_v23  ;;  %v5825_v23 = vld [vmem:[%s5684_s20 + $0x48] sm:$0xff]   ;;  %v5902_v58 = vld [vmem:[%s5684_s20 + $0x70] sm:$0xff]   ;;  %v373_v63 = vld [vmem:[%s7768_s1 + $0x78] sm:$0xff] }
  0x2d   : > { %1229 = vmatpush1.bf16.msra.mxu0 %v4819_v22  ;;  %v377_v10 = vld [vmem:[%s7768_s1 + $0x98] sm:$0xff]  ;;  %v4813_v12 = vcombine.low %v369_v62, %v373_v63  ;;  %v5276_v17 = vld [vmem:[%s7771_s4 + $0x140] ss:$8 sps:$4 sm:$0xff]  }
  0x2e   : > { %v381_v11 = vld [vmem:[%s7768_s1 + $0xb8] sm:$0xff] }
  0x2f   : > { %849 = vmatpush1.bf16.msra.mxu1 %v4839_v26  ;;  %v4828_v26 = vcombine.high %v384_v24, %v388_v25  ;;  %v4822_v13 = vcombine.high %v377_v10, %v381_v11  ;;  %v385_v15 = vld [vmem:[%s7768_s1 + $0xd8] sm:$0xff]  ;;  %v4821_v18 = vcombine.low %v377_v10, %v381_v11  ;;  %v5323_v10 = vld [vmem:[%s7771_s4 + $0x1e4] ss:$8 sps:$4 sm:$0xff]  }
  0x30   : > { %850 = vmatprep.subr.bf16.mxu1 %v4848_v27  ;;  %v4827_v27 = vcombine.low %v384_v24, %v388_v25  ;;  %v389_v16 = vld [vmem:[%s7768_s1 + $0xf8] sm:$0xff] }
  0x31   : > { %1230 = vmatprep.subr.bf16.mxu0 %v4828_v26  ;;  %v4830_v19 = vcombine.high %v385_v15, %v389_v16  ;;  %v393_v20 = vld [vmem:[%s7768_s1 + $0x118] sm:$0xff]  ;;  %v4829_v22 = vcombine.low %v385_v15, %v389_v16 }
  0x32   : > { %1231 = vmatpush1.bf16.msra.mxu0 %v4827_v27  ;;  %v397_v21 = vld [vmem:[%s7768_s1 + $0x138] sm:$0xff] }
  0x33   : > { %851 = vmatpush1.bf16.msra.mxu1 %v4847_v30  ;;  %v4836_v30 = vcombine.high %v392_v28, %v396_v29  ;;  %v4838_v24 = vcombine.high %v393_v20, %v397_v21  ;;  %v401_v25 = vld [vmem:[%s7768_s1 + $0x158] sm:$0xff] }
  0x34   : > { %852 = vmatprep.subr.bf16.mxu1 %v4856_v31  ;;  %v4835_v31 = vcombine.low %v392_v28, %v396_v29  ;;  %v405_v26 = vld [vmem:[%s7768_s1 + $0x178] sm:$0xff]  ;;  %v4837_v28 = vcombine.low %v393_v20, %v397_v21 }
  0x35   : > { %1232 = vmatprep.subr.bf16.mxu0 %v4836_v30  ;;  %v5281_v27 = vld [vmem:[%s7771_s4 + $0x154] ss:$8 sps:$4 sm:$0xff]   ;;  %v4846_v29 = vcombine.high %v401_v25, %v405_v26 }
  0x36   : > { %1233 = vmatpush1.bf16.msra.mxu0 %v4835_v31  ;;  %v409_v30 = vld [vmem:[%s7768_s1 + $0x198] sm:$0xff] }
  0x37   : > { %853 = vmatpush1.bf16.msra.mxu1 %v4855_v34  ;;  %v404_v34 = vld [vmem:[%s7768_s1 + $0x170] sm:$0xff]  ;;  %v413_v31 = vld [vmem:[%s7768_s1 + $0x1b8] sm:$0xff] }
  0x38   : > { %1031 = vmatprep.subr.bf16.mxu1 %v4802_v38  ;;  %v4844_v35 = vcombine.high %v400_v33, %v404_v34  ;;  %v4843_v36 = vcombine.low %v400_v33, %v404_v34  ;;  %v408_v38 = vld [vmem:[%s7768_s1 + $0x190] sm:$0xff]  ;;  %v4845_v33 = vcombine.low %v401_v25, %v405_v26  ;;  %v4854_v34 = vcombine.high %v409_v30, %v413_v31 }
  0x39   : > { %v5332_v25 = vld [vmem:[%s7771_s4 + $0x1f4] ss:$8 sps:$4 sm:$0xff]  }
  0x3a   : > { %871 = vmatmul.mubr.bf16.vlgmr.msra.gmra.mrb[0].mxu1 %v5726_v37  ;;  %1234 = vmatprep.subr.bf16.mxu0 %v4844_v35  ;;  %v417_v35 = vld [vmem:[%s7768_s1 + $0x1d8] sm:$0xff] }
  0x3b   : > { %1032 = vmatpush1.bf16.msra.mxu1 %v4801_v39  ;;  %880 = vmatprep.mubr.bf16.mxu1 %v7777_v6  ;;  %v412_v39 = vld [vmem:[%s7768_s1 + $0x1b0] sm:$0xff] }
  0x3c   : > { %1033 = vmatprep.subr.bf16.mxu1 %v4810_v42  ;;  %1235 = vmatpush1.bf16.msra.mxu0 %v4843_v36  ;;  %v4852_v40 = vcombine.high %v408_v38, %v412_v39  ;;  %v4851_v42 = vcombine.low %v408_v38, %v412_v39  ;;  %v421_v36 = vld [vmem:[%s7768_s1 + $0x1f8] sm:$0xff]  ;;  %v5284_v38 = vld [vmem:[%s7771_s4 + $0x164] ss:$8 sps:$4 sm:$0xff]   ;;  %v4853_v39 = vcombine.low %v409_v30, %v413_v31 }
  0x3e   : > { %1236 = vmatprep.subr.bf16.mxu0 %v4852_v40  ;;  %v4862_v40 = vcombine.high %v417_v35, %v421_v36 }
  0x3f   : > { %1034 = vmatpush1.bf16.msra.mxu1 %v4809_v43  ;;  %v416_v43 = vld [vmem:[%s7768_s1 + $0x1d0] sm:$0xff] }
  0x40   : > { %1035 = vmatprep.subr.bf16.mxu1 %v4818_v47  ;;  %1237 = vmatpush1.bf16.msra.mxu0 %v4851_v42  ;;  %v4860_v45 = vcombine.high %v416_v43, %v420_v44  ;;  %v4859_v47 = vcombine.low %v416_v43, %v420_v44  ;;  %v4861_v42 = vcombine.low %v417_v35, %v421_v36  ;;  %v5285_v43 = vld [vmem:[%s7771_s4 + $0x170] ss:$8 sps:$4 sm:$0xff]   ;;  %v5287_v44 = vld [vmem:[%s7771_s4 + $0x174] ss:$8 sps:$4 sm:$0xff]  }
  0x42   : > { %881 = vmatmul.mubr.bf16.gmra.mrb[4].mxu1 %v5743_v46  ;;  %1238 = vmatprep.subr.bf16.mxu0 %v4860_v45  ;;  %v5290_v45 = vld [vmem:[%s7771_s4 + $0x184] ss:$8 sps:$4 sm:$0xff]  }
  0x43   : > { %890 = vmatprep.mubr.bf16.mxu1 %v7777_v6  ;;  %1036 = vmatpush1.bf16.msra.mxu1 %v4817_v48  ;;  %v5870_v48 = vld [vmem:[%s5684_s20 + $0x60] sm:$0xff]  }
  0x44   : > { %1037 = vmatprep.subr.bf16.mxu1 %v4826_v51  ;;  %1239 = vmatpush1.bf16.msra.mxu0 %v4859_v47  ;;  %v4806_v51 = vcombine.high %v361_v49, %v365_v50  ;;  %v5293_v47 = vld [vmem:[%s7771_s4 + $0x194] ss:$8 sps:$4 sm:$0xff]  }
  0x45   : > { %3807 = vmatprep.subr.bf16.mxu0 %v5266_v53  ;;  %v1612_v53 = vlaneseq }
  0x47   : > { %1038 = vmatpush1.bf16.msra.mxu1 %v4825_v52  ;;  %1257 = vmatmul.mubr.bf16.vlgmr.msra.gmra.mrb[0].mxu0 %v5726_v37  ;;  %v5264_v52 = vld [vmem:[%s7771_s4 + $0x100] ss:$8 sps:$4 sm:$0xff]  }
  0x48   : > { %1039 = vmatprep.subr.bf16.mxu1 %v4834_v56  ;;  %1266 = vmatprep.mubr.bf16.mxu0 %v7777_v6  ;;  %v5267_v56 = vld [vmem:[%s7771_s4 + $0x110] ss:$8 sps:$4 sm:$0xff]  }
  0x49   : > { %3808 = vmatpush1.bf16.msra.mxu0 %v5264_v52  ;;  %v5305_v52 = vld [vmem:[%s7771_s4 + $0x1c4] ss:$8 sps:$4 sm:$0xff]  }
  0x4a   : > { %891 = vmatmul.mubr.bf16.gmra.mrb[8].mxu1 %v5760_v55 }
  0x4b   : > { %900 = vmatprep.mubr.bf16.mxu1 %v7777_v6  ;;  %1040 = vmatpush1.bf16.msra.mxu1 %v4833_v57  ;;  %v5269_v57 = vld [vmem:[%s7771_s4 + $0x114] ss:$8 sps:$4 sm:$0xff]  }
  0x4c   : > { %1041 = vmatprep.subr.bf16.mxu1 %v4842_v60  ;;  %3809 = vmatprep.subr.bf16.mxu0 %v5269_v57  ;;  %v5272_v60 = vld [vmem:[%s7771_s4 + $0x124] ss:$8 sps:$4 sm:$0xff]   ;;  %v5314_v57 = vld [vmem:[%s7771_s4 + $0x1d4] ss:$8 sps:$4 sm:$0xff]  }
  0x4d   : > { %3810 = vmatpush1.bf16.msra.mxu0 %v5267_v56  ;;  %v6063_v56 = vshrl.u32 %v1612_v53, 7 }
  0x4e   : > { %3811 = vmatprep.subr.bf16.mxu0 %v5272_v60 }
  0x4f   : > { %1042 = vmatpush1.bf16.msra.mxu1 %v4841_v61  ;;  %1267 = vmatmul.mubr.bf16.gmra.mrb[4].mxu0 %v5743_v46  ;;  %v5915_v61 = vld [vmem:[%s5684_s20 + $0x78] sm:$0xff]   ;;  %v6078_v60 = vsub.s32 1, %v6063_v56 }
  0x50   : > { %1043 = vmatprep.subr.bf16.mxu1 %v4850_v1  ;;  %1276 = vmatprep.mubr.bf16.mxu0 %v7777_v6  ;;  %v5273_v1 = vld [vmem:[%s7771_s4 + $0x130] ss:$8 sps:$4 sm:$0xff]  }
  0x51   : > { %3812 = vmatpush1.bf16.msra.mxu0 %v5270_v59  ;;  %v6075_v59 = vsub.s32 0, %v6063_v56  ;;  %7784 = vst [vmem:[#allocation7_spill] sm:$0xff] %v6078_v60 }
  0x52   : > { %901 = vmatmul.mubr.bf16.gmra.mrb[12].mxu1 %v5777_v0 }
  0x53   : > { %910 = vmatprep.mubr.bf16.mxu1 %v7777_v6  ;;  %1044 = vmatpush1.bf16.msra.mxu1 %v4849_v2  ;;  %v5275_v2 = vld [vmem:[%s7771_s4 + $0x134] ss:$8 sps:$4 sm:$0xff]   ;;  %7783 = vst [vmem:[#allocation6_spill] sm:$0xff] %v6075_v59 }
  0x54   : > { %1045 = vmatprep.subr.bf16.mxu1 %v4858_v3  ;;  %v4805_v3 = vcombine.low %v361_v49, %v365_v50  ;;  %3813 = vmatprep.subr.bf16.mxu0 %v5275_v2  ;;  %v5296_v49 = vld [vmem:[%s7771_s4 + $0x1a4] ss:$8 sps:$4 sm:$0xff]   ;;  %v5299_v50 = vld [vmem:[%s7771_s4 + $0x1b4] ss:$8 sps:$4 sm:$0xff]  }
  0x55   : > { %3814 = vmatpush1.bf16.msra.mxu0 %v5273_v1 }
  0x57   : > { %1046 = vmatpush1.bf16.msra.mxu1 %v4857_v4  ;;  %1277 = vmatmul.mubr.bf16.gmra.mrb[8].mxu0 %v5760_v55  ;;  %v4814_v4 = vcombine.high %v369_v62, %v373_v63  ;;  %v6088_v62 = vld [vmem:[%s7770_s3] sm:$0xff] }
  0x58   : > { %1417 = vmatprep.subr.bf16.mxu1 %v4806_v51  ;;  %1286 = vmatprep.mubr.bf16.mxu0 %v7777_v6  ;;  %v5302_v51 = vld [vmem:[%s7771_s4 + $0x4] ss:$8 sps:$4 sm:$0xff]   ;;  %v6104_v2 = vrot.slane %v6088_v62, %v6075_v59 }
  0x5a   : > { %911 = vmatmul.mubr.bf16.gmra.mrb[16].mxu1 %v5782_v5 }
  0x5b   : > { %920 = vmatprep.mubr.bf16.mxu1 %v7777_v6 }
  0x5f   : > { %1287 = vmatmul.mubr.bf16.gmra.mrb[12].mxu0 %v5777_v0 }
  0x60   : > { %1296 = vmatprep.mubr.bf16.mxu0 %v7777_v6 }
  0x62   : > { %921 = vmatmul.mubr.bf16.gmra.mrb[20].mxu1 %v5787_v7 }
  0x63   : > { %930 = vmatprep.mubr.bf16.mxu1 %v7777_v6 }
  0x67   : > { %1297 = vmatmul.mubr.bf16.gmra.mrb[16].mxu0 %v5782_v5 }
  0x68   : > { %1306 = vmatprep.mubr.bf16.mxu0 %v7777_v6 }
  0x6a   : > { %931 = vmatmul.mubr.bf16.gmra.mrb[24].mxu1 %v5792_v8 }
  0x6b   : > { %940 = vmatprep.mubr.bf16.mxu1 %v7777_v6 }
  0x6f   : > { %1307 = vmatmul.mubr.bf16.gmra.mrb[20].mxu0 %v5787_v7 }
  0x70   : > { %1316 = vmatprep.mubr.bf16.mxu0 %v7777_v6 }
  0x72   : > { %941 = vmatmul.mubr.bf16.gmra.mrb[28].mxu1 %v5797_v9 }
  0x73   : > { %950 = vmatprep.mubr.bf16.mxu1 %v7777_v6 }
  0x77   : > { %1317 = vmatmul.mubr.bf16.gmra.mrb[24].mxu0 %v5792_v8 }
  0x78   : > { %1326 = vmatprep.mubr.bf16.mxu0 %v7777_v6 }
  0x7a   : > { %951 = vmatmul.mubr.bf16.gmra.mrb[32].mxu1 %v5808_v14 }
  0x7b   : > { %960 = vmatprep.mubr.bf16.mxu1 %v7777_v6 }
  0x7f   : > { %1327 = vmatmul.mubr.bf16.gmra.mrb[28].mxu0 %v5797_v9 }
  0x80   : > { %1336 = vmatprep.mubr.bf16.mxu0 %v7777_v6 }
  0x82   : > { %961 = vmatmul.mubr.bf16.gmra.mrb[36].mxu1 %v5825_v23 }
  0x83   : > { %970 = vmatprep.mubr.bf16.mxu1 %v7777_v6 }
  0x87   : > { %1337 = vmatmul.mubr.bf16.gmra.mrb[32].mxu0 %v5808_v14 }
  0x88   : > { %1346 = vmatprep.mubr.bf16.mxu0 %v7777_v6 }
  0x8a   : > { %971 = vmatmul.mubr.bf16.gmra.mrb[40].mxu1 %v5842_v32 }
  0x8b   : > { %980 = vmatprep.mubr.bf16.mxu1 %v7777_v6 }
  0x8f   : > { %1347 = vmatmul.mubr.bf16.gmra.mrb[36].mxu0 %v5825_v23 }
  0x90   : > { %1356 = vmatprep.mubr.bf16.mxu0 %v7777_v6 }
  0x92   : > { %981 = vmatmul.mubr.bf16.gmra.mrb[44].mxu1 %v5859_v41 }
  0x93   : > { %990 = vmatprep.mubr.bf16.mxu1 %v7777_v6 }
  0x97   : > { %1357 = vmatmul.mubr.bf16.gmra.mrb[40].mxu0 %v5842_v32 }
  0x98   : > { %1366 = vmatprep.mubr.bf16.mxu0 %v7777_v6 }
  0x9a   : > { %991 = vmatmul.mubr.bf16.gmra.mrb[48].mxu1 %v5870_v48 }
  0x9b   : > { %1000 = vmatprep.mubr.bf16.mxu1 %v7777_v6 }
  0x9f   : > { %1367 = vmatmul.mubr.bf16.gmra.mrb[44].mxu0 %v5859_v41 }
  0xa0   : > { %1376 = vmatprep.mubr.bf16.mxu0 %v7777_v6 }
  0xa2   : > { %1001 = vmatmul.mubr.bf16.gmra.mrb[52].mxu1 %v5889_v54 }
  0xa3   : > { %1010 = vmatprep.mubr.bf16.mxu1 %v7777_v6 }
  0xa7   : > { %1377 = vmatmul.mubr.bf16.gmra.mrb[48].mxu0 %v5870_v48 }
  0xa8   : > { %1386 = vmatprep.mubr.bf16.mxu0 %v7777_v6 }
  0xaa   : > { %1011 = vmatmul.mubr.bf16.gmra.mrb[56].mxu1 %v5902_v58 }
  0xab   : > { %1020 = vmatprep.mubr.bf16.mxu1 %v7777_v6 }
  0xaf   : > { %1387 = vmatmul.mubr.bf16.gmra.mrb[52].mxu0 %v5889_v54 }
  0xb0   : > { %1396 = vmatprep.mubr.bf16.mxu0 %v7777_v6 }
  0xb2   : > { %1021 = vmatmul.mubr.bf16.gmra.mrb[60].mxu1 %v5915_v61 }
  0xb3   : > { %1063 = vmatprep.mubr.bf16.mxu1 %v7777_v6 }
  0xb7   : > { %1397 = vmatmul.mubr.bf16.gmra.mrb[56].mxu0 %v5902_v58 }
  0xb8   : > { %1406 = vmatprep.mubr.bf16.mxu0 %v7777_v6 }
  0xba   : > { %1064 = vmatmul.mubr.bf16.vlgmr.msra.gmra.mrb[64].mxu1 %v5726_v37  ;;  %v5278_v37 = vld [vmem:[%s7771_s4 + $0x144] ss:$8 sps:$4 sm:$0xff]  }
  0xbb   : > { %1073 = vmatprep.mubr.bf16.mxu1 %v7777_v6  ;;  %1418 = vmatpush1.bf16.msra.mxu1 %v4805_v3 }
  0xbc   : > { %1419 = vmatprep.subr.bf16.mxu1 %v4814_v4  ;;  %3815 = vmatprep.subr.bf16.mxu0 %v5278_v37  ;;  %v5321_v4 = vld [vmem:[%s7771_s4 + $0x1e0] ss:$8 sps:$4 sm:$0xff]  }
  0xbd   : > { %3816 = vmatpush1.bf16.msra.mxu0 %v5276_v17 }
  0xbe   : > { %3817 = vmatprep.subr.bf16.mxu0 %v5281_v27 }
  0xbf   : > { %1420 = vmatpush1.bf16.msra.mxu1 %v4813_v12  ;;  %1407 = vmatmul.mubr.bf16.gmra.mrb[60].mxu0 %v5915_v61 }
  0xc0   : > { %1421 = vmatprep.subr.bf16.mxu1 %v4822_v13 }
  0xc2   : > { %1074 = vmatmul.mubr.bf16.gmra.mrb[68].mxu1 %v5743_v46  ;;  %v5279_v46 = vld [vmem:[%s7771_s4 + $0x150] ss:$8 sps:$4 sm:$0xff]  }
  0xc3   : > { %1083 = vmatprep.mubr.bf16.mxu1 %v7777_v6  ;;  %1422 = vmatpush1.bf16.msra.mxu1 %v4821_v18 }
  0xc4   : > { %1423 = vmatprep.subr.bf16.mxu1 %v4830_v19  ;;  %3818 = vmatpush1.bf16.msra.mxu0 %v5279_v46 }
  0xc5   : > { %3819 = vmatprep.subr.bf16.mxu0 %v5284_v38 }
  0xc7   : > { %1424 = vmatpush1.bf16.msra.mxu1 %v4829_v22 }
  0xc8   : > { %1425 = vmatprep.subr.bf16.mxu1 %v4838_v24 }
  0xca   : > { %1084 = vmatmul.mubr.bf16.gmra.mrb[72].mxu1 %v5760_v55  ;;  %v5282_v55 = vld [vmem:[%s7771_s4 + $0x160] ss:$8 sps:$4 sm:$0xff]  }
  0xcb   : > { %1093 = vmatprep.mubr.bf16.mxu1 %v7777_v6  ;;  %1426 = vmatpush1.bf16.msra.mxu1 %v4837_v28  ;;  %v5330_v28 = vld [vmem:[%s7771_s4 + $0x1f0] ss:$8 sps:$4 sm:$0xff]  }
  0xcc   : > { %1427 = vmatprep.subr.bf16.mxu1 %v4846_v29  ;;  %3820 = vmatpush1.bf16.msra.mxu0 %v5282_v55 }
  0xcd   : > { %3821 = vmatprep.subr.bf16.mxu0 %v5287_v44 }
  0xcf   : > { %1428 = vmatpush1.bf16.msra.mxu1 %v4845_v33 }
  0xd0   : > { %1429 = vmatprep.subr.bf16.mxu1 %v4854_v34  ;;  %3822 = vmatpush1.bf16.msra.mxu0 %v5285_v43 }
  0xd1   : > { %3823 = vmatprep.subr.bf16.mxu0 %v5290_v45 }
  0xd2   : > { %1094 = vmatmul.mubr.bf16.gmra.mrb[76].mxu1 %v5777_v0  ;;  %v5288_v0 = vld [vmem:[%s7771_s4 + $0x180] ss:$8 sps:$4 sm:$0xff]  }
  0xd3   : > { %1103 = vmatprep.mubr.bf16.mxu1 %v7777_v6  ;;  %1430 = vmatpush1.bf16.msra.mxu1 %v4853_v39 }
  0xd4   : > { %1431 = vmatprep.subr.bf16.mxu1 %v4862_v40  ;;  %3824 = vmatpush1.bf16.msra.mxu0 %v5288_v0 }
  0xd5   : > { %3825 = vmatprep.subr.bf16.mxu0 %v5293_v47  ;;  %v5341_v47 = vld [vmem:[%s7771_s4 + $0x204] ss:$8 sps:$4 sm:$0xff]  }
  0xd7   : > { %1432 = vmatpush1.bf16.msra.mxu1 %v4861_v42 }
  0xd8   : > { %3614 = vmatprep.subr.bf16.mxu1 %v5302_v51 }
  0xda   : > { %1104 = vmatmul.mubr.bf16.gmra.mrb[80].mxu1 %v5782_v5  ;;  %v5291_v5 = vld [vmem:[%s7771_s4 + $0x190] ss:$8 sps:$4 sm:$0xff]  }
  0xdb   : > { %1113 = vmatprep.mubr.bf16.mxu1 %v7777_v6  ;;  %3826 = vmatpush1.bf16.msra.mxu0 %v5291_v5 }
  0xdc   : > { %3827 = vmatprep.subr.bf16.mxu0 %v5296_v49 }
  0xe2   : > { %1114 = vmatmul.mubr.bf16.gmra.mrb[84].mxu1 %v5787_v7  ;;  %v5294_v7 = vld [vmem:[%s7771_s4 + $0x1a0] ss:$8 sps:$4 sm:$0xff]  }
  0xe3   : > { %1123 = vmatprep.mubr.bf16.mxu1 %v7777_v6  ;;  %3828 = vmatpush1.bf16.msra.mxu0 %v5294_v7 }
  0xe4   : > { %3829 = vmatprep.subr.bf16.mxu0 %v5299_v50 }
  0xea   : > { %1124 = vmatmul.mubr.bf16.gmra.mrb[88].mxu1 %v5792_v8  ;;  %v5297_v8 = vld [vmem:[%s7771_s4 + $0x1b0] ss:$8 sps:$4 sm:$0xff]  }
  0xeb   : > { %1133 = vmatprep.mubr.bf16.mxu1 %v7777_v6  ;;  %3830 = vmatpush1.bf16.msra.mxu0 %v5297_v8 }
  0xec   : > { %3831 = vmatprep.subr.bf16.mxu0 %v5305_v52 }
  0xf2   : > { %1134 = vmatmul.mubr.bf16.gmra.mrb[92].mxu1 %v5797_v9  ;;  %v5303_v9 = vld [vmem:[%s7771_s4 + $0x1c0] ss:$8 sps:$4 sm:$0xff]  }
  0xf3   : > { %1143 = vmatprep.mubr.bf16.mxu1 %v7777_v6  ;;  %3832 = vmatpush1.bf16.msra.mxu0 %v5303_v9 }
  0xf4   : > { %3833 = vmatprep.subr.bf16.mxu0 %v5314_v57 }
  0xfa   : > { %1144 = vmatmul.mubr.bf16.gmra.mrb[96].mxu1 %v5808_v14  ;;  %v5312_v14 = vld [vmem:[%s7771_s4 + $0x1d0] ss:$8 sps:$4 sm:$0xff]  }
  0xfb   : > { %1153 = vmatprep.mubr.bf16.mxu1 %v7777_v6  ;;  %3834 = vmatpush1.bf16.msra.mxu0 %v5312_v14 }
  0xfc   : > { %3835 = vmatprep.subr.bf16.mxu0 %v5323_v10 }
  0xff   : > { %3836 = vmatpush1.bf16.msra.mxu0 %v5321_v4 }
 0x100   : > { %3837 = vmatprep.subr.bf16.mxu0 %v5332_v25 }
 0x102   : > { %1154 = vmatmul.mubr.bf16.gmra.mrb[100].mxu1 %v5825_v23  ;;  %v6083_v23 = vld [vmem:[%s7769_s2] sm:$0xff] }
 0x103   : > { %1163 = vmatprep.mubr.bf16.mxu1 %v7777_v6  ;;  %v6094_v63 = vrot.slane %v6083_v23, %v6075_v59  ;;  %v6099_v1 = vrot.slane %v6083_v23, %v6078_v60  ;;  %3838 = vmatpush1.bf16.msra.mxu0 %v5330_v28 }
 0x104   : > { %4000 = vmatprep.subr.bf16.mxu0 %v5341_v47 }
 0x10a   : > { %1164 = vmatmul.mubr.bf16.gmra.mrb[104].mxu1 %v5842_v32  ;;  %v6108_v32 = vrot.slane %v6088_v62, %v6078_v60 }
 0x10b   : > { %1173 = vmatprep.mubr.bf16.mxu1 %v7777_v6 }
 0x10d   : > { %v872_v3 = vpop.f32.mrb[0].mxu1 }
 0x10e   : > { %v1652_v11 = vmul.f32 %v6094_v63, %v872_v3  ;;  %v874_v12 = vpop.f32.mrb[1].mxu1 }
 0x10f   : > { %v1653_v13 = vmul.f32 %v6099_v1, %v874_v12  ;;  %v876_v15 = vpop.f32.mrb[2].mxu1 }
 0x110   : > { %v1950_v16 = vadd.f32 %v6104_v2, %v1652_v11  ;;  %v1660_v17 = vmul.f32 %v6094_v63, %v876_v15  ;;  %v878_v37 = vpop.f32.mrb[3].mxu1 }
 0x111   : > { %v1951_v18 = vadd.f32 %v6108_v32, %v1653_v13  ;;  %v1661_v19 = vmul.f32 %v6099_v1, %v878_v37 }
 0x112   : > { %v1958_v20 = vadd.f32 %v6104_v2, %v1660_v17  ;;  %1174 = vmatmul.mubr.bf16.gmra.mrb[108].mxu1 %v5859_v41  ;;  %v2206_v22 = vmax.f32 %v1950_v16, 0.0 }
 0x113   : > { %v1959_v21 = vadd.f32 %v6108_v32, %v1661_v19  ;;  %1183 = vmatprep.mubr.bf16.mxu1 %v7777_v6  ;;  %v2207_v26 = vmax.f32 %v1951_v18, 0.0 }
 0x114   : > { %v2214_v24 = vmax.f32 %v1958_v20, 0.0 }
 0x115   : > { %v2215_v46 = vmax.f32 %v1959_v21, 0.0  ;;  %v882_v27 = vpop.f32.mrb[4].mxu1 }
 0x116   : > { %v6133_v29 = vpack.c.bf16 %v2214_v24, %v2206_v22  ;;  %v1668_v41 = vmul.f32 %v6094_v63, %v882_v27  ;;  %v884_v30 = vpop.f32.mrb[5].mxu1 }
 0x117   : > { %v1669_v31 = vmul.f32 %v6099_v1, %v884_v30  ;;  %v886_v33 = vpop.f32.mrb[6].mxu1  ;;  %v6137_v34 = vpack.c.bf16 %v2215_v46, %v2207_v26 }
 0x118   : > { %v1966_v35 = vadd.f32 %v6104_v2, %v1668_v41  ;;  %v1676_v36 = vmul.f32 %v6094_v63, %v886_v33  ;;  %v888_v55 = vpop.f32.mrb[7].mxu1 }
 0x119   : > { %v1967_v38 = vadd.f32 %v6108_v32, %v1669_v31  ;;  %v1677_v39 = vmul.f32 %v6099_v1, %v888_v55 }
 0x11a   : > { %v1974_v40 = vadd.f32 %v6104_v2, %v1676_v36  ;;  %1184 = vmatmul.mubr.bf16.gmra.mrb[112].mxu1 %v5870_v48  ;;  %v2222_v43 = vmax.f32 %v1966_v35, 0.0 }
 0x11b   : > { %v1975_v42 = vadd.f32 %v6108_v32, %v1677_v39  ;;  %1193 = vmatprep.mubr.bf16.mxu1 %v7777_v6  ;;  %v2223_v0 = vmax.f32 %v1967_v38, 0.0 }
 0x11c   : > { %v2230_v44 = vmax.f32 %v1974_v40, 0.0 }
 0x11d   : > { %v2231_v45 = vmax.f32 %v1975_v42, 0.0  ;;  %v892_v5 = vpop.f32.mrb[8].mxu1 }
 0x11e   : > { %v1684_v7 = vmul.f32 %v6094_v63, %v892_v5  ;;  %v894_v49 = vpop.f32.mrb[9].mxu1  ;;  %v6151_v8 = vpack.c.bf16 %v2230_v44, %v2222_v43 }
 0x11f   : > { %v1685_v48 = vmul.f32 %v6099_v1, %v894_v49  ;;  %v896_v50 = vpop.f32.mrb[10].mxu1  ;;  %v6154_v51 = vpack.c.bf16 %v2231_v45, %v2223_v0 }
 0x120   : > { %v1982_v9 = vadd.f32 %v6104_v2, %v1684_v7  ;;  %v1692_v52 = vmul.f32 %v6094_v63, %v896_v50  ;;  %v898_v53 = vpop.f32.mrb[11].mxu1 }
 0x121   : > { %v1983_v14 = vadd.f32 %v6108_v32, %v1685_v48  ;;  %v1693_v57 = vmul.f32 %v6099_v1, %v898_v53 }
 0x122   : > { %v1990_v3 = vadd.f32 %v6104_v2, %v1692_v52  ;;  %1194 = vmatmul.mubr.bf16.gmra.mrb[116].mxu1 %v5889_v54  ;;  %v2238_v10 = vmax.f32 %v1982_v9, 0.0 }
 0x123   : > { %v1991_v4 = vadd.f32 %v6108_v32, %v1693_v57  ;;  %1203 = vmatprep.mubr.bf16.mxu1 %v7777_v6  ;;  %v2239_v12 = vmax.f32 %v1983_v14, 0.0 }
 0x124   : > { %v2246_v11 = vmax.f32 %v1990_v3, 0.0 }
 0x125   : > { %v2247_v13 = vmax.f32 %v1991_v4, 0.0  ;;  %v902_v15 = vpop.f32.mrb[12].mxu1 }
 0x126   : > { %v1700_v16 = vmul.f32 %v6094_v63, %v902_v15  ;;  %v904_v17 = vpop.f32.mrb[13].mxu1  ;;  %v6165_v37 = vpack.c.bf16 %v2246_v11, %v2238_v10  ;;  %v5308_v11 = vld [vmem:[%s7771_s4 + $0x14] ss:$8 sps:$4 sm:$0xff]  }
 0x127   : > { %v1701_v18 = vmul.f32 %v6099_v1, %v904_v17  ;;  %v906_v19 = vpop.f32.mrb[14].mxu1  ;;  %v6168_v20 = vpack.c.bf16 %v2247_v13, %v2239_v12 }
 0x128   : > { %v1998_v54 = vadd.f32 %v6104_v2, %v1700_v16  ;;  %v1708_v21 = vmul.f32 %v6094_v63, %v906_v19  ;;  %v908_v22 = vpop.f32.mrb[15].mxu1  ;;  %v5456_v16 = vld [vmem:[%s5684_s20] sm:$0xff]  }
 0x129   : > { %v1999_v24 = vadd.f32 %v6108_v32, %v1701_v18  ;;  %v1709_v25 = vmul.f32 %v6099_v1, %v908_v22  ;;  %v5306_v18 = vld [vmem:[%s7771_s4 + $0x10] ss:$8 sps:$4 sm:$0xff]  }
 0x12a   : > { %v2006_v26 = vadd.f32 %v6104_v2, %v1708_v21  ;;  %1204 = vmatmul.mubr.bf16.gmra.mrb[120].mxu1 %v5902_v58  ;;  %v2254_v27 = vmax.f32 %v1998_v54, 0.0  ;;  %v5311_v21 = vld [vmem:[%s7771_s4 + $0x24] ss:$8 sps:$4 sm:$0xff]  }
 0x12b   : > { %v2007_v46 = vadd.f32 %v6108_v32, %v1709_v25  ;;  %1213 = vmatprep.mubr.bf16.mxu1 %v7777_v6  ;;  %v2255_v41 = vmax.f32 %v1999_v24, 0.0 }
 0x12c   : > { %v2262_v28 = vmax.f32 %v2006_v26, 0.0 }
 0x12d   : > { %v2263_v30 = vmax.f32 %v2007_v46, 0.0  ;;  %v912_v31 = vpop.f32.mrb[16].mxu1 }
 0x12e   : > { %v1716_v33 = vmul.f32 %v6094_v63, %v912_v31  ;;  %v914_v35 = vpop.f32.mrb[17].mxu1  ;;  %v6179_v36 = vpack.c.bf16 %v2262_v28, %v2254_v27 }
 0x12f   : > { %v1717_v55 = vmul.f32 %v6099_v1, %v914_v35  ;;  %v916_v38 = vpop.f32.mrb[18].mxu1  ;;  %v6182_v39 = vpack.c.bf16 %v2263_v30, %v2255_v41  ;;  %v5309_v30 = vld [vmem:[%s7771_s4 + $0x20] ss:$8 sps:$4 sm:$0xff]  }
 0x130   : > { %v2014_v58 = vadd.f32 %v6104_v2, %v1716_v33  ;;  %v1724_v40 = vmul.f32 %v6094_v63, %v916_v38  ;;  %v918_v42 = vpop.f32.mrb[19].mxu1  ;;  %v5317_v38 = vld [vmem:[%s7771_s4 + $0x34] ss:$8 sps:$4 sm:$0xff]  }
 0x131   : > { %v2015_v43 = vadd.f32 %v6108_v32, %v1717_v55  ;;  %v1725_v44 = vmul.f32 %v6099_v1, %v918_v42 }
 0x132   : > { %v2022_v0 = vadd.f32 %v6104_v2, %v1724_v40  ;;  %1214 = vmatmul.mubr.bf16.gmra.mrb[124].mxu1 %v5915_v61  ;;  %v2270_v5 = vmax.f32 %v2014_v58, 0.0  ;;  %v5300_v61 = vld [vmem:[%s7771_s4] ss:$8 sps:$4 sm:$0xff]  }
 0x133   : > { %v2023_v45 = vadd.f32 %v6108_v32, %v1725_v44  ;;  %1449 = vmatprep.mubr.bf16.mxu1 %v7777_v6  ;;  %v2271_v7 = vmax.f32 %v2015_v43, 0.0  ;;  %v5457_v43 = vld [vmem:[%s5684_s20 + $0x8] sm:$0xff]  }
 0x134   : > { %v2278_v47 = vmax.f32 %v2022_v0, 0.0  ;;  %v5315_v0 = vld [vmem:[%s7771_s4 + $0x30] ss:$8 sps:$4 sm:$0xff]  }
 0x135   : > { %v2279_v49 = vmax.f32 %v2023_v45, 0.0  ;;  %v922_v48 = vpop.f32.mrb[20].mxu1 }
 0x136   : > { %v1732_v50 = vmul.f32 %v6094_v63, %v922_v48  ;;  %v924_v9 = vpop.f32.mrb[21].mxu1  ;;  %v6193_v52 = vpack.c.bf16 %v2278_v47, %v2270_v5  ;;  %v5320_v47 = vld [vmem:[%s7771_s4 + $0x44] ss:$8 sps:$4 sm:$0xff]  }
 0x137   : > { %v1733_v53 = vmul.f32 %v6099_v1, %v924_v9  ;;  %v926_v14 = vpop.f32.mrb[22].mxu1  ;;  %v6199_v57 = vpack.c.bf16 %v2279_v49, %v2271_v7 }
 0x138   : > { %v2030_v3 = vadd.f32 %v6104_v2, %v1732_v50  ;;  %v1740_v4 = vmul.f32 %v6094_v63, %v926_v14  ;;  %v928_v10 = vpop.f32.mrb[23].mxu1 }
 0x139   : > { %v2031_v12 = vadd.f32 %v6108_v32, %v1733_v53  ;;  %v1741_v13 = vmul.f32 %v6099_v1, %v928_v10 }
 0x13a   : > { %v2038_v15 = vadd.f32 %v6104_v2, %v1740_v4  ;;  %1450 = vmatmul.mubr.bf16.vlgmr.msra.gmra.mrb[128].mxu1 %v5456_v16  ;;  %v2286_v19 = vmax.f32 %v2030_v3, 0.0  ;;  %v5318_v3 = vld [vmem:[%s7771_s4 + $0x40] ss:$8 sps:$4 sm:$0xff]  }
 0x13b   : > { %v2039_v17 = vadd.f32 %v6108_v32, %v1741_v13  ;;  %1459 = vmatprep.mubr.bf16.mxu1 %v7777_v6  ;;  %3615 = vmatpush1.bf16.msra.mxu1 %v5300_v61  ;;  %v2287_v22 = vmax.f32 %v2031_v12, 0.0  ;;  %v5326_v13 = vld [vmem:[%s7771_s4 + $0x54] ss:$8 sps:$4 sm:$0xff]  }
 0x13c   : > { %v2294_v54 = vmax.f32 %v2038_v15, 0.0  ;;  %3616 = vmatprep.subr.bf16.mxu1 %v5308_v11 }
 0x13d   : > { %v2295_v24 = vmax.f32 %v2039_v17, 0.0  ;;  %v932_v25 = vpop.f32.mrb[24].mxu1 }
 0x13e   : > { %v1748_v26 = vmul.f32 %v6094_v63, %v932_v25  ;;  %v934_v46 = vpop.f32.mrb[25].mxu1  ;;  %v6219_v27 = vpack.c.bf16 %v2294_v54, %v2286_v19  ;;  %v5324_v54 = vld [vmem:[%s7771_s4 + $0x50] ss:$8 sps:$4 sm:$0xff]  }
 0x13f   : > { %v1749_v28 = vmul.f32 %v6099_v1, %v934_v46  ;;  %v936_v41 = vpop.f32.mrb[26].mxu1  ;;  %3617 = vmatpush1.bf16.msra.mxu1 %v5306_v18  ;;  %v6225_v31 = vpack.c.bf16 %v2295_v24, %v2287_v22  ;;  %v5458_v18 = vld [vmem:[%s5684_s20 + $0x10] sm:$0xff]   ;;  %v5329_v24 = vld [vmem:[%s7771_s4 + $0x64] ss:$8 sps:$4 sm:$0xff]  }
 0x140   : > { %v2046_v33 = vadd.f32 %v6104_v2, %v1748_v26  ;;  %v1756_v35 = vmul.f32 %v6094_v63, %v936_v41  ;;  %v938_v55 = vpop.f32.mrb[27].mxu1  ;;  %3618 = vmatprep.subr.bf16.mxu1 %v5311_v21 }
 0x141   : > { %v2047_v58 = vadd.f32 %v6108_v32, %v1749_v28  ;;  %v1757_v40 = vmul.f32 %v6099_v1, %v938_v55  ;;  %v5327_v55 = vld [vmem:[%s7771_s4 + $0x60] ss:$8 sps:$4 sm:$0xff]  }
 0x142   : > { %v2054_v42 = vadd.f32 %v6104_v2, %v1756_v35  ;;  %1460 = vmatmul.mubr.bf16.gmra.mrb[132].mxu1 %v5457_v43  ;;  %v2302_v45 = vmax.f32 %v2046_v33, 0.0  ;;  %v5335_v43 = vld [vmem:[%s7771_s4 + $0x74] ss:$8 sps:$4 sm:$0xff]  }
 0x143   : > { %v2055_v44 = vadd.f32 %v6108_v32, %v1757_v40  ;;  %1469 = vmatprep.mubr.bf16.mxu1 %v7777_v6  ;;  %3619 = vmatpush1.bf16.msra.mxu1 %v5309_v30  ;;  %v2303_v7 = vmax.f32 %v2047_v58, 0.0 }
 0x144   : > { %v2310_v5 = vmax.f32 %v2054_v42, 0.0  ;;  %3620 = vmatprep.subr.bf16.mxu1 %v5317_v38 }
 0x145   : > { %v2311_v49 = vmax.f32 %v2055_v44, 0.0  ;;  %v942_v48 = vpop.f32.mrb[28].mxu1 }
 0x146   : > { %v1764_v50 = vmul.f32 %v6094_v63, %v942_v48  ;;  %v944_v9 = vpop.f32.mrb[29].mxu1  ;;  %v6245_v53 = vpack.c.bf16 %v2310_v5, %v2302_v45  ;;  %v5459_v5 = vld [vmem:[%s5684_s20 + $0x18] sm:$0xff]  }
 0x147   : > { %v1765_v14 = vmul.f32 %v6099_v1, %v944_v9  ;;  %v946_v61 = vpop.f32.mrb[30].mxu1  ;;  %3621 = vmatpush1.bf16.msra.mxu1 %v5315_v0  ;;  %v6251_v4 = vpack.c.bf16 %v2311_v49, %v2303_v7  ;;  %v5333_v7 = vld [vmem:[%s7771_s4 + $0x70] ss:$8 sps:$4 sm:$0xff]  }
 0x148   : > { %v2062_v10 = vadd.f32 %v6104_v2, %v1764_v50  ;;  %v1772_v11 = vmul.f32 %v6094_v63, %v946_v61  ;;  %v948_v12 = vpop.f32.mrb[31].mxu1  ;;  %3622 = vmatprep.subr.bf16.mxu1 %v5320_v47  ;;  %v5338_v50 = vld [vmem:[%s7771_s4 + $0x84] ss:$8 sps:$4 sm:$0xff]  }
 0x149   : > { %v2063_v15 = vadd.f32 %v6108_v32, %v1765_v14  ;;  %v1773_v16 = vmul.f32 %v6099_v1, %v948_v12 }
 0x14a   : > { %v2070_v17 = vadd.f32 %v6104_v2, %v1772_v11  ;;  %1470 = vmatmul.mubr.bf16.gmra.mrb[136].mxu1 %v5458_v18  ;;  %v2318_v21 = vmax.f32 %v2062_v10, 0.0 }
 0x14b   : > { %v2071_v19 = vadd.f32 %v6108_v32, %v1773_v16  ;;  %1479 = vmatprep.mubr.bf16.mxu1 %v7777_v6  ;;  %3623 = vmatpush1.bf16.msra.mxu1 %v5318_v3  ;;  %v2319_v25 = vmax.f32 %v2063_v15, 0.0  ;;  %v5336_v15 = vld [vmem:[%s7771_s4 + $0x80] ss:$8 sps:$4 sm:$0xff]  }
 0x14c   : > { %v2326_v22 = vmax.f32 %v2070_v17, 0.0  ;;  %3624 = vmatprep.subr.bf16.mxu1 %v5326_v13 }
 0x14d   : > { %v2327_v26 = vmax.f32 %v2071_v19, 0.0  ;;  %v952_v46 = vpop.f32.mrb[32].mxu1 }
 0x14e   : > { %v1780_v28 = vmul.f32 %v6094_v63, %v952_v46  ;;  %v954_v41 = vpop.f32.mrb[33].mxu1  ;;  %v6271_v30 = vpack.c.bf16 %v2326_v22, %v2318_v21  ;;  %v5342_v46 = vld [vmem:[%s7771_s4 + $0x90] ss:$8 sps:$4 sm:$0xff]  }
 0x14f   : > { %v1781_v33 = vmul.f32 %v6099_v1, %v954_v41  ;;  %v956_v35 = vpop.f32.mrb[34].mxu1  ;;  %3625 = vmatpush1.bf16.msra.mxu1 %v5324_v54  ;;  %v6277_v38 = vpack.c.bf16 %v2327_v26, %v2319_v25  ;;  %v5344_v54 = vld [vmem:[%s7771_s4 + $0x94] ss:$8 sps:$4 sm:$0xff]   ;;  %v5460_v25 = vld [vmem:[%s5684_s20 + $0x20] sm:$0xff]  }
 0x150   : > { %v2078_v58 = vadd.f32 %v6104_v2, %v1780_v28  ;;  %v1788_v40 = vmul.f32 %v6094_v63, %v956_v35  ;;  %v958_v42 = vpop.f32.mrb[35].mxu1  ;;  %3626 = vmatprep.subr.bf16.mxu1 %v5329_v24 }
 0x151   : > { %v2079_v44 = vadd.f32 %v6108_v32, %v1781_v33  ;;  %v1789_v0 = vmul.f32 %v6099_v1, %v958_v42  ;;  %v5347_v33 = vld [vmem:[%s7771_s4 + $0xa4] ss:$8 sps:$4 sm:$0xff]  }
 0x152   : > { %v2086_v45 = vadd.f32 %v6104_v2, %v1788_v40  ;;  %1480 = vmatmul.mubr.bf16.gmra.mrb[140].mxu1 %v5459_v5  ;;  %v2334_v49 = vmax.f32 %v2078_v58, 0.0 }
 0x153   : > { %v2087_v47 = vadd.f32 %v6108_v32, %v1789_v0  ;;  %1489 = vmatprep.mubr.bf16.mxu1 %v7777_v6  ;;  %3627 = vmatpush1.bf16.msra.mxu1 %v5327_v55  ;;  %v2335_v9 = vmax.f32 %v2079_v44, 0.0 }
 0x154   : > { %v2342_v48 = vmax.f32 %v2086_v45, 0.0  ;;  %3628 = vmatprep.subr.bf16.mxu1 %v5335_v43  ;;  %v5345_v45 = vld [vmem:[%s7771_s4 + $0xa0] ss:$8 sps:$4 sm:$0xff]  }
 0x155   : > { %v2343_v14 = vmax.f32 %v2087_v47, 0.0  ;;  %v962_v61 = vpop.f32.mrb[36].mxu1 }
 0x156   : > { %v1796_v3 = vmul.f32 %v6094_v63, %v962_v61  ;;  %v964_v10 = vpop.f32.mrb[37].mxu1  ;;  %v6297_v11 = vpack.c.bf16 %v2342_v48, %v2334_v49  ;;  %v5353_v48 = vld [vmem:[%s7771_s4 + $0xb4] ss:$8 sps:$4 sm:$0xff]   ;;  %v5461_v61 = vld [vmem:[%s5684_s20 + $0x28] sm:$0xff]  }
 0x157   : > { %v1797_v12 = vmul.f32 %v6099_v1, %v964_v10  ;;  %v966_v13 = vpop.f32.mrb[38].mxu1  ;;  %3629 = vmatpush1.bf16.msra.mxu1 %v5333_v7  ;;  %v6303_v16 = vpack.c.bf16 %v2343_v14, %v2335_v9  ;;  %v5351_v10 = vld [vmem:[%s7771_s4 + $0xb0] ss:$8 sps:$4 sm:$0xff]  }
 0x158   : > { %v2094_v17 = vadd.f32 %v6104_v2, %v1796_v3  ;;  %v1804_v18 = vmul.f32 %v6094_v63, %v966_v13  ;;  %v968_v19 = vpop.f32.mrb[39].mxu1  ;;  %3630 = vmatprep.subr.bf16.mxu1 %v5338_v50 }
 0x159   : > { %v2095_v21 = vadd.f32 %v6108_v32, %v1797_v12  ;;  %v1805_v22 = vmul.f32 %v6099_v1, %v968_v19 }
 0x15a   : > { %v2102_v24 = vadd.f32 %v6104_v2, %v1804_v18  ;;  %1490 = vmatmul.mubr.bf16.gmra.mrb[144].mxu1 %v5460_v25  ;;  %v2350_v28 = vmax.f32 %v2094_v17, 0.0 }
 0x15b   : > { %v2103_v26 = vadd.f32 %v6108_v32, %v1805_v22  ;;  %1499 = vmatprep.mubr.bf16.mxu1 %v7777_v6  ;;  %3631 = vmatpush1.bf16.msra.mxu1 %v5336_v15  ;;  %v2351_v35 = vmax.f32 %v2095_v21, 0.0  ;;  %v5356_v15 = vld [vmem:[%s7771_s4 + $0xc4] ss:$8 sps:$4 sm:$0xff]  }
 0x15c   : > { %v2358_v41 = vmax.f32 %v2102_v24, 0.0  ;;  %3632 = vmatprep.subr.bf16.mxu1 %v5344_v54 }
 0x15d   : > { %v2359_v55 = vmax.f32 %v2103_v26, 0.0  ;;  %v972_v58 = vpop.f32.mrb[40].mxu1  ;;  %v5354_v26 = vld [vmem:[%s7771_s4 + $0xc0] ss:$8 sps:$4 sm:$0xff]  }
 0x15e   : > { %v1812_v40 = vmul.f32 %v6094_v63, %v972_v58  ;;  %v974_v42 = vpop.f32.mrb[41].mxu1  ;;  %v6323_v43 = vpack.c.bf16 %v2358_v41, %v2350_v28 }
 0x15f   : > { %v1813_v44 = vmul.f32 %v6099_v1, %v974_v42  ;;  %v976_v0 = vpop.f32.mrb[42].mxu1  ;;  %3633 = vmatpush1.bf16.msra.mxu1 %v5342_v46  ;;  %v6329_v5 = vpack.c.bf16 %v2359_v55, %v2351_v35  ;;  %v5362_v35 = vld [vmem:[%s7771_s4 + $0xd4] ss:$8 sps:$4 sm:$0xff]  }
 0x160   : > { %v2110_v47 = vadd.f32 %v6104_v2, %v1812_v40  ;;  %v1820_v7 = vmul.f32 %v6094_v63, %v976_v0  ;;  %v978_v49 = vpop.f32.mrb[43].mxu1  ;;  %3634 = vmatprep.subr.bf16.mxu1 %v5347_v33  ;;  %v5462_v42 = vld [vmem:[%s5684_s20 + $0x30] sm:$0xff]   ;;  %v1630_v0 = vsub.s32 4, %v6063_v56 }
 0x161   : > { %v2111_v50 = vadd.f32 %v6108_v32, %v1813_v44  ;;  %v1821_v9 = vmul.f32 %v6099_v1, %v978_v49  ;;  %v1258_v44 = vpop.f32.mrb[0].mxu0 }
 0x162   : > { %v2118_v14 = vadd.f32 %v6104_v2, %v1820_v7  ;;  %1500 = vmatmul.mubr.bf16.gmra.mrb[148].mxu1 %v5461_v61  ;;  %v2366_v12 = vmax.f32 %v2110_v47, 0.0  ;;  %v5360_v7 = vld [vmem:[%s7771_s4 + $0xd0] ss:$8 sps:$4 sm:$0xff]   ;;  %v1260_v49 = vpop.f32.mrb[1].mxu0 }
 0x163   : > { %v2119_v3 = vadd.f32 %v6108_v32, %v1821_v9  ;;  %1509 = vmatprep.mubr.bf16.mxu1 %v7777_v6  ;;  %3635 = vmatpush1.bf16.msra.mxu1 %v5345_v45  ;;  %v2367_v17 = vmax.f32 %v2111_v50, 0.0  ;;  %v1634_v45 = vsub.s32 5, %v6063_v56  ;;  %v5365_v9 = vld [vmem:[%s7771_s4 + $0xe4] ss:$8 sps:$4 sm:$0xff]  }
 0x164   : > { %v2374_v13 = vmax.f32 %v2118_v14, 0.0  ;;  %3636 = vmatprep.subr.bf16.mxu1 %v5353_v48  ;;  %v6377_v14 = vrot.slane %v6083_v23, %v1630_v0 }
 0x165   : > { %v2375_v18 = vmax.f32 %v2119_v3, 0.0  ;;  %v982_v19 = vpop.f32.mrb[44].mxu1  ;;  %v6380_v61 = vrot.slane %v6083_v23, %v1634_v45  ;;  %v1262_v3 = vpop.f32.mrb[2].mxu0 }
 0x166   : > { %v1828_v54 = vmul.f32 %v6094_v63, %v982_v19  ;;  %v984_v21 = vpop.f32.mrb[45].mxu1  ;;  %v6349_v22 = vpack.c.bf16 %v2374_v13, %v2366_v12 }
 0x167   : > { %v1829_v24 = vmul.f32 %v6099_v1, %v984_v21  ;;  %v986_v25 = vpop.f32.mrb[46].mxu1  ;;  %3637 = vmatpush1.bf16.msra.mxu1 %v5351_v10  ;;  %v6355_v46 = vpack.c.bf16 %v2375_v18, %v2367_v17  ;;  %v6386_v17 = vrot.slane %v6088_v62, %v1634_v45  ;;  %v1657_v21 = vmul.f32 %v6380_v61, %v1260_v49 }
 0x168   : > { %v2126_v28 = vadd.f32 %v6104_v2, %v1828_v54  ;;  %v1836_v41 = vmul.f32 %v6094_v63, %v986_v25  ;;  %v988_v33 = vpop.f32.mrb[47].mxu1  ;;  %3638 = vmatprep.subr.bf16.mxu1 %v5356_v15  ;;  %v6383_v15 = vrot.slane %v6088_v62, %v1630_v0  ;;  %v1656_v54 = vmul.f32 %v6377_v14, %v1258_v44  ;;  %v1264_v25 = vpop.f32.mrb[3].mxu0  ;;  %v5371_v44 = vld [vmem:[%s7771_s4 + $0xf4] ss:$8 sps:$4 sm:$0xff]  }
 0x169   : > { %v2127_v55 = vadd.f32 %v6108_v32, %v1829_v24  ;;  %v1837_v58 = vmul.f32 %v6099_v1, %v988_v33  ;;  %v1664_v24 = vmul.f32 %v6377_v14, %v1262_v3  ;;  %v1665_v33 = vmul.f32 %v6380_v61, %v1264_v25  ;;  %v5463_v3 = vld [vmem:[%s5684_s20 + $0x38] sm:$0xff]  }
 0x16a   : > { %v2134_v40 = vadd.f32 %v6104_v2, %v1836_v41  ;;  %1510 = vmatmul.mubr.bf16.gmra.mrb[152].mxu1 %v5462_v42  ;;  %v2382_v48 = vmax.f32 %v2126_v28, 0.0  ;;  %v5363_v41 = vld [vmem:[%s7771_s4 + $0xe0] ss:$8 sps:$4 sm:$0xff]   ;;  %v1954_v0 = vadd.f32 %v6383_v15, %v1656_v54  ;;  %v1955_v45 = vadd.f32 %v6386_v17, %v1657_v21 }
 0x16b   : > { %v2135_v47 = vadd.f32 %v6108_v32, %v1837_v58  ;;  %1519 = vmatprep.mubr.bf16.mxu1 %v7777_v6  ;;  %3639 = vmatpush1.bf16.msra.mxu1 %v5354_v26  ;;  %v2383_v10 = vmax.f32 %v2127_v55, 0.0  ;;  %v1962_v49 = vadd.f32 %v6383_v15, %v1664_v24 }
 0x16c   : > { %v2390_v50 = vmax.f32 %v2134_v40, 0.0  ;;  %3640 = vmatprep.subr.bf16.mxu1 %v5362_v35 }
 0x16d   : > { %v2391_v12 = vmax.f32 %v2135_v47, 0.0  ;;  %v992_v13 = vpop.f32.mrb[48].mxu1 }
 0x16e   : > { %v1844_v18 = vmul.f32 %v6094_v63, %v992_v13  ;;  %v994_v19 = vpop.f32.mrb[49].mxu1  ;;  %v6399_v55 = vpack.c.bf16 %v2390_v50, %v2382_v48  ;;  %v1963_v48 = vadd.f32 %v6386_v17, %v1665_v33 }
 0x16f   : > { %v1845_v26 = vmul.f32 %v6099_v1, %v994_v19  ;;  %v996_v28 = vpop.f32.mrb[50].mxu1  ;;  %3641 = vmatpush1.bf16.msra.mxu1 %v5360_v7  ;;  %v6397_v35 = vpack.c.bf16 %v2391_v12, %v2383_v10  ;;  %v2211_v10 = vmax.f32 %v1955_v45, 0.0  ;;  %v1268_v12 = vpop.f32.mrb[4].mxu0  ;;  %v2218_v19 = vmax.f32 %v1962_v49, 0.0 }
 0x170   : > { %v2142_v58 = vadd.f32 %v6104_v2, %v1844_v18  ;;  %v1852_v40 = vmul.f32 %v6094_v63, %v996_v28  ;;  %v998_v42 = vpop.f32.mrb[51].mxu1  ;;  %3642 = vmatprep.subr.bf16.mxu1 %v5365_v9  ;;  %v2210_v9 = vmax.f32 %v1954_v0, 0.0  ;;  %v5369_v18 = vld [vmem:[%s7771_s4 + $0xf0] ss:$8 sps:$4 sm:$0xff]   ;;  %v2219_v54 = vmax.f32 %v1963_v48, 0.0  ;;  %v1270_v21 = vpop.f32.mrb[5].mxu0 }
 0x171   : > { %v2143_v47 = vadd.f32 %v6108_v32, %v1845_v26  ;;  %v1853_v7 = vmul.f32 %v6099_v1, %v998_v42  ;;  %v1272_v28 = vpop.f32.mrb[6].mxu0  ;;  %v1672_v0 = vmul.f32 %v6377_v14, %v1268_v12 }
 0x172   : > { %v2150_v50 = vadd.f32 %v6104_v2, %v1852_v40  ;;  %1520 = vmatmul.mubr.bf16.gmra.mrb[156].mxu1 %v5463_v3  ;;  %v2398_v24 = vmax.f32 %v2142_v58, 0.0  ;;  %v6419_v42 = vpack.c.bf16 %v2218_v19, %v2210_v9  ;;  %v1680_v49 = vmul.f32 %v6377_v14, %v1272_v28  ;;  %v1274_v48 = vpop.f32.mrb[7].mxu0 }
 0x173   : > { %v2151_v13 = vadd.f32 %v6108_v32, %v1853_v7  ;;  %1529 = vmatprep.mubr.bf16.mxu1 %v7777_v6  ;;  %3643 = vmatpush1.bf16.msra.mxu1 %v5363_v41  ;;  %v2399_v25 = vmax.f32 %v2143_v47, 0.0  ;;  %v1673_v41 = vmul.f32 %v6380_v61, %v1270_v21  ;;  %v6425_v3 = vpack.c.bf16 %v2219_v54, %v2211_v10 }
 0x174   : > { %v2406_v26 = vmax.f32 %v2150_v50, 0.0  ;;  %3644 = vmatprep.subr.bf16.mxu1 %v5371_v44  ;;  %7785 = vst [vmem:[#allocation8_spill] sm:$0xff] %v6419_v42  ;;  %v1970_v50 = vadd.f32 %v6383_v15, %v1672_v0  ;;  %v1681_v12 = vmul.f32 %v6380_v61, %v1274_v48  ;;  %v1978_v10 = vadd.f32 %v6383_v15, %v1680_v49 }
 0x175   : > { %v2407_v33 = vmax.f32 %v2151_v13, 0.0  ;;  %v1002_v40 = vpop.f32.mrb[52].mxu1  ;;  %7786 = vst [vmem:[#allocation9_spill] sm:$0xff] %v6425_v3  ;;  %v1971_v9 = vadd.f32 %v6386_v17, %v1673_v41 }
 0x176   : > { %v1860_v45 = vmul.f32 %v6094_v63, %v1002_v40  ;;  %v1004_v7 = vpop.f32.mrb[53].mxu1  ;;  %v6427_v58 = vpack.c.bf16 %v2406_v26, %v2398_v24  ;;  %v5464_v40 = vld [vmem:[%s5684_s20 + $0x40] sm:$0xff]   ;;  %v2234_v41 = vmax.f32 %v1978_v10, 0.0 }
 0x177   : > { %v1861_v44 = vmul.f32 %v6099_v1, %v1004_v7  ;;  %v1006_v47 = vpop.f32.mrb[54].mxu1  ;;  %3645 = vmatpush1.bf16.msra.mxu1 %v5369_v18  ;;  %v6436_v54 = vpack.c.bf16 %v2407_v33, %v2399_v25  ;;  %v2226_v18 = vmax.f32 %v1970_v50, 0.0  ;;  %v2227_v0 = vmax.f32 %v1971_v9, 0.0  ;;  %v1278_v7 = vpop.f32.mrb[8].mxu0 }
 0x178   : > { %7787 = vst [vmem:[#allocation10_spill] sm:$0xff] %v6427_v58  ;;  %v2158_v13 = vadd.f32 %v6104_v2, %v1860_v45  ;;  %v1868_v19 = vmul.f32 %v6094_v63, %v1006_v47  ;;  %v1008_v21 = vpop.f32.mrb[55].mxu1  ;;  %v1979_v45 = vadd.f32 %v6386_v17, %v1681_v12  ;;  %v1280_v25 = vpop.f32.mrb[9].mxu0 }
 0x179   : > { %v2159_v24 = vadd.f32 %v6108_v32, %v1861_v44  ;;  %v1869_v26 = vmul.f32 %v6099_v1, %v1008_v21  ;;  %v1282_v21 = vpop.f32.mrb[10].mxu0  ;;  %v1689_v9 = vmul.f32 %v6380_v61, %v1280_v25  ;;  %v6447_v10 = vpack.c.bf16 %v2234_v41, %v2226_v18 }
 0x17a   : > { %v2166_v28 = vadd.f32 %v6104_v2, %v1868_v19  ;;  %1530 = vmatmul.mubr.bf16.gmra.mrb[160].mxu1 %v5464_v40  ;;  %v2414_v33 = vmax.f32 %v2158_v13, 0.0  ;;  %v2235_v47 = vmax.f32 %v1979_v45, 0.0  ;;  %v1688_v19 = vmul.f32 %v6377_v14, %v1278_v7 }
 0x17b   : > { %v2167_v48 = vadd.f32 %v6108_v32, %v1869_v26  ;;  %1539 = vmatprep.mubr.bf16.mxu1 %v7777_v6  ;;  %v2415_v49 = vmax.f32 %v2159_v24, 0.0  ;;  %7788 = vst [vmem:[#allocation11_spill] sm:$0xff] %v6447_v10  ;;  %v1696_v26 = vmul.f32 %v6377_v14, %v1282_v21  ;;  %v1284_v6 = vpop.f32.mrb[11].mxu0  ;;  %v1987_v7 = vadd.f32 %v6386_v17, %v1689_v9 }
 0x17c   : > { %v2422_v44 = vmax.f32 %v2166_v28, 0.0  ;;  %v6451_v59 = vpack.c.bf16 %v2235_v47, %v2227_v0  ;;  %v1986_v45 = vadd.f32 %v6383_v15, %v1688_v19  ;;  %v1697_v18 = vmul.f32 %v6380_v61, %v1284_v6  ;;  %v5465_v19 = vld [vmem:[%s5684_s20 + $0x48] sm:$0xff]  }
 0x17d   : > { %v2423_v50 = vmax.f32 %v2167_v48, 0.0  ;;  %v1012_v60 = vpop.f32.mrb[56].mxu1  ;;  %v1994_v0 = vadd.f32 %v6383_v15, %v1696_v26  ;;  %v2243_v9 = vmax.f32 %v1987_v7, 0.0  ;;  %v7792_v10 = vmov 0  }
 0x17e   : > { %v1876_v12 = vmul.f32 %v6094_v63, %v1012_v60  ;;  %v1014_v40 = vpop.f32.mrb[57].mxu1  ;;  %7789 = vst [vmem:[#allocation12_spill] sm:$0xff] %v6451_v59  ;;  %v6453_v13 = vpack.c.bf16 %v2422_v44, %v2414_v33  ;;  %v2242_v47 = vmax.f32 %v1986_v45, 0.0 }
 0x17f   : > { %v1877_v24 = vmul.f32 %v6099_v1, %v1014_v40  ;;  %v1016_v28 = vpop.f32.mrb[58].mxu1  ;;  %v6462_v25 = vpack.c.bf16 %v2423_v50, %v2415_v49  ;;  %v2250_v6 = vmax.f32 %v1994_v0, 0.0  ;;  %v1288_v40 = vpop.f32.mrb[12].mxu0  ;;  %v1622_v49 = vsub.s32 2, %v6063_v56 }
 0x180   : > { %7790 = vst [vmem:[#allocation13_spill] sm:$0xff] %v6453_v13  ;;  %v2174_v60 = vadd.f32 %v6104_v2, %v1876_v12  ;;  %v1884_v41 = vmul.f32 %v6094_v63, %v1016_v28  ;;  %v1018_v48 = vpop.f32.mrb[59].mxu1  ;;  %v1995_v12 = vadd.f32 %v6386_v17, %v1697_v18  ;;  %v1626_v50 = vsub.s32 3, %v6063_v56  ;;  %v1290_v26 = vpop.f32.mrb[13].mxu0 }
 0x181   : > { %7791 = vst [vmem:[#allocation14_spill] sm:$0xff] %v6462_v25  ;;  %v2175_v33 = vadd.f32 %v6108_v32, %v1877_v24  ;;  %v1885_v44 = vmul.f32 %v6099_v1, %v1018_v48  ;;  %v1292_v13 = vpop.f32.mrb[14].mxu0  ;;  %v1704_v0 = vmul.f32 %v6377_v14, %v1288_v40  ;;  %v1705_v18 = vmul.f32 %v6380_v61, %v1290_v26 }
 0x182   : > { %v2182_v21 = vadd.f32 %v6104_v2, %v1884_v41  ;;  %1540 = vmatmul.mubr.bf16.gmra.mrb[164].mxu1 %v5465_v19  ;;  %v2430_v24 = vmax.f32 %v2174_v60, 0.0  ;;  %v2251_v41 = vmax.f32 %v1995_v12, 0.0  ;;  %v6475_v59 = vpack.c.bf16 %v2250_v6, %v2242_v47  ;;  %v1294_v58 = vpop.f32.mrb[15].mxu0 }
 0x183   : > { %v2183_v28 = vadd.f32 %v6108_v32, %v1885_v44  ;;  %1549 = vmatprep.mubr.bf16.mxu1 %v7792_v10  ;;  %v2431_v45 = vmax.f32 %v2175_v33, 0.0  ;;  %v1712_v42 = vmul.f32 %v6377_v14, %v1292_v13  ;;  %v2002_v12 = vadd.f32 %v6383_v15, %v1704_v0 }
 0x184   : > { %v2438_v48 = vmax.f32 %v2182_v21, 0.0  ;;  %v6479_v3 = vpack.c.bf16 %v2251_v41, %v2243_v9  ;;  %v2003_v40 = vadd.f32 %v6386_v17, %v1705_v18  ;;  %v1713_v47 = vmul.f32 %v6380_v61, %v1294_v58  ;;  %v5466_v58 = vld [vmem:[%s5684_s20 + $0x50] sm:$0xff]  }
 0x185   : > { %v2439_v19 = vmax.f32 %v2183_v28, 0.0  ;;  %v1022_v7 = vpop.f32.mrb[60].mxu1  ;;  %v2010_v9 = vadd.f32 %v6383_v15, %v1712_v42  ;;  %v2258_v41 = vmax.f32 %v2002_v12, 0.0 }
 0x186   : > { %v1892_v44 = vmul.f32 %v6094_v63, %v1022_v7  ;;  %v1024_v25 = vpop.f32.mrb[61].mxu1  ;;  %v6481_v60 = vpack.c.bf16 %v2438_v48, %v2430_v24  ;;  %v6495_v48 = vrot.slane %v6083_v23, %v1622_v49  ;;  %v2259_v0 = vmax.f32 %v2003_v40, 0.0 }
 0x187   : > { %v1893_v33 = vmul.f32 %v6099_v1, %v1024_v25  ;;  %v1026_v21 = vpop.f32.mrb[62].mxu1  ;;  %v6490_v26 = vpack.c.bf16 %v2439_v19, %v2431_v45  ;;  %v2266_v18 = vmax.f32 %v2010_v9, 0.0  ;;  %v6502_v45 = vrot.slane %v6088_v62, %v1622_v49 }
 0x188   : > { %v2190_v6 = vadd.f32 %v6104_v2, %v1892_v44  ;;  %v1900_v28 = vmul.f32 %v6094_v63, %v1026_v21  ;;  %v1028_v13 = vpop.f32.mrb[63].mxu1  ;;  %v2011_v63 = vadd.f32 %v6386_v17, %v1713_v47  ;;  %v1298_v44 = vpop.f32.mrb[16].mxu0  ;;  %v6508_v19 = vrot.slane %v6088_v62, %v1626_v50 }
 0x189   : > { %v2191_v24 = vadd.f32 %v6108_v32, %v1893_v33  ;;  %v1901_v25 = vmul.f32 %v6099_v1, %v1028_v13  ;;  %v6505_v1 = vrot.slane %v6083_v23, %v1626_v50 }
 0x18a   : > { %v2198_v7 = vadd.f32 %v6104_v2, %v1900_v28  ;;  %1550 = vmatmul.mubr.bf16.gmra.mrb[168].mxu1 %v5466_v58  ;;  %v1300_v2 = vpop.f32.mrb[17].mxu0  ;;  %v2446_v33 = vmax.f32 %v2190_v6, 0.0  ;;  %v2267_v40 = vmax.f32 %v2011_v63, 0.0  ;;  %v6519_v6 = vpack.c.bf16 %v2266_v18, %v2258_v41 }
 0x18b   : > { %v2199_v42 = vadd.f32 %v6108_v32, %v1901_v25  ;;  %1559 = vmatprep.mubr.bf16.mxu1 %v7792_v10  ;;  %v2447_v21 = vmax.f32 %v2191_v24, 0.0  ;;  %v1302_v47 = vpop.f32.mrb[18].mxu0  ;;  %v1720_v32 = vmul.f32 %v6377_v14, %v1298_v44  ;;  %v1721_v49 = vmul.f32 %v6380_v61, %v1300_v2 }
 0x18c   : > { %v2454_v12 = vmax.f32 %v2198_v7, 0.0  ;;  %v1728_v23 = vmul.f32 %v6377_v14, %v1302_v47  ;;  %v1304_v50 = vpop.f32.mrb[19].mxu0  ;;  %v6515_v25 = vpack.c.bf16 %v2267_v40, %v2259_v0  ;;  %7795 = vst [vmem:[#allocation17_spill] sm:$0xff] %v6519_v6 }
 0x18d   : > { %v2455_v28 = vmax.f32 %v2199_v42, 0.0  ;;  %v1065_v13 = vpop.f32.mrb[64].mxu1  ;;  %v2018_v63 = vadd.f32 %v6383_v15, %v1720_v32  ;;  %v2019_v44 = vadd.f32 %v6386_v17, %v1721_v49  ;;  %v5467_v32 = vld [vmem:[%s5684_s20 + $0x58] sm:$0xff]  }
 0x18e   : > { %v1654_v9 = vmul.f32 %v6495_v48, %v1065_v13  ;;  %v1067_v62 = vpop.f32.mrb[65].mxu1  ;;  %7793 = vst [vmem:[#allocation15_spill] sm:$0xff] %v6515_v25  ;;  %v6517_v58 = vpack.c.bf16 %v2454_v12, %v2446_v33  ;;  %v2026_v42 = vadd.f32 %v6383_v15, %v1728_v23  ;;  %v1729_v33 = vmul.f32 %v6380_v61, %v1304_v50 }
 0x18f   : > { %v1655_v24 = vmul.f32 %v6505_v1, %v1067_v62  ;;  %v1069_v7 = vpop.f32.mrb[66].mxu1  ;;  %v6528_v12 = vpack.c.bf16 %v2455_v28, %v2447_v21  ;;  %v2274_v40 = vmax.f32 %v2018_v63, 0.0  ;;  %v2275_v49 = vmax.f32 %v2019_v44, 0.0 }
 0x190   : > { %7794 = vst [vmem:[#allocation16_spill] sm:$0xff] %v6517_v58  ;;  %v1952_v2 = vadd.f32 %v6502_v45, %v1654_v9  ;;  %v1662_v47 = vmul.f32 %v6495_v48, %v1069_v7  ;;  %v1071_v0 = vpop.f32.mrb[67].mxu1  ;;  %v2282_v23 = vmax.f32 %v2026_v42, 0.0  ;;  %v2027_v9 = vadd.f32 %v6386_v17, %v1729_v33  ;;  %v1308_v7 = vpop.f32.mrb[20].mxu0 }
 0x191   : > { %7796 = vst [vmem:[#allocation18_spill] sm:$0xff] %v6528_v12  ;;  %v1953_v41 = vadd.f32 %v6508_v19, %v1655_v24  ;;  %v1663_v18 = vmul.f32 %v6505_v1, %v1071_v0  ;;  %v1736_v63 = vmul.f32 %v6377_v14, %v1308_v7 }
 0x192   : > { %v1960_v13 = vadd.f32 %v6502_v45, %v1662_v47  ;;  %1560 = vmatmul.mubr.bf16.gmra.mrb[172].mxu1 %v5467_v32  ;;  %v2208_v50 = vmax.f32 %v1952_v2, 0.0  ;;  %v2283_v28 = vmax.f32 %v2027_v9, 0.0  ;;  %v1310_v47 = vpop.f32.mrb[21].mxu0  ;;  %v6538_v58 = vpack.c.bf16 %v2282_v23, %v2274_v40  ;;  %v5339_v9 = vld [vmem:[%s7771_s4 + $0x200] ss:$8 sps:$4 sm:$0xff]  }
 0x193   : > { %v1961_v62 = vadd.f32 %v6508_v19, %v1663_v18  ;;  %1569 = vmatprep.mubr.bf16.mxu1 %v7792_v10  ;;  %v2209_v24 = vmax.f32 %v1953_v41, 0.0  ;;  %v1737_v18 = vmul.f32 %v6380_v61, %v1310_v47  ;;  %v1312_v32 = vpop.f32.mrb[22].mxu0  ;;  %v2034_v40 = vadd.f32 %v6383_v15, %v1736_v63 }
 0x194   : > { %v2216_v21 = vmax.f32 %v1960_v13, 0.0  ;;  %7797 = vst [vmem:[#allocation19_spill] sm:$0xff] %v6538_v58  ;;  %v6542_v25 = vpack.c.bf16 %v2283_v28, %v2275_v49  ;;  %v1744_v23 = vmul.f32 %v6377_v14, %v1312_v32  ;;  %v5350_v28 = vld [vmem:[%s7771_s4 + $0x214] ss:$8 sps:$4 sm:$0xff]  }
 0x195   : > { %v2217_v6 = vmax.f32 %v1961_v62, 0.0  ;;  %v1075_v0 = vpop.f32.mrb[68].mxu1  ;;  %v1314_v62 = vpop.f32.mrb[23].mxu0  ;;  %v2290_v63 = vmax.f32 %v2034_v40, 0.0 }
 0x196   : > { %v2464_v44 = vpack.c.bf16 %v2216_v21, %v2208_v50  ;;  %v1670_v42 = vmul.f32 %v6495_v48, %v1075_v0  ;;  %v1077_v33 = vpop.f32.mrb[69].mxu1  ;;  %7798 = vst [vmem:[#allocation20_spill] sm:$0xff] %v6542_v25  ;;  %v1745_v7 = vmul.f32 %v6380_v61, %v1314_v62  ;;  %v2042_v47 = vadd.f32 %v6383_v15, %v1744_v23 }
 0x197   : > { %v1671_v2 = vmul.f32 %v6505_v1, %v1077_v33  ;;  %v1079_v13 = vpop.f32.mrb[70].mxu1  ;;  %v2465_v41 = vpack.c.bf16 %v2217_v6, %v2209_v24  ;;  %v2035_v6 = vadd.f32 %v6386_v17, %v1737_v18  ;;  %v5468_v33 = vld [vmem:[%s5684_s20 + $0x60] sm:$0xff]  }
 0x198   : > { %v1968_v50 = vadd.f32 %v6502_v45, %v1670_v42  ;;  %v1678_v21 = vmul.f32 %v6495_v48, %v1079_v13  ;;  %v1081_v49 = vpop.f32.mrb[71].mxu1  ;;  %v2043_v13 = vadd.f32 %v6386_v17, %v1745_v7 }
 0x199   : > { %v1969_v24 = vadd.f32 %v6508_v19, %v1671_v2  ;;  %v1679_v0 = vmul.f32 %v6505_v1, %v1081_v49  ;;  %3839 = vmatprep.mubr.bf16.mxu0 %v2465_v41  ;;  %v2291_v32 = vmax.f32 %v2035_v6, 0.0  ;;  %v5348_v2 = vld [vmem:[%s7771_s4 + $0x210] ss:$8 sps:$4 sm:$0xff]   ;;  %v2298_v41 = vmax.f32 %v2042_v47, 0.0 }
 0x19a   : > { %v1976_v42 = vadd.f32 %v6502_v45, %v1678_v21  ;;  %1570 = vmatmul.mubr.bf16.gmra.mrb[176].mxu1 %v5468_v33  ;;  %3840 = vmatmul.mubr.bf16.vlgmr.msra.gmra.mrb[64].mxu0 %v2464_v44  ;;  %v2224_v40 = vmax.f32 %v1968_v50, 0.0  ;;  %v5359_v44 = vld [vmem:[%s7771_s4 + $0x224] ss:$8 sps:$4 sm:$0xff]   ;;  %v2299_v62 = vmax.f32 %v2043_v13, 0.0  ;;  %v1318_v21 = vpop.f32.mrb[24].mxu0 }
 0x19b   : > { %v1977_v18 = vadd.f32 %v6508_v19, %v1679_v0  ;;  %4001 = vmatpush1.bf16.msra.mxu0 %v5339_v9  ;;  %1579 = vmatprep.mubr.bf16.mxu1 %v7792_v10  ;;  %v2225_v49 = vmax.f32 %v1969_v24, 0.0  ;;  %v1752_v9 = vmul.f32 %v6377_v14, %v1318_v21  ;;  %v1320_v0 = vpop.f32.mrb[25].mxu0  ;;  %v6572_v33 = vpack.c.bf16 %v2298_v41, %v2290_v63 }
 0x19c   : > { %v2232_v23 = vmax.f32 %v1976_v42, 0.0  ;;  %4002 = vmatprep.subr.bf16.mxu0 %v5350_v28  ;;  %v1753_v28 = vmul.f32 %v6380_v61, %v1320_v0  ;;  %v1322_v42 = vpop.f32.mrb[26].mxu0  ;;  %v6576_v25 = vpack.c.bf16 %v2299_v62, %v2291_v32  ;;  %v5469_v0 = vld [vmem:[%s5684_s20 + $0x68] sm:$0xff]  }
 0x19d   : > { %v2233_v6 = vmax.f32 %v1977_v18, 0.0  ;;  %v1085_v7 = vpop.f32.mrb[72].mxu1  ;;  %7799 = vst [vmem:[#allocation21_spill] sm:$0xff] %v6572_v33  ;;  %v5357_v18 = vld [vmem:[%s7771_s4 + $0x220] ss:$8 sps:$4 sm:$0xff]   ;;  %v2050_v63 = vadd.f32 %v6383_v15, %v1752_v9  ;;  %v1760_v41 = vmul.f32 %v6377_v14, %v1322_v42 }
 0x19e   : > { %v1686_v58 = vmul.f32 %v6495_v48, %v1085_v7  ;;  %v1087_v47 = vpop.f32.mrb[73].mxu1  ;;  %v2472_v50 = vpack.c.bf16 %v2232_v23, %v2224_v40  ;;  %7800 = vst [vmem:[#allocation22_spill] sm:$0xff] %v6576_v25  ;;  %v1324_v40 = vpop.f32.mrb[27].mxu0  ;;  %v2051_v21 = vadd.f32 %v6386_v17, %v1753_v28  ;;  %v5366_v42 = vld [vmem:[%s7771_s4 + $0x230] ss:$8 sps:$4 sm:$0xff]  }
 0x19f   : > { %v1687_v13 = vmul.f32 %v6505_v1, %v1087_v47  ;;  %v1089_v12 = vpop.f32.mrb[74].mxu1  ;;  %v2473_v24 = vpack.c.bf16 %v2233_v6, %v2225_v49  ;;  %4003 = vmatpush1.bf16.msra.mxu0 %v5348_v2  ;;  %v5368_v2 = vld [vmem:[%s7771_s4 + $0x234] ss:$8 sps:$4 sm:$0xff]   ;;  %v1761_v49 = vmul.f32 %v6380_v61, %v1324_v40  ;;  %v2306_v9 = vmax.f32 %v2050_v63, 0.0  ;;  %v1328_v40 = vpop.f32.mrb[28].mxu0 }
 0x1a0   : > { %v1984_v23 = vadd.f32 %v6502_v45, %v1686_v58  ;;  %v1694_v32 = vmul.f32 %v6495_v48, %v1089_v12  ;;  %v1091_v62 = vpop.f32.mrb[75].mxu1  ;;  %4004 = vmatprep.subr.bf16.mxu0 %v5359_v44  ;;  %v2058_v58 = vadd.f32 %v6383_v15, %v1760_v41  ;;  %v2307_v44 = vmax.f32 %v2051_v21, 0.0 }
 0x1a1   : > { %v1985_v6 = vadd.f32 %v6508_v19, %v1687_v13  ;;  %v1695_v7 = vmul.f32 %v6505_v1, %v1091_v62  ;;  %3849 = vmatprep.mubr.bf16.mxu0 %v2473_v24  ;;  %v2059_v47 = vadd.f32 %v6386_v17, %v1761_v49  ;;  %v1768_v49 = vmul.f32 %v6377_v14, %v1328_v40 }
 0x1a2   : > { %v1992_v12 = vadd.f32 %v6502_v45, %v1694_v32  ;;  %1580 = vmatmul.mubr.bf16.gmra.mrb[180].mxu1 %v5469_v0  ;;  %3850 = vmatmul.mubr.bf16.gmra.mrb[68].mxu0 %v2472_v50  ;;  %v2314_v13 = vmax.f32 %v2058_v58, 0.0  ;;  %v2240_v24 = vmax.f32 %v1984_v23, 0.0  ;;  %v5374_v50 = vld [vmem:[%s7771_s4 + $0x244] ss:$8 sps:$4 sm:$0xff]  }
 0x1a3   : > { %v1993_v28 = vadd.f32 %v6508_v19, %v1695_v7  ;;  %1589 = vmatprep.mubr.bf16.mxu1 %v7792_v10  ;;  %4005 = vmatpush1.bf16.msra.mxu0 %v5357_v18  ;;  %v2315_v41 = vmax.f32 %v2059_v47, 0.0  ;;  %v2241_v32 = vmax.f32 %v1985_v6, 0.0  ;;  %v1330_v18 = vpop.f32.mrb[29].mxu0 }
 0x1a4   : > { %v2248_v63 = vmax.f32 %v1992_v12, 0.0  ;;  %4006 = vmatprep.subr.bf16.mxu0 %v5368_v2  ;;  %v6606_v7 = vpack.c.bf16 %v2314_v13, %v2306_v9  ;;  %v1769_v2 = vmul.f32 %v6380_v61, %v1330_v18  ;;  %v1332_v12 = vpop.f32.mrb[30].mxu0  ;;  %v2066_v9 = vadd.f32 %v6383_v15, %v1768_v49 }
 0x1a5   : > { %v2249_v62 = vmax.f32 %v1993_v28, 0.0  ;;  %v1095_v21 = vpop.f32.mrb[76].mxu1  ;;  %v6610_v33 = vpack.c.bf16 %v2315_v41, %v2307_v44  ;;  %v5372_v28 = vld [vmem:[%s7771_s4 + $0x240] ss:$8 sps:$4 sm:$0xff]   ;;  %v1776_v13 = vmul.f32 %v6377_v14, %v1332_v12  ;;  %v5375_v12 = vld [vmem:[%s7771_s4 + $0x250] ss:$8 sps:$4 sm:$0xff]  }
 0x1a6   : > { %7801 = vst [vmem:[#allocation23_spill] sm:$0xff] %v6606_v7  ;;  %v1702_v0 = vmul.f32 %v6495_v48, %v1095_v21  ;;  %v1097_v58 = vpop.f32.mrb[77].mxu1  ;;  %v2480_v23 = vpack.c.bf16 %v2248_v63, %v2240_v24  ;;  %v1334_v24 = vpop.f32.mrb[31].mxu0  ;;  %v2067_v40 = vadd.f32 %v6386_v17, %v1769_v2  ;;  %v2322_v49 = vmax.f32 %v2066_v9, 0.0 }
 0x1a7   : > { %v1703_v47 = vmul.f32 %v6505_v1, %v1097_v58  ;;  %v1099_v25 = vpop.f32.mrb[78].mxu1  ;;  %v2481_v6 = vpack.c.bf16 %v2249_v62, %v2241_v32  ;;  %4007 = vmatpush1.bf16.msra.mxu0 %v5366_v42  ;;  %v5377_v42 = vld [vmem:[%s7771_s4 + $0x254] ss:$8 sps:$4 sm:$0xff]   ;;  %v1777_v32 = vmul.f32 %v6380_v61, %v1334_v24  ;;  %v2074_v18 = vadd.f32 %v6383_v15, %v1776_v13  ;;  %v1338_v24 = vpop.f32.mrb[32].mxu0 }
 0x1a8   : > { %v2000_v63 = vadd.f32 %v6502_v45, %v1702_v0  ;;  %v1710_v44 = vmul.f32 %v6495_v48, %v1099_v25  ;;  %v1101_v41 = vpop.f32.mrb[79].mxu1  ;;  %4008 = vmatprep.subr.bf16.mxu0 %v5374_v50  ;;  %v5470_v0 = vld [vmem:[%s5684_s20 + $0x70] sm:$0xff]   ;;  %v2323_v50 = vmax.f32 %v2067_v40, 0.0 }
 0x1a9   : > { %v2001_v62 = vadd.f32 %v6508_v19, %v1703_v47  ;;  %v1711_v21 = vmul.f32 %v6505_v1, %v1101_v41  ;;  %3859 = vmatprep.mubr.bf16.mxu0 %v2481_v6  ;;  %v2075_v58 = vadd.f32 %v6386_v17, %v1777_v32  ;;  %v2330_v47 = vmax.f32 %v2074_v18, 0.0 }
 0x1aa   : > { %v2008_v25 = vadd.f32 %v6502_v45, %v1710_v44  ;;  %1590 = vmatmul.mubr.bf16.gmra.mrb[184].mxu1 %v5470_v0  ;;  %3860 = vmatmul.mubr.bf16.gmra.mrb[72].mxu0 %v2480_v23  ;;  %v2256_v6 = vmax.f32 %v2000_v63, 0.0  ;;  %v5380_v23 = vld [vmem:[%s7771_s4 + $0x264] ss:$8 sps:$4 sm:$0xff]  }
 0x1ab   : > { %v2009_v2 = vadd.f32 %v6508_v19, %v1711_v21  ;;  %1599 = vmatprep.mubr.bf16.mxu1 %v7792_v10  ;;  %4009 = vmatpush1.bf16.msra.mxu0 %v5372_v28  ;;  %v2331_v13 = vmax.f32 %v2075_v58, 0.0  ;;  %v2257_v44 = vmax.f32 %v2001_v62, 0.0  ;;  %v1784_v10 = vmul.f32 %v6377_v14, %v1338_v24  ;;  %v1340_v28 = vpop.f32.mrb[33].mxu0 }
 0x1ac   : > { %v2264_v9 = vmax.f32 %v2008_v25, 0.0  ;;  %4010 = vmatprep.subr.bf16.mxu0 %v5377_v42  ;;  %v6640_v32 = vpack.c.bf16 %v2330_v47, %v2322_v49  ;;  %v1785_v42 = vmul.f32 %v6380_v61, %v1340_v28  ;;  %v1342_v25 = vpop.f32.mrb[34].mxu0 }
 0x1ad   : > { %v2265_v41 = vmax.f32 %v2009_v2, 0.0  ;;  %v1105_v40 = vpop.f32.mrb[80].mxu1  ;;  %v6644_v0 = vpack.c.bf16 %v2331_v13, %v2323_v50  ;;  %v5378_v2 = vld [vmem:[%s7771_s4 + $0x260] ss:$8 sps:$4 sm:$0xff]   ;;  %v2082_v49 = vadd.f32 %v6383_v15, %v1784_v10  ;;  %v1792_v47 = vmul.f32 %v6377_v14, %v1342_v25  ;;  %v5381_v25 = vld [vmem:[%s7771_s4 + $0x270] ss:$8 sps:$4 sm:$0xff]  }
 0x1ae   : > { %7802 = vst [vmem:[#allocation24_spill] sm:$0xff] %v6640_v32  ;;  %v1718_v21 = vmul.f32 %v6495_v48, %v1105_v40  ;;  %v1107_v18 = vpop.f32.mrb[81].mxu1  ;;  %v2488_v63 = vpack.c.bf16 %v2264_v9, %v2256_v6  ;;  %v1344_v6 = vpop.f32.mrb[35].mxu0  ;;  %v2083_v24 = vadd.f32 %v6386_v17, %v1785_v42 }
 0x1af   : > { %v1719_v58 = vmul.f32 %v6505_v1, %v1107_v18  ;;  %v1109_v7 = vpop.f32.mrb[82].mxu1  ;;  %v2489_v62 = vpack.c.bf16 %v2265_v41, %v2257_v44  ;;  %4011 = vmatpush1.bf16.msra.mxu0 %v5375_v12  ;;  %v5383_v12 = vld [vmem:[%s7771_s4 + $0x274] ss:$8 sps:$4 sm:$0xff]   ;;  %v1793_v44 = vmul.f32 %v6380_v61, %v1344_v6  ;;  %v2338_v10 = vmax.f32 %v2082_v49, 0.0  ;;  %v1348_v6 = vpop.f32.mrb[36].mxu0 }
 0x1b0   : > { %v2016_v9 = vadd.f32 %v6502_v45, %v1718_v21  ;;  %v1726_v50 = vmul.f32 %v6495_v48, %v1109_v7  ;;  %v1111_v13 = vpop.f32.mrb[83].mxu1  ;;  %4012 = vmatprep.subr.bf16.mxu0 %v5380_v23  ;;  %v2090_v28 = vadd.f32 %v6383_v15, %v1792_v47  ;;  %v5471_v21 = vld [vmem:[%s5684_s20 + $0x78] sm:$0xff]   ;;  %v2339_v23 = vmax.f32 %v2083_v24, 0.0  ;;  %s4683_s20 = sshll.u32 %s7464_s23, 4  ;;  %s7714_s20 = int_to_ptr.vmem [resolvable:$true] %s4683_s20 }
 0x1b1   : > { %v2017_v41 = vadd.f32 %v6508_v19, %v1719_v58  ;;  %v1727_v40 = vmul.f32 %v6505_v1, %v1111_v13  ;;  %3869 = vmatprep.mubr.bf16.mxu0 %v2489_v62  ;;  %v2091_v18 = vadd.f32 %v6386_v17, %v1793_v44  ;;  %s5474_s16 = scalar_lea.vmem %s7714_s20, 8192 }
 0x1b2   : > { %v2024_v7 = vadd.f32 %v6502_v45, %v1726_v50  ;;  %1600 = vmatmul.mubr.bf16.gmra.mrb[188].mxu1 %v5471_v21  ;;  %3870 = vmatmul.mubr.bf16.gmra.mrb[76].mxu0 %v2488_v63  ;;  %v2346_v58 = vmax.f32 %v2090_v28, 0.0  ;;  %v2272_v62 = vmax.f32 %v2016_v9, 0.0  ;;  %v5386_v63 = vld [vmem:[%s7771_s4 + $0x284] ss:$8 sps:$4 sm:$0xff]   ;;  %p5475_p12 = scmp.ne.s32.totalorder %s7714_s20, %s5474_s16 }
 0x1b3   : > { %v2025_v42 = vadd.f32 %v6508_v19, %v1727_v40  ;;  %3646 = vmatprep.mubr.bf16.mxu1 %v6137_v34  ;;  %4013 = vmatpush1.bf16.msra.mxu0 %v5378_v2  ;;  %v2347_v47 = vmax.f32 %v2091_v18, 0.0  ;;  %v2273_v50 = vmax.f32 %v2017_v41, 0.0  ;;  %v1800_v34 = vmul.f32 %v6377_v14, %v1348_v6  ;;  %v1350_v2 = vpop.f32.mrb[37].mxu0 }
 0x1b4   : > { %v2280_v49 = vmax.f32 %v2024_v7, 0.0  ;;  %4014 = vmatprep.subr.bf16.mxu0 %v5383_v12  ;;  %v6674_v44 = vpack.c.bf16 %v2346_v58, %v2338_v10  ;;  %v1801_v12 = vmul.f32 %v6380_v61, %v1350_v2  ;;  %v1352_v7 = vpop.f32.mrb[38].mxu0  ;;  %p5476_p13 = pnand %p5475_p12, %p5638_p4 }
 0x1b5   : > { %v2281_v13 = vmax.f32 %v2025_v42, 0.0  ;;  %v1115_v24 = vpop.f32.mrb[84].mxu1  ;;  %v6678_v21 = vpack.c.bf16 %v2347_v47, %v2339_v23  ;;  %v5384_v42 = vld [vmem:[%s7771_s4 + $0x280] ss:$8 sps:$4 sm:$0xff]   ;;  %v2098_v10 = vadd.f32 %v6383_v15, %v1800_v34  ;;  %v1808_v58 = vmul.f32 %v6377_v14, %v1352_v7  ;;  %v1354_v6 = vpop.f32.mrb[39].mxu0 }
 0x1b6   : > { %v1734_v40 = vmul.f32 %v6495_v48, %v1115_v24  ;;  %v1117_v28 = vpop.f32.mrb[85].mxu1  ;;  %v2496_v9 = vpack.c.bf16 %v2280_v49, %v2272_v62  ;;  %v5389_v47 = vld [vmem:[%s7771_s4 + $0x294] ss:$8 sps:$4 sm:$0xff]   ;;  %p5477_p0 = pneg %p5476_p13 }
 0x1b7   : > { %v1735_v18 = vmul.f32 %v6505_v1, %v1117_v28  ;;  %v1119_v32 = vpop.f32.mrb[86].mxu1  ;;  %v2497_v41 = vpack.c.bf16 %v2281_v13, %v2273_v50  ;;  %4015 = vmatpush1.bf16.msra.mxu0 %v5381_v25  ;;  %v2099_v25 = vadd.f32 %v6386_v17, %v1801_v12  ;;  %v1809_v50 = vmul.f32 %v6380_v61, %v1354_v6  ;;  %v5387_v12 = vld [vmem:[%s7771_s4 + $0x290] ss:$8 sps:$4 sm:$0xff]  }
 0x1b8   : > { %v2032_v62 = vadd.f32 %v6502_v45, %v1734_v40  ;;  %v1742_v49 = vmul.f32 %v6495_v48, %v1119_v32  ;;  %v1121_v23 = vpop.f32.mrb[87].mxu1  ;;  %4016 = vmatprep.subr.bf16.mxu0 %v5386_v63  ;;  %v2354_v34 = vmax.f32 %v2098_v10, 0.0  ;;  %v2106_v2 = vadd.f32 %v6383_v15, %v1808_v58  ;;  %v1358_v10 = vpop.f32.mrb[40].mxu0 }
 0x1b9   : > { %v2033_v13 = vadd.f32 %v6508_v19, %v1735_v18  ;;  %v1743_v24 = vmul.f32 %v6505_v1, %v1121_v23  ;;  %3879 = vmatprep.mubr.bf16.mxu0 %v2497_v41  ;;  %v2355_v63 = vmax.f32 %v2099_v25, 0.0  ;;  %v2107_v40 = vadd.f32 %v6386_v17, %v1809_v50 }
 0x1ba   : > { %v2040_v32 = vadd.f32 %v6502_v45, %v1742_v49  ;;  %3647 = vmatmul.mubr.bf16.vlgmr.msra.gmra.mrb[192].mxu1 %v6133_v29  ;;  %3880 = vmatmul.mubr.bf16.gmra.mrb[80].mxu0 %v2496_v9  ;;  %v2362_v7 = vmax.f32 %v2106_v2, 0.0  ;;  %v2288_v18 = vmax.f32 %v2032_v62, 0.0  ;;  %v5392_v29 = vld [vmem:[%s7771_s4 + $0x2a4] ss:$8 sps:$4 sm:$0xff]  }
 0x1bb   : > { %v2041_v28 = vadd.f32 %v6508_v19, %v1743_v24  ;;  %3656 = vmatprep.mubr.bf16.mxu1 %v6154_v51  ;;  %4017 = vmatpush1.bf16.msra.mxu0 %v5384_v42  ;;  %v2363_v9 = vmax.f32 %v2107_v40, 0.0  ;;  %v2289_v58 = vmax.f32 %v2033_v13, 0.0  ;;  %v1816_v51 = vmul.f32 %v6377_v14, %v1358_v10  ;;  %v1360_v42 = vpop.f32.mrb[41].mxu0 }
 0x1bc   : > { %v2296_v41 = vmax.f32 %v2040_v32, 0.0  ;;  %4018 = vmatprep.subr.bf16.mxu0 %v5389_v47  ;;  %v6708_v23 = vpack.c.bf16 %v2362_v7, %v2354_v34  ;;  %v1817_v47 = vmul.f32 %v6380_v61, %v1360_v42  ;;  %v1362_v24 = vpop.f32.mrb[42].mxu0 }
 0x1bd   : > { %v2297_v6 = vmax.f32 %v2041_v28, 0.0  ;;  %v1125_v49 = vpop.f32.mrb[88].mxu1  ;;  %v6712_v2 = vpack.c.bf16 %v2363_v9, %v2355_v63  ;;  %v5390_v28 = vld [vmem:[%s7771_s4 + $0x2a0] ss:$8 sps:$4 sm:$0xff]   ;;  %v2114_v34 = vadd.f32 %v6383_v15, %v1816_v51  ;;  %v1824_v7 = vmul.f32 %v6377_v14, %v1362_v24  ;;  %v1364_v10 = vpop.f32.mrb[43].mxu0 }
 0x1be   : > { %v1750_v25 = vmul.f32 %v6495_v48, %v1125_v49  ;;  %v1127_v50 = vpop.f32.mrb[89].mxu1  ;;  %v2504_v62 = vpack.c.bf16 %v2296_v41, %v2288_v18  ;;  %v5395_v9 = vld [vmem:[%s7771_s4 + $0x2b4] ss:$8 sps:$4 sm:$0xff]   ;;  %v5393_v24 = vld [vmem:[%s7771_s4 + $0x2b0] ss:$8 sps:$4 sm:$0xff]  }
 0x1bf   : > { %v1751_v32 = vmul.f32 %v6505_v1, %v1127_v50  ;;  %v1129_v40 = vpop.f32.mrb[90].mxu1  ;;  %v2505_v13 = vpack.c.bf16 %v2297_v6, %v2289_v58  ;;  %4019 = vmatpush1.bf16.msra.mxu0 %v5387_v12  ;;  %v2115_v12 = vadd.f32 %v6386_v17, %v1817_v47  ;;  %v1825_v58 = vmul.f32 %v6380_v61, %v1364_v10 }
 0x1c0   : > { %v2048_v18 = vadd.f32 %v6502_v45, %v1750_v25  ;;  %v1758_v41 = vmul.f32 %v6495_v48, %v1129_v40  ;;  %v1131_v63 = vpop.f32.mrb[91].mxu1  ;;  %4020 = vmatprep.subr.bf16.mxu0 %v5392_v29  ;;  %v2370_v51 = vmax.f32 %v2114_v34, 0.0  ;;  %v2122_v42 = vadd.f32 %v6383_v15, %v1824_v7  ;;  %v1368_v34 = vpop.f32.mrb[44].mxu0 }
 0x1c1   : > { %v2049_v6 = vadd.f32 %v6508_v19, %v1751_v32  ;;  %v1759_v49 = vmul.f32 %v6505_v1, %v1131_v63  ;;  %3889 = vmatprep.mubr.bf16.mxu0 %v2505_v13  ;;  %v2371_v29 = vmax.f32 %v2115_v12, 0.0  ;;  %v2123_v50 = vadd.f32 %v6386_v17, %v1825_v58 }
 0x1c2   : > { %v2056_v25 = vadd.f32 %v6502_v45, %v1758_v41  ;;  %3657 = vmatmul.mubr.bf16.gmra.mrb[196].mxu1 %v6151_v8  ;;  %3890 = vmatmul.mubr.bf16.gmra.mrb[84].mxu0 %v2504_v62  ;;  %v2378_v32 = vmax.f32 %v2122_v42, 0.0  ;;  %v2304_v40 = vmax.f32 %v2048_v18, 0.0  ;;  %v5398_v8 = vld [vmem:[%s7771_s4 + $0x2c4] ss:$8 sps:$4 sm:$0xff]  }
 0x1c3   : > { %v2057_v47 = vadd.f32 %v6508_v19, %v1759_v49  ;;  %3666 = vmatprep.mubr.bf16.mxu1 %v6168_v20  ;;  %4021 = vmatpush1.bf16.msra.mxu0 %v5390_v28  ;;  %v2379_v62 = vmax.f32 %v2123_v50, 0.0  ;;  %v2305_v7 = vmax.f32 %v2049_v6, 0.0  ;;  %v1832_v20 = vmul.f32 %v6377_v14, %v1368_v34  ;;  %v1370_v28 = vpop.f32.mrb[45].mxu0 }
 0x1c4   : > { %v2312_v13 = vmax.f32 %v2056_v25, 0.0  ;;  %4022 = vmatprep.subr.bf16.mxu0 %v5395_v9  ;;  %v6742_v63 = vpack.c.bf16 %v2378_v32, %v2370_v51  ;;  %v1833_v9 = vmul.f32 %v6380_v61, %v1370_v28  ;;  %v1372_v49 = vpop.f32.mrb[46].mxu0 }
 0x1c5   : > { %v2313_v10 = vmax.f32 %v2057_v47, 0.0  ;;  %v1135_v41 = vpop.f32.mrb[92].mxu1  ;;  %v6746_v42 = vpack.c.bf16 %v2379_v62, %v2371_v29  ;;  %v5396_v47 = vld [vmem:[%s7771_s4 + $0x2c0] ss:$8 sps:$4 sm:$0xff]   ;;  %v6753_v51 = vadd.f32 %v6383_v15, %v1832_v20  ;;  %v1840_v32 = vmul.f32 %v6377_v14, %v1372_v49 }
 0x1c6   : > { %7803 = vst [vmem:[#allocation25_spill] sm:$0xff] %v6742_v63  ;;  %v1766_v12 = vmul.f32 %v6495_v48, %v1135_v41  ;;  %v1137_v58 = vpop.f32.mrb[93].mxu1  ;;  %v2512_v18 = vpack.c.bf16 %v2312_v13, %v2304_v40  ;;  %v1374_v40 = vpop.f32.mrb[47].mxu0  ;;  %v6762_v34 = vadd.f32 %v6386_v17, %v1833_v9  ;;  %v5404_v9 = vld [vmem:[%s7771_s4 + $0x2e4] ss:$8 sps:$4 sm:$0xff]  }
 0x1c7   : > { %7804 = vst [vmem:[#allocation26_spill] sm:$0xff] %v6746_v42  ;;  %v1767_v25 = vmul.f32 %v6505_v1, %v1137_v58  ;;  %v1139_v50 = vpop.f32.mrb[94].mxu1  ;;  %v2513_v6 = vpack.c.bf16 %v2313_v10, %v2305_v7  ;;  %4023 = vmatpush1.bf16.msra.mxu0 %v5393_v24  ;;  %v5401_v24 = vld [vmem:[%s7771_s4 + $0x2d4] ss:$8 sps:$4 sm:$0xff]   ;;  %v1841_v7 = vmul.f32 %v6380_v61, %v1374_v40  ;;  %v5399_v58 = vld [vmem:[%s7771_s4 + $0x2d0] ss:$8 sps:$4 sm:$0xff]  }
 0x1c8   : > { %v2064_v13 = vadd.f32 %v6502_v45, %v1766_v12  ;;  %v1774_v29 = vmul.f32 %v6495_v48, %v1139_v50  ;;  %v1141_v62 = vpop.f32.mrb[95].mxu1  ;;  %4024 = vmatprep.subr.bf16.mxu0 %v5398_v8  ;;  %v6768_v20 = vadd.f32 %v6383_v15, %v1840_v32  ;;  %v1378_v50 = vpop.f32.mrb[48].mxu0 }
 0x1c9   : > { %v2065_v10 = vadd.f32 %v6508_v19, %v1767_v25  ;;  %v1775_v41 = vmul.f32 %v6505_v1, %v1141_v62  ;;  %3899 = vmatprep.mubr.bf16.mxu0 %v2513_v6  ;;  %v2139_v8 = vadd.f32 %v6386_v17, %v1841_v7  ;;  %v1848_v40 = vmul.f32 %v6377_v14, %v1378_v50 }
 0x1ca   : > { %v2072_v28 = vadd.f32 %v6502_v45, %v1774_v29  ;;  %3667 = vmatmul.mubr.bf16.gmra.mrb[200].mxu1 %v6165_v37  ;;  %3900 = vmatmul.mubr.bf16.gmra.mrb[88].mxu0 %v2512_v18  ;;  %v2320_v49 = vmax.f32 %v2064_v13, 0.0  ;;  %v2386_v37 = vmax.f32 %v6753_v51, 0.0  ;;  %v2387_v18 = vmax.f32 %v6762_v34, 0.0  ;;  %v1380_v29 = vpop.f32.mrb[49].mxu0 }
 0x1cb   : > { %v2073_v12 = vadd.f32 %v6508_v19, %v1775_v41  ;;  %3676 = vmatprep.mubr.bf16.mxu1 %v6182_v39  ;;  %4025 = vmatpush1.bf16.msra.mxu0 %v5396_v47  ;;  %v2321_v6 = vmax.f32 %v2065_v10, 0.0  ;;  %v2394_v47 = vmax.f32 %v6768_v20, 0.0  ;;  %v2395_v13 = vmax.f32 %v2139_v8, 0.0  ;;  %v5402_v10 = vld [vmem:[%s7771_s4 + $0x2e0] ss:$8 sps:$4 sm:$0xff]  }
 0x1cc   : > { %v2328_v25 = vmax.f32 %v2072_v28, 0.0  ;;  %4026 = vmatprep.subr.bf16.mxu0 %v5401_v24  ;;  %v1849_v24 = vmul.f32 %v6380_v61, %v1380_v29  ;;  %v1382_v28 = vpop.f32.mrb[50].mxu0  ;;  %v2146_v20 = vadd.f32 %v6383_v15, %v1848_v40 }
 0x1cd   : > { %v2329_v32 = vmax.f32 %v2073_v12, 0.0  ;;  %v1145_v39 = vpop.f32.mrb[96].mxu1  ;;  %v1856_v12 = vmul.f32 %v6377_v14, %v1382_v28  ;;  %v1384_v50 = vpop.f32.mrb[51].mxu0 }
 0x1ce   : > { %v1782_v62 = vmul.f32 %v6495_v48, %v1145_v39  ;;  %v1147_v7 = vpop.f32.mrb[97].mxu1  ;;  %v2520_v41 = vpack.c.bf16 %v2328_v25, %v2320_v49  ;;  %v2402_v29 = vmax.f32 %v2146_v20, 0.0 }
 0x1cf   : > { %v1783_v51 = vmul.f32 %v6505_v1, %v1147_v7  ;;  %v1149_v34 = vpop.f32.mrb[98].mxu1  ;;  %v2521_v63 = vpack.c.bf16 %v2329_v32, %v2321_v6  ;;  %4027 = vmatpush1.bf16.msra.mxu0 %v5399_v58  ;;  %v5407_v6 = vld [vmem:[%s7771_s4 + $0x2f4] ss:$8 sps:$4 sm:$0xff]   ;;  %v2147_v58 = vadd.f32 %v6386_v17, %v1849_v24  ;;  %v1857_v32 = vmul.f32 %v6380_v61, %v1384_v50 }
 0x1d0   : > { %v2080_v49 = vadd.f32 %v6502_v45, %v1782_v62  ;;  %v1790_v8 = vmul.f32 %v6495_v48, %v1149_v34  ;;  %v1151_v25 = vpop.f32.mrb[99].mxu1  ;;  %4028 = vmatprep.subr.bf16.mxu0 %v5404_v9  ;;  %v2154_v62 = vadd.f32 %v6383_v15, %v1856_v12  ;;  %v1388_v12 = vpop.f32.mrb[52].mxu0  ;;  %v6814_v50 = vpack.c.bf16 %v2395_v13, %v2387_v18 }
 0x1d1   : > { %v2081_v39 = vadd.f32 %v6508_v19, %v1783_v51  ;;  %v1791_v40 = vmul.f32 %v6505_v1, %v1151_v25  ;;  %3909 = vmatprep.mubr.bf16.mxu0 %v2521_v63  ;;  %v2403_v9 = vmax.f32 %v2147_v58, 0.0  ;;  %v2155_v28 = vadd.f32 %v6386_v17, %v1857_v32  ;;  %v5405_v63 = vld [vmem:[%s7771_s4 + $0x2f0] ss:$8 sps:$4 sm:$0xff]   ;;  %v1390_v58 = vpop.f32.mrb[53].mxu0 }
 0x1d2   : > { %v2088_v7 = vadd.f32 %v6502_v45, %v1790_v8  ;;  %3677 = vmatmul.mubr.bf16.gmra.mrb[204].mxu1 %v6179_v36  ;;  %3910 = vmatmul.mubr.bf16.gmra.mrb[92].mxu0 %v2520_v41  ;;  %v2336_v34 = vmax.f32 %v2080_v49, 0.0  ;;  %v2410_v51 = vmax.f32 %v2154_v62, 0.0  ;;  %v5410_v36 = vld [vmem:[%s7771_s4 + $0x304] ss:$8 sps:$4 sm:$0xff]   ;;  %v6816_v49 = vpack.c.bf16 %v2394_v47, %v2386_v37 }
 0x1d3   : > { %v2089_v24 = vadd.f32 %v6508_v19, %v1791_v40  ;;  %3686 = vmatprep.mubr.bf16.mxu1 %v6199_v57  ;;  %4029 = vmatpush1.bf16.msra.mxu0 %v5402_v10  ;;  %v2411_v41 = vmax.f32 %v2155_v28, 0.0  ;;  %v2337_v8 = vmax.f32 %v2081_v39, 0.0  ;;  %v1864_v25 = vmul.f32 %v6377_v14, %v1388_v12  ;;  %v1392_v28 = vpop.f32.mrb[54].mxu0 }
 0x1d4   : > { %v2344_v20 = vmax.f32 %v2088_v7, 0.0  ;;  %4030 = vmatprep.subr.bf16.mxu0 %v5407_v6  ;;  %v6819_v32 = vpack.c.bf16 %v2410_v51, %v2402_v29  ;;  %v1865_v7 = vmul.f32 %v6380_v61, %v1390_v58  ;;  %v1872_v39 = vmul.f32 %v6377_v14, %v1392_v28  ;;  %v1394_v29 = vpop.f32.mrb[55].mxu0 }
 0x1d5   : > { %v2345_v57 = vmax.f32 %v2089_v24, 0.0  ;;  %v1155_v10 = vpop.f32.mrb[100].mxu1  ;;  %v6823_v42 = vpack.c.bf16 %v2411_v41, %v2403_v9  ;;  %v2162_v13 = vadd.f32 %v6383_v15, %v1864_v25  ;;  %v1873_v9 = vmul.f32 %v6380_v61, %v1394_v29  ;;  %v1398_v28 = vpop.f32.mrb[56].mxu0 }
 0x1d6   : > { %v1798_v6 = vmul.f32 %v6495_v48, %v1155_v10  ;;  %v1157_v40 = vpop.f32.mrb[101].mxu1  ;;  %v2528_v62 = vpack.c.bf16 %v2344_v20, %v2336_v34  ;;  %v2163_v20 = vadd.f32 %v6386_v17, %v1865_v7 }
 0x1d7   : > { %v1799_v37 = vmul.f32 %v6505_v1, %v1157_v40  ;;  %v1159_v18 = vpop.f32.mrb[102].mxu1  ;;  %v2529_v47 = vpack.c.bf16 %v2345_v57, %v2337_v8  ;;  %4031 = vmatpush1.bf16.msra.mxu0 %v5405_v63  ;;  %v2418_v63 = vmax.f32 %v2162_v13, 0.0  ;;  %v2170_v8 = vadd.f32 %v6383_v15, %v1872_v39  ;;  %v1400_v39 = vpop.f32.mrb[57].mxu0 }
 0x1d8   : > { %v2096_v24 = vadd.f32 %v6502_v45, %v1798_v6  ;;  %v1806_v51 = vmul.f32 %v6495_v48, %v1159_v18  ;;  %v1161_v34 = vpop.f32.mrb[103].mxu1  ;;  %4193 = vmatprep.subr.bf16.mxu0 %v5410_v36  ;;  %v2419_v10 = vmax.f32 %v2163_v20, 0.0  ;;  %v2171_v36 = vadd.f32 %v6386_v17, %v1873_v9 }
 0x1d9   : > { %v2097_v41 = vadd.f32 %v6508_v19, %v1799_v37  ;;  %v1807_v12 = vmul.f32 %v6505_v1, %v1161_v34  ;;  %3919 = vmatprep.mubr.bf16.mxu0 %v2529_v47  ;;  %v2426_v58 = vmax.f32 %v2170_v8, 0.0  ;;  %v1880_v13 = vmul.f32 %v6377_v14, %v1398_v28 }
 0x1da   : > { %v2104_v57 = vadd.f32 %v6502_v45, %v1806_v51  ;;  %3687 = vmatmul.mubr.bf16.gmra.mrb[208].mxu1 %v6193_v52  ;;  %3920 = vmatmul.mubr.bf16.gmra.mrb[96].mxu0 %v2528_v62  ;;  %v2352_v6 = vmax.f32 %v2096_v24, 0.0  ;;  %v2427_v7 = vmax.f32 %v2171_v36, 0.0  ;;  %v1881_v34 = vmul.f32 %v6380_v61, %v1400_v39 }
 0x1db   : > { %v2105_v25 = vadd.f32 %v6508_v19, %v1807_v12  ;;  %3696 = vmatprep.mubr.bf16.mxu1 %v6225_v31  ;;  %v2353_v37 = vmax.f32 %v2097_v41, 0.0  ;;  %v6841_v52 = vpack.c.bf16 %v2426_v58, %v2418_v63  ;;  %v1402_v31 = vpop.f32.mrb[58].mxu0  ;;  %v2178_v12 = vadd.f32 %v6383_v15, %v1880_v13 }
 0x1dc   : > { %v2360_v40 = vmax.f32 %v2104_v57, 0.0  ;;  %v6845_v20 = vpack.c.bf16 %v2427_v7, %v2419_v10  ;;  %v1888_v8 = vmul.f32 %v6377_v14, %v1402_v31  ;;  %v1404_v57 = vpop.f32.mrb[59].mxu0  ;;  %v2179_v58 = vadd.f32 %v6386_v17, %v1881_v34 }
 0x1dd   : > { %v2361_v18 = vmax.f32 %v2105_v25, 0.0  ;;  %v1165_v47 = vpop.f32.mrb[104].mxu1  ;;  %v2434_v7 = vmax.f32 %v2178_v12, 0.0  ;;  %v1408_v31 = vpop.f32.mrb[60].mxu0 }
 0x1de   : > { %v1814_v62 = vmul.f32 %v6495_v48, %v1165_v47  ;;  %v1167_v29 = vpop.f32.mrb[105].mxu1  ;;  %v2536_v51 = vpack.c.bf16 %v2360_v40, %v2352_v6  ;;  %v1889_v6 = vmul.f32 %v6380_v61, %v1404_v57  ;;  %v2186_v28 = vadd.f32 %v6383_v15, %v1888_v8  ;;  %v1410_v8 = vpop.f32.mrb[61].mxu0 }
 0x1df   : > { %v1815_v24 = vmul.f32 %v6505_v1, %v1167_v29  ;;  %v1169_v9 = vpop.f32.mrb[106].mxu1  ;;  %v2537_v41 = vpack.c.bf16 %v2361_v18, %v2353_v37  ;;  %v2435_v18 = vmax.f32 %v2179_v58, 0.0  ;;  %v1896_v12 = vmul.f32 %v6377_v14, %v1408_v31 }
 0x1e0   : > { %v2112_v63 = vadd.f32 %v6502_v45, %v1814_v62  ;;  %v1822_v36 = vmul.f32 %v6495_v48, %v1169_v9  ;;  %v1171_v25 = vpop.f32.mrb[107].mxu1  ;;  %v2187_v47 = vadd.f32 %v6386_v17, %v1889_v6  ;;  %v2442_v39 = vmax.f32 %v2186_v28, 0.0 }
 0x1e1   : > { %v2113_v10 = vadd.f32 %v6508_v19, %v1815_v24  ;;  %v1823_v40 = vmul.f32 %v6505_v1, %v1171_v25  ;;  %3929 = vmatprep.mubr.bf16.mxu0 %v2537_v41  ;;  %v1897_v25 = vmul.f32 %v6380_v61, %v1410_v8 }
 0x1e2   : > { %v2120_v37 = vadd.f32 %v6502_v45, %v1822_v36  ;;  %3697 = vmatmul.mubr.bf16.gmra.mrb[212].mxu1 %v6219_v27  ;;  %3930 = vmatmul.mubr.bf16.gmra.mrb[100].mxu0 %v2536_v51  ;;  %v2368_v62 = vmax.f32 %v2112_v63, 0.0  ;;  %v2443_v34 = vmax.f32 %v2187_v47, 0.0  ;;  %v6863_v27 = vpack.c.bf16 %v2442_v39, %v2434_v7 }
 0x1e3   : > { %v2121_v13 = vadd.f32 %v6508_v19, %v1823_v40  ;;  %3706 = vmatprep.mubr.bf16.mxu1 %v6251_v4  ;;  %v2369_v24 = vmax.f32 %v2113_v10, 0.0  ;;  %v1412_v4 = vpop.f32.mrb[62].mxu0  ;;  %v2194_v40 = vadd.f32 %v6383_v15, %v1896_v12  ;;  %v2195_v39 = vadd.f32 %v6386_v17, %v1897_v25 }
 0x1e4   : > { %v2376_v29 = vmax.f32 %v2120_v37, 0.0  ;;  %v6867_v58 = vpack.c.bf16 %v2443_v34, %v2435_v18  ;;  %v1904_v28 = vmul.f32 %v6377_v14, %v1412_v4  ;;  %v1414_v37 = vpop.f32.mrb[63].mxu0 }
 0x1e5   : > { %v2377_v9 = vmax.f32 %v2121_v13, 0.0  ;;  %v1175_v41 = vpop.f32.mrb[108].mxu1  ;;  %v2450_v34 = vmax.f32 %v2194_v40, 0.0 }
 0x1e6   : > { %v1830_v51 = vmul.f32 %v6495_v48, %v1175_v41  ;;  %v1177_v57 = vpop.f32.mrb[109].mxu1  ;;  %v2544_v36 = vpack.c.bf16 %v2376_v29, %v2368_v62  ;;  %v1905_v62 = vmul.f32 %v6380_v61, %v1414_v37  ;;  %v2202_v31 = vadd.f32 %v6383_v15, %v1904_v28 }
 0x1e7   : > { %v1831_v63 = vmul.f32 %v6505_v1, %v1177_v57  ;;  %v1179_v6 = vpop.f32.mrb[110].mxu1  ;;  %v2545_v10 = vpack.c.bf16 %v2377_v9, %v2369_v24  ;;  %v2451_v24 = vmax.f32 %v2195_v39, 0.0 }
 0x1e8   : > { %v2128_v7 = vadd.f32 %v6502_v45, %v1830_v51  ;;  %v1838_v47 = vmul.f32 %v6495_v48, %v1179_v6  ;;  %v1181_v13 = vpop.f32.mrb[111].mxu1  ;;  %v2203_v9 = vadd.f32 %v6386_v17, %v1905_v62  ;;  %v2458_v61 = vmax.f32 %v2202_v31, 0.0 }
 0x1e9   : > { %v2129_v18 = vadd.f32 %v6508_v19, %v1831_v63  ;;  %v1839_v29 = vmul.f32 %v6505_v1, %v1181_v13  ;;  %3939 = vmatprep.mubr.bf16.mxu0 %v2545_v10 }
 0x1ea   : > { %v2136_v14 = vadd.f32 %v6502_v45, %v1838_v47  ;;  %3707 = vmatmul.mubr.bf16.gmra.mrb[216].mxu1 %v6245_v53  ;;  %3940 = vmatmul.mubr.bf16.gmra.mrb[104].mxu0 %v2544_v36  ;;  %v2384_v12 = vmax.f32 %v2128_v7, 0.0  ;;  %v2459_v51 = vmax.f32 %v2203_v9, 0.0  ;;  %v6884_v15 = vpack.c.bf16 %v2458_v61, %v2450_v34 }
 0x1eb   : > { %v2137_v41 = vadd.f32 %v6508_v19, %v1839_v29  ;;  %3716 = vmatprep.mubr.bf16.mxu1 %v6277_v38  ;;  %v2385_v57 = vmax.f32 %v2129_v18, 0.0 }
 0x1ec   : > { %v2392_v8 = vmax.f32 %v2136_v14, 0.0  ;;  %v6887_v6 = vpack.c.bf16 %v2459_v51, %v2451_v24 }
 0x1ed   : > { %v2393_v25 = vmax.f32 %v2137_v41, 0.0  ;;  %v1185_v4 = vpop.f32.mrb[112].mxu1 }
 0x1ee   : > { %v1846_v63 = vmul.f32 %v6495_v48, %v1185_v4  ;;  %v1187_v53 = vpop.f32.mrb[113].mxu1  ;;  %v2552_v36 = vpack.c.bf16 %v2392_v8, %v2384_v12 }
 0x1ef   : > { %v1847_v17 = vmul.f32 %v6505_v1, %v1187_v53  ;;  %v1189_v10 = vpop.f32.mrb[114].mxu1  ;;  %v2553_v40 = vpack.c.bf16 %v2393_v25, %v2385_v57 }
 0x1f0   : > { %v2144_v38 = vadd.f32 %v6502_v45, %v1846_v63  ;;  %v1854_v28 = vmul.f32 %v6495_v48, %v1189_v10  ;;  %v1191_v37 = vpop.f32.mrb[115].mxu1 }
 0x1f1   : > { %v2145_v7 = vadd.f32 %v6508_v19, %v1847_v17  ;;  %v1855_v47 = vmul.f32 %v6505_v1, %v1191_v37  ;;  %3949 = vmatprep.mubr.bf16.mxu0 %v2553_v40 }
 0x1f2   : > { %v2152_v13 = vadd.f32 %v6502_v45, %v1854_v28  ;;  %3717 = vmatmul.mubr.bf16.gmra.mrb[220].mxu1 %v6271_v30  ;;  %3950 = vmatmul.mubr.bf16.gmra.mrb[108].mxu0 %v2552_v36  ;;  %v2400_v62 = vmax.f32 %v2144_v38, 0.0 }
 0x1f3   : > { %v2153_v39 = vadd.f32 %v6508_v19, %v1855_v47  ;;  %3726 = vmatprep.mubr.bf16.mxu1 %v6303_v16  ;;  %v2401_v29 = vmax.f32 %v2145_v7, 0.0 }
 0x1f4   : > { %v2408_v18 = vmax.f32 %v2152_v13, 0.0 }
 0x1f5   : > { %v2409_v34 = vmax.f32 %v2153_v39, 0.0  ;;  %v1195_v31 = vpop.f32.mrb[116].mxu1 }
 0x1f6   : > { %v1862_v14 = vmul.f32 %v6495_v48, %v1195_v31  ;;  %v1197_v24 = vpop.f32.mrb[117].mxu1  ;;  %v2560_v9 = vpack.c.bf16 %v2408_v18, %v2400_v62 }
 0x1f7   : > { %v1863_v41 = vmul.f32 %v6505_v1, %v1197_v24  ;;  %v1199_v61 = vpop.f32.mrb[118].mxu1  ;;  %v2561_v12 = vpack.c.bf16 %v2409_v34, %v2401_v29 }
 0x1f8   : > { %v2160_v30 = vadd.f32 %v6502_v45, %v1862_v14  ;;  %v1870_v8 = vmul.f32 %v6495_v48, %v1199_v61  ;;  %v1201_v51 = vpop.f32.mrb[119].mxu1 }
 0x1f9   : > { %v2161_v16 = vadd.f32 %v6508_v19, %v1863_v41  ;;  %v1871_v57 = vmul.f32 %v6505_v1, %v1201_v51  ;;  %3959 = vmatprep.mubr.bf16.mxu0 %v2561_v12 }
 0x1fa   : > { %v2168_v25 = vadd.f32 %v6502_v45, %v1870_v8  ;;  %3727 = vmatmul.mubr.bf16.gmra.mrb[224].mxu1 %v6297_v11  ;;  %3960 = vmatmul.mubr.bf16.gmra.mrb[112].mxu0 %v2560_v9  ;;  %v2416_v63 = vmax.f32 %v2160_v30, 0.0  ;;  %v1638_v30 = vsub.s32 6, %v6063_v56 }
 0x1fb   : > { %v2169_v4 = vadd.f32 %v6508_v19, %v1871_v57  ;;  %3736 = vmatprep.mubr.bf16.mxu1 %v6329_v5  ;;  %v2417_v36 = vmax.f32 %v2161_v16, 0.0  ;;  %v1642_v16 = vsub.s32 7, %v6063_v56 }
 0x1fc   : > { %v2424_v53 = vmax.f32 %v2168_v25, 0.0 }
 0x1fd   : > { %v2425_v17 = vmax.f32 %v2169_v4, 0.0  ;;  %v1205_v10 = vpop.f32.mrb[120].mxu1 }
 0x1fe   : > { %v1878_v40 = vmul.f32 %v6495_v48, %v1205_v10  ;;  %v1207_v38 = vpop.f32.mrb[121].mxu1  ;;  %v2568_v28 = vpack.c.bf16 %v2424_v53, %v2416_v63 }
 0x1ff   : > { %v1879_v37 = vmul.f32 %v6505_v1, %v1207_v38  ;;  %v1209_v7 = vpop.f32.mrb[122].mxu1  ;;  %v2569_v47 = vpack.c.bf16 %v2425_v17, %v2417_v36  ;;  %v5472_v36 = vld [vmem:[%s7769_s2] sm:$0xff] }
 0x200   : > { %v2176_v11 = vadd.f32 %v6502_v45, %v1878_v40  ;;  %v1886_v13 = vmul.f32 %v6495_v48, %v1209_v7  ;;  %v1211_v39 = vpop.f32.mrb[123].mxu1  ;;  %v6931_v56 = vrot.slane %v5472_v36, %v1638_v30 }
 0x201   : > { %v2177_v5 = vadd.f32 %v6508_v19, %v1879_v37  ;;  %v1887_v62 = vmul.f32 %v6505_v1, %v1211_v39  ;;  %3969 = vmatprep.mubr.bf16.mxu0 %v2569_v47 }
 0x202   : > { %v2184_v18 = vadd.f32 %v6502_v45, %v1886_v13  ;;  %3737 = vmatmul.mubr.bf16.gmra.mrb[228].mxu1 %v6323_v43  ;;  %3970 = vmatmul.mubr.bf16.gmra.mrb[116].mxu0 %v2568_v28  ;;  %v2432_v34 = vmax.f32 %v2176_v11, 0.0 }
 0x203   : > { %v2185_v29 = vadd.f32 %v6508_v19, %v1887_v62  ;;  %3746 = vmatprep.mubr.bf16.mxu1 %v6355_v46  ;;  %v2433_v14 = vmax.f32 %v2177_v5, 0.0 }
 0x204   : > { %v2440_v31 = vmax.f32 %v2184_v18, 0.0 }
 0x205   : > { %v2441_v24 = vmax.f32 %v2185_v29, 0.0  ;;  %v1215_v9 = vpop.f32.mrb[124].mxu1 }
 0x206   : > { %v1894_v41 = vmul.f32 %v6495_v48, %v1215_v9  ;;  %v1217_v61 = vpop.f32.mrb[125].mxu1  ;;  %v2576_v12 = vpack.c.bf16 %v2440_v31, %v2432_v34 }
 0x207   : > { %v1895_v8 = vmul.f32 %v6505_v1, %v1217_v61  ;;  %v1219_v51 = vpop.f32.mrb[126].mxu1  ;;  %v2577_v43 = vpack.c.bf16 %v2441_v24, %v2433_v14  ;;  %v7805_v14 = vld [vmem:[#allocation9_spill] sm:$0xff] }
 0x208   : > { %v2192_v57 = vadd.f32 %v6502_v45, %v1894_v41  ;;  %v1902_v46 = vmul.f32 %v6495_v48, %v1219_v51  ;;  %v1221_v25 = vpop.f32.mrb[127].mxu1  ;;  %v6935_v48 = vrot.slane %v5472_v36, %v1642_v16  ;;  %v7806_v36 = vld [vmem:[#allocation10_spill] sm:$0xff] }
 0x209   : > { %v2193_v4 = vadd.f32 %v6508_v19, %v1895_v8  ;;  %v1903_v63 = vmul.f32 %v6505_v1, %v1221_v25  ;;  %3979 = vmatprep.mubr.bf16.mxu0 %v2577_v43 }
 0x20a   : > { %v2200_v53 = vadd.f32 %v6502_v45, %v1902_v46  ;;  %3747 = vmatmul.mubr.bf16.gmra.mrb[232].mxu1 %v6349_v22  ;;  %3980 = vmatmul.mubr.bf16.gmra.mrb[120].mxu0 %v2576_v12  ;;  %v2448_v10 = vmax.f32 %v2192_v57, 0.0  ;;  %v5473_v45 = vld [vmem:[%s7770_s3] sm:$0xff] }
 0x20b   : > { %v2201_v17 = vadd.f32 %v6508_v19, %v1903_v63  ;;  %3756 = vmatprep.mubr.bf16.mxu1 %v6397_v35  ;;  %v6940_v22 = vrot.slane %v5473_v45, %v1638_v30  ;;  %v2449_v40 = vmax.f32 %v2193_v4, 0.0  ;;  %v6942_v37 = vrot.slane %v5473_v45, %v1642_v16  ;;  %v5413_v4 = vld [vmem:[%s7771_s4 + $0x314] ss:$8 sps:$4 sm:$0xff]   ;;  %v7808_v45 = vld [vmem:[#allocation14_spill] sm:$0xff] }
 0x20c   : > { %v2456_v1 = vmax.f32 %v2200_v53, 0.0 }
 0x20d   : > { %v2457_v38 = vmax.f32 %v2201_v17, 0.0  ;;  %v1451_v28 = vpop.f32.mrb[128].mxu1  ;;  %v7807_v17 = vld [vmem:[#allocation8_spill] sm:$0xff] }
 0x20e   : > { %v2584_v7 = vpack.c.bf16 %v2456_v1, %v2448_v10  ;;  %v1658_v19 = vmul.f32 %v6931_v56, %v1451_v28  ;;  %v1453_v47 = vpop.f32.mrb[129].mxu1 }
 0x20f   : > { %v2585_v35 = vpack.c.bf16 %v2457_v38, %v2449_v40  ;;  %v1659_v11 = vmul.f32 %v6935_v48, %v1453_v47  ;;  %v1455_v13 = vpop.f32.mrb[130].mxu1  ;;  %v7809_v40 = vld [vmem:[#allocation12_spill] sm:$0xff]  ;;  %v5416_v47 = vld [vmem:[%s7771_s4 + $0x324] ss:$8 sps:$4 sm:$0xff]  }
 0x210   : > { %v1956_v39 = vadd.f32 %v6940_v22, %v1658_v19  ;;  %v1666_v5 = vmul.f32 %v6931_v56, %v1455_v13  ;;  %v1457_v62 = vpop.f32.mrb[131].mxu1 }
 0x211   : > { %3989 = vmatprep.mubr.bf16.mxu0 %v2585_v35  ;;  %v1957_v18 = vadd.f32 %v6942_v37, %v1659_v11  ;;  %v1667_v29 = vmul.f32 %v6935_v48, %v1457_v62 }
 0x212   : > { %3757 = vmatmul.mubr.bf16.gmra.mrb[236].mxu1 %v6399_v55  ;;  %3990 = vmatmul.mubr.bf16.gmra.mrb[124].mxu0 %v2584_v7  ;;  %v2212_v34 = vmax.f32 %v1956_v39, 0.0  ;;  %v1964_v31 = vadd.f32 %v6940_v22, %v1666_v5  ;;  %v5411_v7 = vld [vmem:[%s7771_s4 + $0x310] ss:$8 sps:$4 sm:$0xff]  }
 0x213   : > { %3766 = vmatprep.mubr.bf16.mxu1 %v6436_v54  ;;  %4032 = vmatprep.mubr.bf16.mxu0 %v7805_v14  ;;  %v2213_v24 = vmax.f32 %v1957_v18, 0.0  ;;  %v1965_v9 = vadd.f32 %v6942_v37, %v1667_v29  ;;  %v5408_v54 = vld [vmem:[%s7771_s4 + $0x300] ss:$8 sps:$4 sm:$0xff]  }
 0x214   : > { %v2220_v41 = vmax.f32 %v1964_v31, 0.0 }
 0x215   : > { %v2221_v61 = vmax.f32 %v1965_v9, 0.0  ;;  %v1461_v12 = vpop.f32.mrb[132].mxu1  ;;  %v5419_v9 = vld [vmem:[%s7771_s4 + $0x334] ss:$8 sps:$4 sm:$0xff]  }
 0x216   : > { %v6955_v30 = vpack.c.bf16 %v2220_v41, %v2212_v34  ;;  %v1674_v8 = vmul.f32 %v6931_v56, %v1461_v12  ;;  %v1463_v51 = vpop.f32.mrb[133].mxu1  ;;  %v5414_v34 = vld [vmem:[%s7771_s4 + $0x320] ss:$8 sps:$4 sm:$0xff]   ;;  %v7810_v12 = vld [vmem:[#allocation13_spill] sm:$0xff] }
 0x217   : > { %v1675_v55 = vmul.f32 %v6935_v48, %v1463_v51  ;;  %v1465_v43 = vpop.f32.mrb[134].mxu1  ;;  %v6959_v16 = vpack.c.bf16 %v2221_v61, %v2213_v24 }
 0x218   : > { %v1972_v57 = vadd.f32 %v6940_v22, %v1674_v8  ;;  %v1682_v46 = vmul.f32 %v6931_v56, %v1465_v43  ;;  %v1467_v25 = vpop.f32.mrb[135].mxu1  ;;  %v7811_v8 = vld [vmem:[#allocation11_spill] sm:$0xff] }
 0x219   : > { %v1973_v63 = vadd.f32 %v6942_v37, %v1675_v55  ;;  %v1683_v53 = vmul.f32 %v6935_v48, %v1467_v25  ;;  %v5422_v25 = vld [vmem:[%s7771_s4 + $0x344] ss:$8 sps:$4 sm:$0xff]  }
 0x21a   : > { %3767 = vmatmul.mubr.bf16.gmra.mrb[240].mxu1 %v7806_v36  ;;  %4033 = vmatmul.mubr.bf16.vlgmr.msra.gmra.mrb[64].mxu0 %v7807_v17  ;;  %v2228_v10 = vmax.f32 %v1972_v57, 0.0  ;;  %v1980_v1 = vadd.f32 %v6940_v22, %v1682_v46  ;;  %v5417_v57 = vld [vmem:[%s7771_s4 + $0x330] ss:$8 sps:$4 sm:$0xff]  }
 0x21b   : > { %3776 = vmatprep.mubr.bf16.mxu1 %v7808_v45  ;;  %4042 = vmatprep.mubr.bf16.mxu0 %v7809_v40  ;;  %v2229_v38 = vmax.f32 %v1973_v63, 0.0  ;;  %v1981_v28 = vadd.f32 %v6942_v37, %v1683_v53 }
 0x21c   : > { %4194 = vmatpush1.bf16.msra.mxu0 %v5408_v54  ;;  %v2236_v19 = vmax.f32 %v1980_v1, 0.0  ;;  %v5420_v1 = vld [vmem:[%s7771_s4 + $0x340] ss:$8 sps:$4 sm:$0xff]  }
 0x21d   : > { %4195 = vmatprep.subr.bf16.mxu0 %v5413_v4  ;;  %v2237_v35 = vmax.f32 %v1981_v28, 0.0  ;;  %v1471_v11 = vpop.f32.mrb[136].mxu1  ;;  %v5425_v28 = vld [vmem:[%s7771_s4 + $0x354] ss:$8 sps:$4 sm:$0xff]  }
 0x21e   : > { %v1690_v13 = vmul.f32 %v6931_v56, %v1471_v11  ;;  %v1473_v39 = vpop.f32.mrb[137].mxu1  ;;  %v6984_v5 = vpack.c.bf16 %v2236_v19, %v2228_v10  ;;  %v7812_v11 = vld [vmem:[#allocation18_spill] sm:$0xff] }
 0x21f   : > { %v1691_v62 = vmul.f32 %v6935_v48, %v1473_v39  ;;  %v1475_v18 = vpop.f32.mrb[138].mxu1  ;;  %v6987_v29 = vpack.c.bf16 %v2237_v35, %v2229_v38 }
 0x220   : > { %4196 = vmatpush1.bf16.msra.mxu0 %v5411_v7  ;;  %v1988_v31 = vadd.f32 %v6940_v22, %v1690_v13  ;;  %v1698_v14 = vmul.f32 %v6931_v56, %v1475_v18  ;;  %v1477_v24 = vpop.f32.mrb[139].mxu1  ;;  %v7813_v13 = vld [vmem:[#allocation15_spill] sm:$0xff]  ;;  %v5423_v18 = vld [vmem:[%s7771_s4 + $0x350] ss:$8 sps:$4 sm:$0xff]  }
 0x221   : > { %4197 = vmatprep.subr.bf16.mxu0 %v5416_v47  ;;  %v1989_v41 = vadd.f32 %v6942_v37, %v1691_v62  ;;  %v1699_v61 = vmul.f32 %v6935_v48, %v1477_v24 }
 0x222   : > { %3777 = vmatmul.mubr.bf16.gmra.mrb[244].mxu1 %v7810_v12  ;;  %4043 = vmatmul.mubr.bf16.gmra.mrb[68].mxu0 %v7811_v8  ;;  %v2244_v51 = vmax.f32 %v1988_v31, 0.0  ;;  %v1996_v55 = vadd.f32 %v6940_v22, %v1698_v14  ;;  %v5426_v8 = vld [vmem:[%s7771_s4 + $0x360] ss:$8 sps:$4 sm:$0xff]  }
 0x223   : > { %3786 = vmatprep.mubr.bf16.mxu1 %v6490_v26  ;;  %4052 = vmatprep.mubr.bf16.mxu0 %v6479_v3  ;;  %v2245_v43 = vmax.f32 %v1989_v41, 0.0  ;;  %v1997_v54 = vadd.f32 %v6942_v37, %v1699_v61 }
 0x224   : > { %4198 = vmatpush1.bf16.msra.mxu0 %v5414_v34  ;;  %v2252_v46 = vmax.f32 %v1996_v55, 0.0 }
 0x225   : > { %4199 = vmatprep.subr.bf16.mxu0 %v5419_v9  ;;  %v2253_v4 = vmax.f32 %v1997_v54, 0.0  ;;  %v1481_v63 = vpop.f32.mrb[140].mxu1  ;;  %v5431_v54 = vld [vmem:[%s7771_s4 + $0x374] ss:$8 sps:$4 sm:$0xff]  }
 0x226   : > { %v1706_v26 = vmul.f32 %v6931_v56, %v1481_v63  ;;  %v1483_v53 = vpop.f32.mrb[141].mxu1  ;;  %v7012_v3 = vpack.c.bf16 %v2252_v46, %v2244_v51 }
 0x227   : > { %v1707_v36 = vmul.f32 %v6935_v48, %v1483_v53  ;;  %v1485_v17 = vpop.f32.mrb[142].mxu1  ;;  %v7015_v10 = vpack.c.bf16 %v2253_v4, %v2245_v43  ;;  %v7815_v4 = vld [vmem:[#allocation17_spill] sm:$0xff]  ;;  %v7816_v53 = vld [vmem:[#allocation20_spill] sm:$0xff] }
 0x228   : > { %4200 = vmatpush1.bf16.msra.mxu0 %v5417_v57  ;;  %v2004_v45 = vadd.f32 %v6940_v22, %v1706_v26  ;;  %v1714_v40 = vmul.f32 %v6931_v56, %v1485_v17  ;;  %v1487_v38 = vpop.f32.mrb[143].mxu1 }
 0x229   : > { %4201 = vmatprep.subr.bf16.mxu0 %v5422_v25  ;;  %v2005_v7 = vadd.f32 %v6942_v37, %v1707_v36  ;;  %v1715_v19 = vmul.f32 %v6935_v48, %v1487_v38  ;;  %v7814_v25 = vld [vmem:[#allocation16_spill] sm:$0xff] }
 0x22a   : > { %3787 = vmatmul.mubr.bf16.gmra.mrb[248].mxu1 %v6481_v60  ;;  %4053 = vmatmul.mubr.bf16.gmra.mrb[72].mxu0 %v6475_v59  ;;  %v2260_v47 = vmax.f32 %v2004_v45, 0.0  ;;  %v2012_v35 = vadd.f32 %v6940_v22, %v1714_v40  ;;  %v5428_v59 = vld [vmem:[%s7771_s4 + $0x364] ss:$8 sps:$4 sm:$0xff]  }
 0x22b   : > { %3796 = vmatprep.mubr.bf16.mxu1 %v7812_v11  ;;  %4062 = vmatprep.mubr.bf16.mxu0 %v7813_v13  ;;  %v2261_v39 = vmax.f32 %v2005_v7, 0.0  ;;  %v2013_v62 = vadd.f32 %v6942_v37, %v1715_v19  ;;  %v5434_v40 = vld [vmem:[%s7771_s4 + $0x384] ss:$8 sps:$4 sm:$0xff]  }
 0x22c   : > { %4202 = vmatpush1.bf16.msra.mxu0 %v5420_v1  ;;  %v2268_v34 = vmax.f32 %v2012_v35, 0.0  ;;  %v5429_v1 = vld [vmem:[%s7771_s4 + $0x370] ss:$8 sps:$4 sm:$0xff]  }
 0x22d   : > { %4203 = vmatprep.subr.bf16.mxu0 %v5425_v28  ;;  %v2269_v60 = vmax.f32 %v2013_v62, 0.0  ;;  %v1491_v31 = vpop.f32.mrb[144].mxu1 }
 0x22e   : > { %v1722_v14 = vmul.f32 %v6931_v56, %v1491_v31  ;;  %v1493_v24 = vpop.f32.mrb[145].mxu1  ;;  %v7040_v9 = vpack.c.bf16 %v2268_v34, %v2260_v47 }
 0x22f   : > { %v1723_v41 = vmul.f32 %v6935_v48, %v1493_v24  ;;  %v1495_v61 = vpop.f32.mrb[146].mxu1  ;;  %v7043_v12 = vpack.c.bf16 %v2269_v60, %v2261_v39  ;;  %v5432_v39 = vld [vmem:[%s7771_s4 + $0x380] ss:$8 sps:$4 sm:$0xff]   ;;  %v5437_v60 = vld [vmem:[%s7771_s4 + $0x394] ss:$8 sps:$4 sm:$0xff]  }
 0x230   : > { %4204 = vmatpush1.bf16.msra.mxu0 %v5423_v18  ;;  %v2020_v51 = vadd.f32 %v6940_v22, %v1722_v14  ;;  %v1730_v55 = vmul.f32 %v6931_v56, %v1495_v61  ;;  %v1497_v43 = vpop.f32.mrb[147].mxu1  ;;  %v7817_v14 = vld [vmem:[#allocation19_spill] sm:$0xff]  ;;  %v7818_v61 = vld [vmem:[#allocation22_spill] sm:$0xff] }
 0x231   : > { %4205 = vmatprep.subr.bf16.mxu0 %v5428_v59  ;;  %v2021_v57 = vadd.f32 %v6942_v37, %v1723_v41  ;;  %v1731_v46 = vmul.f32 %v6935_v48, %v1497_v43 }
 0x232   : > { %3797 = vmatmul.mubr.bf16.gmra.mrb[252].mxu1 %v7814_v25  ;;  %4063 = vmatmul.mubr.bf16.gmra.mrb[76].mxu0 %v7815_v4  ;;  %v2276_v63 = vmax.f32 %v2020_v51, 0.0  ;;  %v2028_v26 = vadd.f32 %v6940_v22, %v1730_v55  ;;  %v5435_v55 = vld [vmem:[%s7771_s4 + $0x390] ss:$8 sps:$4 sm:$0xff]  }
 0x233   : > { %4072 = vmatprep.mubr.bf16.mxu0 %v7816_v53  ;;  %v2277_v36 = vmax.f32 %v2021_v57, 0.0  ;;  %v2029_v17 = vadd.f32 %v6942_v37, %v1731_v46  ;;  %v5440_v46 = vld [vmem:[%s7771_s4 + $0x3a4] ss:$8 sps:$4 sm:$0xff]  }
 0x234   : > { %4206 = vmatpush1.bf16.msra.mxu0 %v5426_v8  ;;  %v2284_v45 = vmax.f32 %v2028_v26, 0.0 }
 0x235   : > { %4207 = vmatprep.subr.bf16.mxu0 %v5431_v54  ;;  %v2285_v38 = vmax.f32 %v2029_v17, 0.0  ;;  %v1501_v28 = vpop.f32.mrb[148].mxu1 }
 0x236   : > { %v1738_v7 = vmul.f32 %v6931_v56, %v1501_v28  ;;  %v1503_v19 = vpop.f32.mrb[149].mxu1  ;;  %v7067_v47 = vpack.c.bf16 %v2284_v45, %v2276_v63 }
 0x237   : > { %v1739_v35 = vmul.f32 %v6935_v48, %v1503_v19  ;;  %v1505_v11 = vpop.f32.mrb[150].mxu1  ;;  %v7070_v13 = vpack.c.bf16 %v2285_v38, %v2277_v36  ;;  %v7819_v19 = vld [vmem:[#allocation21_spill] sm:$0xff] }
 0x238   : > { %4208 = vmatpush1.bf16.msra.mxu0 %v5429_v1  ;;  %v2036_v62 = vadd.f32 %v6940_v22, %v1738_v7  ;;  %v1746_v18 = vmul.f32 %v6931_v56, %v1505_v11  ;;  %v1507_v34 = vpop.f32.mrb[151].mxu1  ;;  %v5443_v7 = vld [vmem:[%s7771_s4 + $0x3b4] ss:$8 sps:$4 sm:$0xff]  }
 0x239   : > { %4209 = vmatprep.subr.bf16.mxu0 %v5434_v40  ;;  %v2037_v59 = vadd.f32 %v6942_v37, %v1739_v35  ;;  %v1747_v31 = vmul.f32 %v6935_v48, %v1507_v34  ;;  %v5438_v40 = vld [vmem:[%s7771_s4 + $0x3a0] ss:$8 sps:$4 sm:$0xff]   ;;  %v5441_v34 = vld [vmem:[%s7771_s4 + $0x3b0] ss:$8 sps:$4 sm:$0xff]  }
 0x23a   : > { %4073 = vmatmul.mubr.bf16.gmra.mrb[80].mxu0 %v7817_v14  ;;  %v2292_v24 = vmax.f32 %v2036_v62, 0.0  ;;  %v2044_v41 = vadd.f32 %v6940_v22, %v1746_v18 }
 0x23b   : > { %4082 = vmatprep.mubr.bf16.mxu0 %v7818_v61  ;;  %v2293_v8 = vmax.f32 %v2037_v59, 0.0  ;;  %v2045_v51 = vadd.f32 %v6942_v37, %v1747_v31  ;;  %v5446_v31 = vld [vmem:[%s7771_s4 + $0x3c4] ss:$8 sps:$4 sm:$0xff]  }
 0x23c   : > { %4210 = vmatpush1.bf16.msra.mxu0 %v5432_v39  ;;  %v2300_v43 = vmax.f32 %v2044_v41, 0.0 }
 0x23d   : > { %4211 = vmatprep.subr.bf16.mxu0 %v5437_v60  ;;  %v2301_v54 = vmax.f32 %v2045_v51, 0.0  ;;  %v1511_v57 = vpop.f32.mrb[152].mxu1 }
 0x23e   : > { %v1754_v25 = vmul.f32 %v6931_v56, %v1511_v57  ;;  %v1513_v4 = vpop.f32.mrb[153].mxu1  ;;  %v7093_v63 = vpack.c.bf16 %v2300_v43, %v2292_v24 }
 0x23f   : > { %v1755_v26 = vmul.f32 %v6935_v48, %v1513_v4  ;;  %v1515_v53 = vpop.f32.mrb[154].mxu1  ;;  %v7096_v36 = vpack.c.bf16 %v2301_v54, %v2293_v8  ;;  %v5444_v54 = vld [vmem:[%s7771_s4 + $0x3c0] ss:$8 sps:$4 sm:$0xff]  }
 0x240   : > { %4212 = vmatpush1.bf16.msra.mxu0 %v5435_v55  ;;  %v2052_v17 = vadd.f32 %v6940_v22, %v1754_v25  ;;  %v1762_v1 = vmul.f32 %v6931_v56, %v1515_v53  ;;  %v1517_v45 = vpop.f32.mrb[155].mxu1  ;;  %v5449_v25 = vld [vmem:[%s7771_s4 + $0x3d4] ss:$8 sps:$4 sm:$0xff]   ;;  %v7820_v4 = vld [vmem:[#allocation23_spill] sm:$0xff] }
 0x241   : > { %v2053_v38 = vadd.f32 %v6942_v37, %v1755_v26  ;;  %v1763_v28 = vmul.f32 %v6935_v48, %v1517_v45  ;;  %4213 = vmatprep.subr.bf16.mxu0 %v5440_v46 }
 0x242   : > { %4083 = vmatmul.mubr.bf16.gmra.mrb[84].mxu0 %v7819_v19  ;;  %v2308_v35 = vmax.f32 %v2052_v17, 0.0  ;;  %v2060_v11 = vadd.f32 %v6940_v22, %v1762_v1 }
 0x243   : > { %4092 = vmatprep.mubr.bf16.mxu0 %v6610_v33  ;;  %v2309_v39 = vmax.f32 %v2053_v38, 0.0  ;;  %v2061_v62 = vadd.f32 %v6942_v37, %v1763_v28 }
 0x244   : > { %v2316_v18 = vmax.f32 %v2060_v11, 0.0  ;;  %4214 = vmatpush1.bf16.msra.mxu0 %v5438_v40  ;;  %v5447_v40 = vld [vmem:[%s7771_s4 + $0x3d0] ss:$8 sps:$4 sm:$0xff]  }
 0x245   : > { %v2317_v59 = vmax.f32 %v2061_v62, 0.0  ;;  %v1521_v60 = vpop.f32.mrb[156].mxu1  ;;  %4215 = vmatprep.subr.bf16.mxu0 %v5443_v7  ;;  %v5452_v7 = vld [vmem:[%s7771_s4 + $0x3e4] ss:$8 sps:$4 sm:$0xff]  }
 0x246   : > { %v1770_v14 = vmul.f32 %v6931_v56, %v1521_v60  ;;  %v1523_v24 = vpop.f32.mrb[157].mxu1  ;;  %v7119_v33 = vpack.c.bf16 %v2316_v18, %v2308_v35  ;;  %v5450_v60 = vld [vmem:[%s7771_s4 + $0x3e0] ss:$8 sps:$4 sm:$0xff]  }
 0x247   : > { %v1771_v41 = vmul.f32 %v6935_v48, %v1523_v24  ;;  %v1525_v61 = vpop.f32.mrb[158].mxu1  ;;  %v7122_v8 = vpack.c.bf16 %v2317_v59, %v2309_v39  ;;  %v5455_v24 = vld [vmem:[%s7771_s4 + $0x3f4] ss:$8 sps:$4 sm:$0xff]  }
 0x248   : > { %v2068_v51 = vadd.f32 %v6940_v22, %v1770_v14  ;;  %v1778_v55 = vmul.f32 %v6931_v56, %v1525_v61  ;;  %v1527_v43 = vpop.f32.mrb[159].mxu1  ;;  %4216 = vmatpush1.bf16.msra.mxu0 %v5441_v34 }
 0x249   : > { %v2069_v57 = vadd.f32 %v6942_v37, %v1771_v41  ;;  %v1779_v46 = vmul.f32 %v6935_v48, %v1527_v43  ;;  %4217 = vmatprep.subr.bf16.mxu0 %v5446_v31  ;;  %v7821_v41 = vld [vmem:[#allocation24_spill] sm:$0xff] }
 0x24a   : > { %4093 = vmatmul.mubr.bf16.gmra.mrb[88].mxu0 %v7820_v4  ;;  %v2324_v26 = vmax.f32 %v2068_v51, 0.0  ;;  %v2076_v53 = vadd.f32 %v6940_v22, %v1778_v55 }
 0x24b   : > { %4102 = vmatprep.mubr.bf16.mxu0 %v6644_v0  ;;  %v2325_v17 = vmax.f32 %v2069_v57, 0.0  ;;  %v2077_v1 = vadd.f32 %v6942_v37, %v1779_v46  ;;  %v5453_v57 = vld [vmem:[%s7771_s4 + $0x3f0] ss:$8 sps:$4 sm:$0xff]  }
 0x24c   : > { %v2332_v45 = vmax.f32 %v2076_v53, 0.0  ;;  %4218 = vmatpush1.bf16.msra.mxu0 %v5444_v54 }
 0x24d   : > { %v2333_v38 = vmax.f32 %v2077_v1, 0.0  ;;  %v1531_v28 = vpop.f32.mrb[160].mxu1  ;;  %4219 = vmatprep.subr.bf16.mxu0 %v5449_v25 }
 0x24e   : > { %v1786_v19 = vmul.f32 %v6931_v56, %v1531_v28  ;;  %v1533_v35 = vpop.f32.mrb[161].mxu1  ;;  %v7145_v0 = vpack.c.bf16 %v2332_v45, %v2324_v26 }
 0x24f   : > { %v1787_v11 = vmul.f32 %v6935_v48, %v1533_v35  ;;  %v1535_v39 = vpop.f32.mrb[162].mxu1  ;;  %v7148_v62 = vpack.c.bf16 %v2333_v38, %v2325_v17 }
 0x250   : > { %v2084_v18 = vadd.f32 %v6940_v22, %v1786_v19  ;;  %v1794_v34 = vmul.f32 %v6931_v56, %v1535_v39  ;;  %v1537_v59 = vpop.f32.mrb[163].mxu1  ;;  %4220 = vmatpush1.bf16.msra.mxu0 %v5447_v40 }
 0x251   : > { %v2085_v31 = vadd.f32 %v6942_v37, %v1787_v11  ;;  %v1795_v14 = vmul.f32 %v6935_v48, %v1537_v59  ;;  %4221 = vmatprep.subr.bf16.mxu0 %v5452_v7 }
 0x252   : > { %4103 = vmatmul.mubr.bf16.gmra.mrb[92].mxu0 %v7821_v41  ;;  %v2340_v61 = vmax.f32 %v2084_v18, 0.0  ;;  %v2092_v51 = vadd.f32 %v6940_v22, %v1794_v34 }
 0x253   : > { %4112 = vmatprep.mubr.bf16.mxu0 %v6678_v21  ;;  %v2341_v55 = vmax.f32 %v2085_v31, 0.0  ;;  %v2093_v43 = vadd.f32 %v6942_v37, %v1795_v14 }
 0x254   : > { %v2348_v54 = vmax.f32 %v2092_v51, 0.0  ;;  %4222 = vmatpush1.bf16.msra.mxu0 %v5450_v60 }
 0x255   : > { %v2349_v46 = vmax.f32 %v2093_v43, 0.0  ;;  %v1541_v25 = vpop.f32.mrb[164].mxu1  ;;  %4223 = vmatprep.subr.bf16.mxu0 %v5455_v24 }
 0x256   : > { %v1802_v4 = vmul.f32 %v6931_v56, %v1541_v25  ;;  %v1543_v26 = vpop.f32.mrb[165].mxu1  ;;  %v7168_v53 = vpack.c.bf16 %v2348_v54, %v2340_v61 }
 0x257   : > { %v1803_v17 = vmul.f32 %v6935_v48, %v1543_v26  ;;  %v1545_v21 = vpop.f32.mrb[166].mxu1  ;;  %v7171_v1 = vpack.c.bf16 %v2349_v46, %v2341_v55  ;;  %v7822_v46 = vld [vmem:[#allocation26_spill] sm:$0xff] }
 0x258   : > { %v2100_v45 = vadd.f32 %v6940_v22, %v1802_v4  ;;  %v1810_v40 = vmul.f32 %v6931_v56, %v1545_v21  ;;  %v1547_v38 = vpop.f32.mrb[167].mxu1  ;;  %4224 = vmatpush1.bf16.msra.mxu0 %v5453_v57 }
 0x259   : > { %v2101_v28 = vadd.f32 %v6942_v37, %v1803_v17  ;;  %v1811_v7 = vmul.f32 %v6935_v48, %v1547_v38 }
 0x25a   : > { %4113 = vmatmul.mubr.bf16.gmra.mrb[96].mxu0 %v6674_v44  ;;  %v2356_v19 = vmax.f32 %v2100_v45, 0.0  ;;  %v2108_v35 = vadd.f32 %v6940_v22, %v1810_v40 }
 0x25b   : > { %4122 = vmatprep.mubr.bf16.mxu0 %v6712_v2  ;;  %v2357_v11 = vmax.f32 %v2101_v28, 0.0  ;;  %v2109_v39 = vadd.f32 %v6942_v37, %v1811_v7 }
 0x25c   : > { %v2364_v18 = vmax.f32 %v2108_v35, 0.0 }
 0x25d   : > { %v2365_v34 = vmax.f32 %v2109_v39, 0.0  ;;  %v1551_v59 = vpop.f32.mrb[168].mxu1 }
 0x25e   : > { %v1818_v60 = vmul.f32 %v6931_v56, %v1551_v59  ;;  %v1553_v31 = vpop.f32.mrb[169].mxu1  ;;  %v7182_v14 = vpack.c.bf16 %v2364_v18, %v2356_v19 }
 0x25f   : > { %v1819_v24 = vmul.f32 %v6935_v48, %v1553_v31  ;;  %v1555_v41 = vpop.f32.mrb[170].mxu1  ;;  %v7185_v44 = vpack.c.bf16 %v2365_v34, %v2357_v11  ;;  %v7823_v34 = vld [vmem:[#allocation25_spill] sm:$0xff] }
 0x260   : > { %v2116_v61 = vadd.f32 %v6940_v22, %v1818_v60  ;;  %v1826_v2 = vmul.f32 %v6931_v56, %v1555_v41  ;;  %v1557_v51 = vpop.f32.mrb[171].mxu1 }
 0x261   : > { %v2117_v55 = vadd.f32 %v6942_v37, %v1819_v24  ;;  %v1827_v43 = vmul.f32 %v6935_v48, %v1557_v51 }
 0x262   : > { %4123 = vmatmul.mubr.bf16.gmra.mrb[100].mxu0 %v6708_v23  ;;  %v2372_v54 = vmax.f32 %v2116_v61, 0.0  ;;  %v2124_v57 = vadd.f32 %v6940_v22, %v1826_v2 }
 0x263   : > { %4132 = vmatprep.mubr.bf16.mxu0 %v7822_v46  ;;  %v2373_v25 = vmax.f32 %v2117_v55, 0.0  ;;  %v2125_v4 = vadd.f32 %v6942_v37, %v1827_v43 }
 0x264   : > { %v2380_v26 = vmax.f32 %v2124_v57, 0.0 }
 0x265   : > { %v2381_v17 = vmax.f32 %v2125_v4, 0.0  ;;  %v1561_v21 = vpop.f32.mrb[172].mxu1 }
 0x266   : > { %v1834_v45 = vmul.f32 %v6931_v56, %v1561_v21  ;;  %v1563_v40 = vpop.f32.mrb[173].mxu1  ;;  %v7196_v38 = vpack.c.bf16 %v2380_v26, %v2372_v54 }
 0x267   : > { %v1835_v28 = vmul.f32 %v6935_v48, %v1563_v40  ;;  %v1565_v7 = vpop.f32.mrb[174].mxu1  ;;  %v7199_v23 = vpack.c.bf16 %v2381_v17, %v2373_v25 }
 0x268   : > { %v2132_v19 = vadd.f32 %v6940_v22, %v1834_v45  ;;  %v1842_v35 = vmul.f32 %v6931_v56, %v1565_v7  ;;  %v1567_v11 = vpop.f32.mrb[175].mxu1 }
 0x269   : > { %v2133_v39 = vadd.f32 %v6942_v37, %v1835_v28  ;;  %v1843_v18 = vmul.f32 %v6935_v48, %v1567_v11 }
 0x26a   : > { %4133 = vmatmul.mubr.bf16.gmra.mrb[104].mxu0 %v7823_v34  ;;  %v2388_v59 = vmax.f32 %v2132_v19, 0.0  ;;  %v2140_v60 = vadd.f32 %v6940_v22, %v1842_v35 }
 0x26b   : > { %4142 = vmatprep.mubr.bf16.mxu0 %v6814_v50  ;;  %v2389_v31 = vmax.f32 %v2133_v39, 0.0  ;;  %v2141_v24 = vadd.f32 %v6942_v37, %v1843_v18 }
 0x26c   : > { %v2396_v41 = vmax.f32 %v2140_v60, 0.0 }
 0x26d   : > { %v2397_v61 = vmax.f32 %v2141_v24, 0.0  ;;  %v1571_v2 = vpop.f32.mrb[176].mxu1 }
 0x26e   : > { %v1850_v51 = vmul.f32 %v6931_v56, %v1571_v2  ;;  %v1573_v55 = vpop.f32.mrb[177].mxu1  ;;  %v7210_v43 = vpack.c.bf16 %v2396_v41, %v2388_v59 }
 0x26f   : > { %v1851_v54 = vmul.f32 %v6935_v48, %v1573_v55  ;;  %v1575_v57 = vpop.f32.mrb[178].mxu1  ;;  %v7213_v46 = vpack.c.bf16 %v2397_v61, %v2389_v31 }
 0x270   : > { %v2148_v25 = vadd.f32 %v6940_v22, %v1850_v51  ;;  %v1858_v50 = vmul.f32 %v6931_v56, %v1575_v57  ;;  %v1577_v4 = vpop.f32.mrb[179].mxu1 }
 0x271   : > { %v2149_v26 = vadd.f32 %v6942_v37, %v1851_v54  ;;  %v1859_v17 = vmul.f32 %v6935_v48, %v1577_v4 }
 0x272   : > { %4143 = vmatmul.mubr.bf16.gmra.mrb[108].mxu0 %v6816_v49  ;;  %v2404_v21 = vmax.f32 %v2148_v25, 0.0  ;;  %v2156_v45 = vadd.f32 %v6940_v22, %v1858_v50 }
 0x273   : > { %4152 = vmatprep.mubr.bf16.mxu0 %v6823_v42  ;;  %v2405_v40 = vmax.f32 %v2149_v26, 0.0  ;;  %v2157_v28 = vadd.f32 %v6942_v37, %v1859_v17 }
 0x274   : > { %v2412_v7 = vmax.f32 %v2156_v45, 0.0 }
 0x275   : > { %v2413_v19 = vmax.f32 %v2157_v28, 0.0  ;;  %v1581_v35 = vpop.f32.mrb[180].mxu1 }
 0x276   : > { %v1866_v11 = vmul.f32 %v6931_v56, %v1581_v35  ;;  %v1583_v39 = vpop.f32.mrb[181].mxu1  ;;  %v7224_v18 = vpack.c.bf16 %v2412_v7, %v2404_v21 }
 0x277   : > { %v1867_v34 = vmul.f32 %v6935_v48, %v1583_v39  ;;  %v1585_v59 = vpop.f32.mrb[182].mxu1  ;;  %v7227_v49 = vpack.c.bf16 %v2413_v19, %v2405_v40 }
 0x278   : > { %v2164_v60 = vadd.f32 %v6940_v22, %v1866_v11  ;;  %v1874_v42 = vmul.f32 %v6931_v56, %v1585_v59  ;;  %v1587_v31 = vpop.f32.mrb[183].mxu1 }
 0x279   : > { %v2165_v24 = vadd.f32 %v6942_v37, %v1867_v34  ;;  %v1875_v41 = vmul.f32 %v6935_v48, %v1587_v31 }
 0x27a   : > { %4153 = vmatmul.mubr.bf16.gmra.mrb[112].mxu0 %v6819_v32  ;;  %v2420_v61 = vmax.f32 %v2164_v60, 0.0  ;;  %v2172_v2 = vadd.f32 %v6940_v22, %v1874_v42 }
 0x27b   : > { %4162 = vmatprep.mubr.bf16.mxu0 %v6845_v20  ;;  %v2421_v51 = vmax.f32 %v2165_v24, 0.0  ;;  %v2173_v55 = vadd.f32 %v6942_v37, %v1875_v41 }
 0x27c   : > { %v2428_v54 = vmax.f32 %v2172_v2, 0.0 }
 0x27d   : > { %v2429_v57 = vmax.f32 %v2173_v55, 0.0  ;;  %v1591_v25 = vpop.f32.mrb[184].mxu1 }
 0x27e   : > { %v1882_v50 = vmul.f32 %v6931_v56, %v1591_v25  ;;  %v1593_v4 = vpop.f32.mrb[185].mxu1  ;;  %v7238_v26 = vpack.c.bf16 %v2428_v54, %v2420_v61 }
 0x27f   : > { %v1883_v17 = vmul.f32 %v6935_v48, %v1593_v4  ;;  %v1595_v21 = vpop.f32.mrb[186].mxu1  ;;  %v7241_v32 = vpack.c.bf16 %v2429_v57, %v2421_v51 }
 0x280   : > { %v2180_v45 = vadd.f32 %v6940_v22, %v1882_v50  ;;  %v1890_v20 = vmul.f32 %v6931_v56, %v1595_v21  ;;  %v1597_v40 = vpop.f32.mrb[187].mxu1 }
 0x281   : > { %v2181_v28 = vadd.f32 %v6942_v37, %v1883_v17  ;;  %v1891_v7 = vmul.f32 %v6935_v48, %v1597_v40 }
 0x282   : > { %4163 = vmatmul.mubr.bf16.gmra.mrb[116].mxu0 %v6841_v52  ;;  %v2436_v19 = vmax.f32 %v2180_v45, 0.0  ;;  %v2188_v35 = vadd.f32 %v6940_v22, %v1890_v20 }
 0x283   : > { %4172 = vmatprep.mubr.bf16.mxu0 %v6867_v58  ;;  %v2437_v11 = vmax.f32 %v2181_v28, 0.0  ;;  %v2189_v39 = vadd.f32 %v6942_v37, %v1891_v7 }
 0x284   : > { %v2444_v34 = vmax.f32 %v2188_v35, 0.0 }
 0x285   : > { %v2445_v59 = vmax.f32 %v2189_v39, 0.0  ;;  %v1601_v60 = vpop.f32.mrb[188].mxu1 }
 0x286   : > { %v1898_v42 = vmul.f32 %v6931_v56, %v1601_v60  ;;  %v1603_v31 = vpop.f32.mrb[189].mxu1  ;;  %v7252_v24 = vpack.c.bf16 %v2444_v34, %v2436_v19 }
 0x287   : > { %v1899_v41 = vmul.f32 %v6935_v48, %v1603_v31  ;;  %v1605_v61 = vpop.f32.mrb[190].mxu1  ;;  %v7255_v52 = vpack.c.bf16 %v2445_v59, %v2437_v11 }
 0x288   : > { %v2196_v2 = vadd.f32 %v6940_v22, %v1898_v42  ;;  %v1906_v58 = vmul.f32 %v6931_v56, %v1605_v61  ;;  %v1607_v51 = vpop.f32.mrb[191].mxu1 }
 0x289   : > { %v2197_v55 = vadd.f32 %v6942_v37, %v1899_v41  ;;  %v1907_v54 = vmul.f32 %v6935_v48, %v1607_v51 }
 0x28a   : > { %v2452_v57 = vmax.f32 %v2196_v2, 0.0  ;;  %4173 = vmatmul.mubr.bf16.gmra.mrb[120].mxu0 %v6863_v27  ;;  %v2204_v25 = vadd.f32 %v6940_v22, %v1906_v58 }
 0x28b   : > { %v2453_v50 = vmax.f32 %v2197_v55, 0.0  ;;  %4182 = vmatprep.mubr.bf16.mxu0 %v6887_v6  ;;  %v2205_v4 = vadd.f32 %v6942_v37, %v1907_v54 }
 0x28c   : > { %v2460_v17 = vmax.f32 %v2204_v25, 0.0 }
 0x28d   : > { %v2461_v21 = vmax.f32 %v2205_v4, 0.0  ;;  %v7265_v45 = vpop.f32.mrb[192].mxu1 }
 0x28e   : > { %v7267_v56 = vpop.f32.mrb[193].mxu1  ;;  %v7269_v20 = vpack.c.bf16 %v2460_v17, %v2452_v57 }
 0x28f   : > { %v7271_v40 = vpop.f32.mrb[194].mxu1  ;;  %v7273_v48 = vpack.c.bf16 %v2461_v21, %v2453_v50 }
 0x290   : > { %v7275_v27 = vpop.f32.mrb[195].mxu1 }
 0x292   : > { %4183 = vmatmul.mubr.bf16.gmra.mrb[124].mxu0 %v6884_v15 }
 0x293   : > { %4225 = vmatprep.mubr.bf16.mxu0 %v6959_v16 }
 0x295   : > { %v7279_v6 = vpop.f32.mrb[196].mxu1 }
 0x296   : > { %v7281_v22 = vpop.f32.mrb[197].mxu1 }
 0x297   : > { %v7283_v37 = vpop.f32.mrb[198].mxu1 }
 0x298   : > { %v7285_v28 = vpop.f32.mrb[199].mxu1 }
 0x29a   : > { %4226 = vmatmul.mubr.bf16.vlgmr.msra.gmra.mrb[64].mxu0 %v6955_v30 }
 0x29b   : > { %4235 = vmatprep.mubr.bf16.mxu0 %v6987_v29 }
 0x29d   : > { %v7289_v7 = vpop.f32.mrb[200].mxu1 }
 0x29e   : > { %v7291_v19 = vpop.f32.mrb[201].mxu1 }
 0x29f   : > { %v7293_v35 = vpop.f32.mrb[202].mxu1 }
 0x2a0   : > { %v7295_v15 = vpop.f32.mrb[203].mxu1 }
 0x2a2   : > { %4236 = vmatmul.mubr.bf16.gmra.mrb[68].mxu0 %v6984_v5 }
 0x2a3   : > { %4245 = vmatprep.mubr.bf16.mxu0 %v7015_v10 }
 0x2a5   : > { %v7299_v16 = vpop.f32.mrb[204].mxu1 }
 0x2a6   : > { %v7301_v11 = vpop.f32.mrb[205].mxu1 }
 0x2a7   : > { %v7303_v39 = vpop.f32.mrb[206].mxu1 }
 0x2a8   : > { %v7305_v30 = vpop.f32.mrb[207].mxu1 }
 0x2aa   : > { %4246 = vmatmul.mubr.bf16.gmra.mrb[72].mxu0 %v7012_v3 }
 0x2ab   : > { %4255 = vmatprep.mubr.bf16.mxu0 %v7043_v12 }
 0x2ad   : > { %v7309_v29 = vpop.f32.mrb[208].mxu1 }
 0x2ae   : > { %v7311_v34 = vpop.f32.mrb[209].mxu1 }
 0x2af   : > { %v7313_v59 = vpop.f32.mrb[210].mxu1 }
 0x2b0   : > { %v7315_v5 = vpop.f32.mrb[211].mxu1 }
 0x2b2   : > { %4256 = vmatmul.mubr.bf16.gmra.mrb[76].mxu0 %v7040_v9 }
 0x2b3   : > { %4265 = vmatprep.mubr.bf16.mxu0 %v7070_v13 }
 0x2b5   : > { %v7319_v10 = vpop.f32.mrb[212].mxu1 }
 0x2b6   : > { %v7321_v60 = vpop.f32.mrb[213].mxu1 }
 0x2b7   : > { %v7323_v42 = vpop.f32.mrb[214].mxu1 }
 0x2b8   : > { %v7325_v3 = vpop.f32.mrb[215].mxu1 }
 0x2ba   : > { %4266 = vmatmul.mubr.bf16.gmra.mrb[80].mxu0 %v7067_v47 }
 0x2bb   : > { %4275 = vmatprep.mubr.bf16.mxu0 %v7096_v36 }
 0x2bd   : > { %v7329_v12 = vpop.f32.mrb[216].mxu1 }
 0x2be   : > { %v7331_v31 = vpop.f32.mrb[217].mxu1 }
 0x2bf   : > { %v7333_v41 = vpop.f32.mrb[218].mxu1 }
 0x2c0   : > { %v7335_v9 = vpop.f32.mrb[219].mxu1 }
 0x2c2   : > { %4276 = vmatmul.mubr.bf16.gmra.mrb[84].mxu0 %v7093_v63 }
 0x2c3   : > { %4285 = vmatprep.mubr.bf16.mxu0 %v7122_v8 }
 0x2c5   : > { %v7339_v13 = vpop.f32.mrb[220].mxu1 }
 0x2c6   : > { %v7341_v61 = vpop.f32.mrb[221].mxu1 }
 0x2c7   : > { %v7343_v2 = vpop.f32.mrb[222].mxu1 }
 0x2c8   : > { %v7345_v47 = vpop.f32.mrb[223].mxu1 }
 0x2ca   : > { %4286 = vmatmul.mubr.bf16.gmra.mrb[88].mxu0 %v7119_v33 }
 0x2cb   : > { %4295 = vmatprep.mubr.bf16.mxu0 %v7148_v62 }
 0x2cd   : > { %v7349_v36 = vpop.f32.mrb[224].mxu1 }
 0x2ce   : > { %v7351_v58 = vpop.f32.mrb[225].mxu1 }
 0x2cf   : > { %v7353_v51 = vpop.f32.mrb[226].mxu1 }
 0x2d0   : > { %v7355_v63 = vpop.f32.mrb[227].mxu1 }
 0x2d2   : > { %4296 = vmatmul.mubr.bf16.gmra.mrb[92].mxu0 %v7145_v0 }
 0x2d3   : > { %4305 = vmatprep.mubr.bf16.mxu0 %v7171_v1 }
 0x2d5   : > { %v7359_v8 = vpop.f32.mrb[228].mxu1 }
 0x2d6   : > { %v7361_v55 = vpop.f32.mrb[229].mxu1 }
 0x2d7   : > { %v7363_v54 = vpop.f32.mrb[230].mxu1 }
 0x2d8   : > { %v7365_v33 = vpop.f32.mrb[231].mxu1 }
 0x2da   : > { %4306 = vmatmul.mubr.bf16.gmra.mrb[96].mxu0 %v7168_v53 }
 0x2db   : > { %4315 = vmatprep.mubr.bf16.mxu0 %v7185_v44 }
 0x2dd   : > { %v7369_v62 = vpop.f32.mrb[232].mxu1 }
 0x2de   : > { %v7371_v57 = vpop.f32.mrb[233].mxu1 }
 0x2df   : > { %v7373_v25 = vpop.f32.mrb[234].mxu1 }
 0x2e0   : > { %v7375_v0 = vpop.f32.mrb[235].mxu1 }
 0x2e2   : > { %4316 = vmatmul.mubr.bf16.gmra.mrb[100].mxu0 %v7182_v14 }
 0x2e3   : > { %4325 = vmatprep.mubr.bf16.mxu0 %v7199_v23 }
 0x2e5   : > { %v7379_v1 = vpop.f32.mrb[236].mxu1 }
 0x2e6   : > { %v7381_v50 = vpop.f32.mrb[237].mxu1 }
 0x2e7   : > { %v7383_v4 = vpop.f32.mrb[238].mxu1 }
 0x2e8   : > { %7824 = vst [vmem:[#allocation9_spill] sm:$0xff] %v7383_v4  ;;  %v7385_v53 = vpop.f32.mrb[239].mxu1 }
 0x2e9   : > { %7825 = vst [vmem:[#allocation10_spill] sm:$0xff] %v7385_v53 }
 0x2ea   : > { %4326 = vmatmul.mubr.bf16.gmra.mrb[104].mxu0 %v7196_v38 }
 0x2eb   : > { %4335 = vmatprep.mubr.bf16.mxu0 %v7213_v46 }
 0x2ed   : > { %v7389_v44 = vpop.f32.mrb[240].mxu1 }
 0x2ee   : > { %v7391_v17 = vpop.f32.mrb[241].mxu1 }
 0x2ef   : > { %7826 = vst [vmem:[#allocation8_spill] sm:$0xff] %v7391_v17  ;;  %v7393_v21 = vpop.f32.mrb[242].mxu1 }
 0x2f0   : > { %7827 = vst [vmem:[#allocation14_spill] sm:$0xff] %v7393_v21  ;;  %v7395_v14 = vpop.f32.mrb[243].mxu1 }
 0x2f1   : > { %7828 = vst [vmem:[#allocation12_spill] sm:$0xff] %v7395_v14 }
 0x2f2   : > { %4336 = vmatmul.mubr.bf16.gmra.mrb[108].mxu0 %v7210_v43 }
 0x2f3   : > { %4345 = vmatprep.mubr.bf16.mxu0 %v7227_v49 }
 0x2f5   : > { %v7399_v23 = vpop.f32.mrb[244].mxu1 }
 0x2f6   : > { %7829 = vst [vmem:[#allocation13_spill] sm:$0xff] %v7399_v23  ;;  %v7401_v4 = vpop.f32.mrb[245].mxu1 }
 0x2f7   : > { %7830 = vst [vmem:[#allocation11_spill] sm:$0xff] %v7401_v4  ;;  %v7403_v53 = vpop.f32.mrb[246].mxu1 }
 0x2f8   : > { %7831 = vst [vmem:[#allocation18_spill] sm:$0xff] %v7403_v53  ;;  %v7405_v38 = vpop.f32.mrb[247].mxu1 }
 0x2f9   : > { %7832 = vst [vmem:[#allocation15_spill] sm:$0xff] %v7405_v38 }
 0x2fa   : > { %4346 = vmatmul.mubr.bf16.gmra.mrb[112].mxu0 %v7224_v18 }
 0x2fb   : > { %4355 = vmatprep.mubr.bf16.mxu0 %v7241_v32 }
 0x2fd   : > { %v7409_v46 = vpop.f32.mrb[248].mxu1 }
 0x2fe   : > { %7833 = vst [vmem:[#allocation16_spill] sm:$0xff] %v7409_v46  ;;  %v7411_v14 = vpop.f32.mrb[249].mxu1 }
 0x2ff   : > { %7834 = vst [vmem:[#allocation17_spill] sm:$0xff] %v7411_v14  ;;  %v7413_v43 = vpop.f32.mrb[250].mxu1 }
 0x300   : > { %7835 = vst [vmem:[#allocation20_spill] sm:$0xff] %v7413_v43  ;;  %v7415_v49 = vpop.f32.mrb[251].mxu1 }
 0x301   : > { %7836 = vst [vmem:[#allocation19_spill] sm:$0xff] %v7415_v49 }
 0x302   : > { %4356 = vmatmul.mubr.bf16.gmra.mrb[116].mxu0 %v7238_v26  ;;  %v4386_v26 = vld [vmem:[%s7772_s5] sm:$0x3] }
 0x303   : > { %4365 = vmatprep.mubr.bf16.mxu0 %v7255_v52  ;;  %v4462_v52 = vld [vmem:[%s323_s18] sm:$0x3]  ;;  %s5478_s18 = sshll.u32 %s5555_s17, 4  ;;  %s5479_s18 = int_to_ptr.vmem [resolvable:$false] %s5478_s18 }
 0x304   : > { %s5480_s19 = scalar_lea.vmem %s5479_s18, 16384  ;;  %p5481_p1 = scmp.lt.s32.totalorder %s7714_s20, %s5479_s18 }
 0x305   : > { %v7419_v53 = vpop.f32.mrb[252].mxu1  ;;  %p5482_p2 = scmp.lt.s32.totalorder %s5480_s19, %s5474_s16 }
 0x306   : > { %7837 = vst [vmem:[#allocation22_spill] sm:$0xff] %v7419_v53  ;;  %v7421_v38 = vpop.f32.mrb[253].mxu1 }
 0x307   : > { %7838 = vst [vmem:[#allocation21_spill] sm:$0xff] %v7421_v38  ;;  %v7423_v18 = vpop.f32.mrb[254].mxu1  ;;  %p5483_p3 = por %p5482_p2, %p5481_p1 }
 0x308   : > { %7839 = vst [vmem:[#allocation23_spill] sm:$0xff] %v7423_v18  ;;  %v7425_v32 = vpop.f32.mrb[255].mxu1  ;;  %v7841_v18 = vld [vmem:[#allocation6_spill] sm:$0xff] }
 0x309   : > { %7840 = vst [vmem:[#allocation24_spill] sm:$0xff] %v7425_v32  ;;  %v7438_v38 = vrot.slane %v4386_v26, %v7841_v18  ;;  %v7842_v32 = vld [vmem:[#allocation7_spill] sm:$0xff]  ;;  %p5484_p5 = pnand %p5483_p3, %p5477_p0 }
 0x30a   : > { %4366 = vmatmul.mubr.bf16.gmra.mrb[120].mxu0 %v7252_v24  ;;  %v7449_v43 = vrot.slane %v4462_v52, %v7842_v32 }
 0x30b   : > { %4375 = vmatprep.mubr.bf16.mxu0 %v7273_v48  ;;  %v7442_v48 = vrot.slane %v4386_v26, %v7842_v32 }
 0x312   : > { %4376 = vmatmul.mubr.bf16.gmra.mrb[124].mxu0 %v7269_v20  ;;  %v7445_v20 = vrot.slane %v4462_v52, %v7841_v18 }
 0x36d   : > { %v4227_v24 = vpop.f32.mrb[64].mxu0 }
 0x36e   : > { %v4998_v53 = vadd.f32 %v4227_v24, %v7265_v45  ;;  %v4229_v49 = vpop.f32.mrb[65].mxu0 }
 0x36f   : > { %v4999_v14 = vadd.f32 %v4229_v49, %v7267_v56  ;;  %v4231_v46 = vpop.f32.mrb[66].mxu0 }
 0x370   : > { %v4398_v4 = vmul.f32 %v4998_v53, %v7438_v38  ;;  %v5000_v23 = vadd.f32 %v4231_v46, %v7271_v40  ;;  %v4233_v26 = vpop.f32.mrb[67].mxu0 }
 0x371   : > { %v4399_v21 = vmul.f32 %v4999_v14, %v7442_v48  ;;  %v5001_v18 = vadd.f32 %v4233_v26, %v7275_v27 }
 0x372   : > { %v4474_v45 = vadd.f32 %v7445_v20, %v4398_v4  ;;  %v4400_v24 = vmul.f32 %v5000_v23, %v7438_v38 }
 0x373   : > { %v4475_v32 = vadd.f32 %v7449_v43, %v4399_v21  ;;  %v4401_v56 = vmul.f32 %v5001_v18, %v7442_v48 }
 0x374   : > { %v4538_v49 = vmax.f32 %v4474_v45, 0.0  ;;  %v4476_v52 = vadd.f32 %v7445_v20, %v4400_v24 }
 0x375   : > { %v4539_v17 = vmax.f32 %v4475_v32, 0.0  ;;  %v4477_v53 = vadd.f32 %v7449_v43, %v4401_v56  ;;  %v4237_v40 = vpop.f32.mrb[68].mxu0 }
 0x376   : > { %4602 = vst [vmem:[%s7464_s23] sm:$0xff] %v4538_v49  ;;  %v4540_v27 = vmax.f32 %v4476_v52, 0.0  ;;  %v5002_v4 = vadd.f32 %v4237_v40, %v7279_v6  ;;  %v4239_v21 = vpop.f32.mrb[69].mxu0 }
 0x377   : > { %4603 = vst [vmem:[%s7464_s23 + $0x8] sm:$0xff] %v4539_v17  ;;  %v4541_v14 = vmax.f32 %v4477_v53, 0.0  ;;  %v5003_v23 = vadd.f32 %v4239_v21, %v7281_v22  ;;  %v4241_v46 = vpop.f32.mrb[70].mxu0 }
 0x378   : > { %4604 = vst [vmem:[%s7464_s23 + $0x10] sm:$0xff] %v4540_v27  ;;  %v4402_v26 = vmul.f32 %v5002_v4, %v7438_v38  ;;  %v5004_v18 = vadd.f32 %v4241_v46, %v7283_v37  ;;  %v4243_v45 = vpop.f32.mrb[71].mxu0 }
 0x379   : > { %4605 = vst [vmem:[%s7464_s23 + $0x18] sm:$0xff] %v4541_v14  ;;  %v4403_v24 = vmul.f32 %v5003_v23, %v7442_v48  ;;  %v5005_v32 = vadd.f32 %v4243_v45, %v7285_v28 }
 0x37a   : > { %v4478_v6 = vadd.f32 %v7445_v20, %v4402_v26  ;;  %v4404_v17 = vmul.f32 %v5004_v18, %v7438_v38 }
 0x37b   : > { %v4479_v22 = vadd.f32 %v7449_v43, %v4403_v24  ;;  %v4405_v56 = vmul.f32 %v5005_v32, %v7442_v48 }
 0x37c   : > { %v4542_v49 = vmax.f32 %v4478_v6, 0.0  ;;  %v4480_v52 = vadd.f32 %v7445_v20, %v4404_v17 }
 0x37d   : > { %v4543_v37 = vmax.f32 %v4479_v22, 0.0  ;;  %v4481_v53 = vadd.f32 %v7449_v43, %v4405_v56  ;;  %v4247_v40 = vpop.f32.mrb[72].mxu0 }
 0x37e   : > { %4606 = vst [vmem:[%s7464_s23 + $0x20] sm:$0xff] %v4542_v49  ;;  %v4544_v27 = vmax.f32 %v4480_v52, 0.0  ;;  %v5006_v28 = vadd.f32 %v4247_v40, %v7289_v7  ;;  %v4249_v4 = vpop.f32.mrb[73].mxu0 }
 0x37f   : > { %4607 = vst [vmem:[%s7464_s23 + $0x28] sm:$0xff] %v4543_v37  ;;  %v4545_v21 = vmax.f32 %v4481_v53, 0.0  ;;  %v5007_v14 = vadd.f32 %v4249_v4, %v7291_v19  ;;  %v4251_v23 = vpop.f32.mrb[74].mxu0 }
 0x380   : > { %4608 = vst [vmem:[%s7464_s23 + $0x30] sm:$0xff] %v4544_v27  ;;  %v4406_v46 = vmul.f32 %v5006_v28, %v7438_v38  ;;  %v5008_v26 = vadd.f32 %v4251_v23, %v7293_v35  ;;  %v4253_v18 = vpop.f32.mrb[75].mxu0 }
 0x381   : > { %4609 = vst [vmem:[%s7464_s23 + $0x38] sm:$0xff] %v4545_v21  ;;  %v4407_v45 = vmul.f32 %v5007_v14, %v7442_v48  ;;  %v5009_v24 = vadd.f32 %v4253_v18, %v7295_v15 }
 0x382   : > { %v4482_v7 = vadd.f32 %v7445_v20, %v4406_v46  ;;  %v4408_v32 = vmul.f32 %v5008_v26, %v7438_v38 }
 0x383   : > { %v4483_v19 = vadd.f32 %v7449_v43, %v4407_v45  ;;  %v4409_v6 = vmul.f32 %v5009_v24, %v7442_v48 }
 0x384   : > { %v4546_v17 = vmax.f32 %v4482_v7, 0.0  ;;  %v4484_v22 = vadd.f32 %v7445_v20, %v4408_v32 }
 0x385   : > { %v4547_v35 = vmax.f32 %v4483_v19, 0.0  ;;  %v4485_v56 = vadd.f32 %v7449_v43, %v4409_v6  ;;  %v4257_v49 = vpop.f32.mrb[76].mxu0 }
 0x386   : > { %4610 = vst [vmem:[%s7464_s23 + $0x40] sm:$0xff] %v4546_v17  ;;  %v4548_v52 = vmax.f32 %v4484_v22, 0.0  ;;  %v5010_v15 = vadd.f32 %v4257_v49, %v7299_v16  ;;  %v4259_v37 = vpop.f32.mrb[77].mxu0 }
 0x387   : > { %4611 = vst [vmem:[%s7464_s23 + $0x48] sm:$0xff] %v4547_v35  ;;  %v4549_v53 = vmax.f32 %v4485_v56, 0.0  ;;  %v5011_v40 = vadd.f32 %v4259_v37, %v7301_v11  ;;  %v4261_v27 = vpop.f32.mrb[78].mxu0 }
 0x388   : > { %4612 = vst [vmem:[%s7464_s23 + $0x50] sm:$0xff] %v4548_v52  ;;  %v4410_v28 = vmul.f32 %v5010_v15, %v7438_v38  ;;  %v5012_v4 = vadd.f32 %v4261_v27, %v7303_v39  ;;  %v4263_v21 = vpop.f32.mrb[79].mxu0 }
 0x389   : > { %4613 = vst [vmem:[%s7464_s23 + $0x58] sm:$0xff] %v4549_v53  ;;  %v4411_v14 = vmul.f32 %v5011_v40, %v7442_v48  ;;  %v5013_v23 = vadd.f32 %v4263_v21, %v7305_v30 }
 0x38a   : > { %v4486_v16 = vadd.f32 %v7445_v20, %v4410_v28  ;;  %v4412_v46 = vmul.f32 %v5012_v4, %v7438_v38 }
 0x38b   : > { %v4487_v11 = vadd.f32 %v7449_v43, %v4411_v14  ;;  %v4413_v26 = vmul.f32 %v5013_v23, %v7442_v48 }
 0x38c   : > { %v4550_v18 = vmax.f32 %v4486_v16, 0.0  ;;  %v4488_v45 = vadd.f32 %v7445_v20, %v4412_v46 }
 0x38d   : > { %v4551_v39 = vmax.f32 %v4487_v11, 0.0  ;;  %v4489_v24 = vadd.f32 %v7449_v43, %v4413_v26  ;;  %v4267_v7 = vpop.f32.mrb[80].mxu0 }
 0x38e   : > { %4614 = vst [vmem:[%s7464_s23 + $0x60] sm:$0xff] %v4550_v18  ;;  %v4552_v32 = vmax.f32 %v4488_v45, 0.0  ;;  %v5014_v30 = vadd.f32 %v4267_v7, %v7309_v29  ;;  %v4269_v19 = vpop.f32.mrb[81].mxu0 }
 0x38f   : > { %4615 = vst [vmem:[%s7464_s23 + $0x68] sm:$0xff] %v4551_v39  ;;  %v4553_v6 = vmax.f32 %v4489_v24, 0.0  ;;  %v5015_v17 = vadd.f32 %v4269_v19, %v7311_v34  ;;  %v4271_v22 = vpop.f32.mrb[82].mxu0 }
 0x390   : > { %4616 = vst [vmem:[%s7464_s23 + $0x70] sm:$0xff] %v4552_v32  ;;  %v4414_v35 = vmul.f32 %v5014_v30, %v7438_v38  ;;  %v5016_v56 = vadd.f32 %v4271_v22, %v7313_v59  ;;  %v4273_v49 = vpop.f32.mrb[83].mxu0 }
 0x391   : > { %4617 = vst [vmem:[%s7464_s23 + $0x78] sm:$0xff] %v4553_v6  ;;  %v4415_v52 = vmul.f32 %v5015_v17, %v7442_v48  ;;  %v5017_v15 = vadd.f32 %v4273_v49, %v7315_v5 }
 0x392   : > { %v4490_v29 = vadd.f32 %v7445_v20, %v4414_v35  ;;  %v4416_v37 = vmul.f32 %v5016_v56, %v7438_v38 }
 0x393   : > { %v4491_v34 = vadd.f32 %v7449_v43, %v4415_v52  ;;  %v4417_v53 = vmul.f32 %v5017_v15, %v7442_v48 }
 0x394   : > { %v4554_v40 = vmax.f32 %v4490_v29, 0.0  ;;  %v4492_v27 = vadd.f32 %v7445_v20, %v4416_v37 }
 0x395   : > { %v4555_v59 = vmax.f32 %v4491_v34, 0.0  ;;  %v4493_v28 = vadd.f32 %v7449_v43, %v4417_v53  ;;  %v4277_v4 = vpop.f32.mrb[84].mxu0 }
 0x396   : > { %4618 = vst [vmem:[%s7464_s23 + $0x80] sm:$0xff] %v4554_v40  ;;  %v4556_v21 = vmax.f32 %v4492_v27, 0.0  ;;  %v5018_v5 = vadd.f32 %v4277_v4, %v7319_v10  ;;  %v4279_v14 = vpop.f32.mrb[85].mxu0 }
 0x397   : > { %4619 = vst [vmem:[%s7464_s23 + $0x88] sm:$0xff] %v4555_v59  ;;  %v4557_v23 = vmax.f32 %v4493_v28, 0.0  ;;  %v5019_v16 = vadd.f32 %v4279_v14, %v7321_v60  ;;  %v4281_v46 = vpop.f32.mrb[86].mxu0 }
 0x398   : > { %4620 = vst [vmem:[%s7464_s23 + $0x90] sm:$0xff] %v4556_v21  ;;  %v4418_v11 = vmul.f32 %v5018_v5, %v7438_v38  ;;  %v5020_v26 = vadd.f32 %v4281_v46, %v7323_v42  ;;  %v4283_v18 = vpop.f32.mrb[87].mxu0 }
 0x399   : > { %4621 = vst [vmem:[%s7464_s23 + $0x98] sm:$0xff] %v4557_v23  ;;  %v4419_v45 = vmul.f32 %v5019_v16, %v7442_v48  ;;  %v5021_v39 = vadd.f32 %v4283_v18, %v7325_v3 }
 0x39a   : > { %v4494_v10 = vadd.f32 %v7445_v20, %v4418_v11  ;;  %v4420_v24 = vmul.f32 %v5020_v26, %v7438_v38 }
 0x39b   : > { %v4495_v60 = vadd.f32 %v7449_v43, %v4419_v45  ;;  %v4421_v7 = vmul.f32 %v5021_v39, %v7442_v48 }
 0x39c   : > { %v4558_v32 = vmax.f32 %v4494_v10, 0.0  ;;  %v4496_v30 = vadd.f32 %v7445_v20, %v4420_v24 }
 0x39d   : > { %v4559_v42 = vmax.f32 %v4495_v60, 0.0  ;;  %v4497_v19 = vadd.f32 %v7449_v43, %v4421_v7  ;;  %v4287_v6 = vpop.f32.mrb[88].mxu0 }
 0x39e   : > { %4622 = vst [vmem:[%s7464_s23 + $0xa0] sm:$0xff] %v4558_v32  ;;  %v4560_v17 = vmax.f32 %v4496_v30, 0.0  ;;  %v5022_v3 = vadd.f32 %v4287_v6, %v7329_v12  ;;  %v4289_v22 = vpop.f32.mrb[89].mxu0 }
 0x39f   : > { %4623 = vst [vmem:[%s7464_s23 + $0xa8] sm:$0xff] %v4559_v42  ;;  %v4561_v35 = vmax.f32 %v4497_v19, 0.0  ;;  %v5023_v56 = vadd.f32 %v4289_v22, %v7331_v31  ;;  %v4291_v49 = vpop.f32.mrb[90].mxu0 }
 0x3a0   : > { %4624 = vst [vmem:[%s7464_s23 + $0xb0] sm:$0xff] %v4560_v17  ;;  %v4422_v52 = vmul.f32 %v5022_v3, %v7438_v38  ;;  %v5024_v15 = vadd.f32 %v4291_v49, %v7333_v41  ;;  %v4293_v29 = vpop.f32.mrb[91].mxu0 }
 0x3a1   : > { %4625 = vst [vmem:[%s7464_s23 + $0xb8] sm:$0xff] %v4561_v35  ;;  %v4423_v37 = vmul.f32 %v5023_v56, %v7442_v48  ;;  %v5025_v34 = vadd.f32 %v4293_v29, %v7335_v9 }
 0x3a2   : > { %v4498_v12 = vadd.f32 %v7445_v20, %v4422_v52  ;;  %v4424_v53 = vmul.f32 %v5024_v15, %v7438_v38 }
 0x3a3   : > { %v4499_v31 = vadd.f32 %v7449_v43, %v4423_v37  ;;  %v4425_v40 = vmul.f32 %v5025_v34, %v7442_v48 }
 0x3a4   : > { %v4562_v27 = vmax.f32 %v4498_v12, 0.0  ;;  %v4500_v59 = vadd.f32 %v7445_v20, %v4424_v53 }
 0x3a5   : > { %v4563_v41 = vmax.f32 %v4499_v31, 0.0  ;;  %v4501_v28 = vadd.f32 %v7449_v43, %v4425_v40  ;;  %v4297_v4 = vpop.f32.mrb[92].mxu0 }
 0x3a6   : > { %4626 = vst [vmem:[%s7464_s23 + $0xc0] sm:$0xff] %v4562_v27  ;;  %v4564_v21 = vmax.f32 %v4500_v59, 0.0  ;;  %v5026_v9 = vadd.f32 %v4297_v4, %v7339_v13  ;;  %v4299_v5 = vpop.f32.mrb[93].mxu0 }
 0x3a7   : > { %4627 = vst [vmem:[%s7464_s23 + $0xc8] sm:$0xff] %v4563_v41  ;;  %v4565_v14 = vmax.f32 %v4501_v28, 0.0  ;;  %v5027_v23 = vadd.f32 %v4299_v5, %v7341_v61  ;;  %v4301_v16 = vpop.f32.mrb[94].mxu0 }
 0x3a8   : > { %4628 = vst [vmem:[%s7464_s23 + $0xd0] sm:$0xff] %v4564_v21  ;;  %v4426_v46 = vmul.f32 %v5026_v9, %v7438_v38  ;;  %v5028_v11 = vadd.f32 %v4301_v16, %v7343_v2  ;;  %v4303_v26 = vpop.f32.mrb[95].mxu0 }
 0x3a9   : > { %4629 = vst [vmem:[%s7464_s23 + $0xd8] sm:$0xff] %v4565_v14  ;;  %v4427_v18 = vmul.f32 %v5027_v23, %v7442_v48  ;;  %v5029_v45 = vadd.f32 %v4303_v26, %v7345_v47 }
 0x3aa   : > { %v4502_v13 = vadd.f32 %v7445_v20, %v4426_v46  ;;  %v4428_v39 = vmul.f32 %v5028_v11, %v7438_v38 }
 0x3ab   : > { %v4503_v61 = vadd.f32 %v7449_v43, %v4427_v18  ;;  %v4429_v10 = vmul.f32 %v5029_v45, %v7442_v48 }
 0x3ac   : > { %v4566_v24 = vmax.f32 %v4502_v13, 0.0  ;;  %v4504_v60 = vadd.f32 %v7445_v20, %v4428_v39 }
 0x3ad   : > { %v4567_v2 = vmax.f32 %v4503_v61, 0.0  ;;  %v4505_v7 = vadd.f32 %v7449_v43, %v4429_v10  ;;  %v4307_v32 = vpop.f32.mrb[96].mxu0 }
 0x3ae   : > { %4630 = vst [vmem:[%s7464_s23 + $0xe0] sm:$0xff] %v4566_v24  ;;  %v4568_v30 = vmax.f32 %v4504_v60, 0.0  ;;  %v5030_v47 = vadd.f32 %v4307_v32, %v7349_v36  ;;  %v4309_v42 = vpop.f32.mrb[97].mxu0 }
 0x3af   : > { %4631 = vst [vmem:[%s7464_s23 + $0xe8] sm:$0xff] %v4567_v2  ;;  %v4569_v19 = vmax.f32 %v4505_v7, 0.0  ;;  %v5031_v6 = vadd.f32 %v4309_v42, %v7351_v58  ;;  %v4311_v17 = vpop.f32.mrb[98].mxu0 }
 0x3b0   : > { %4632 = vst [vmem:[%s7464_s23 + $0xf0] sm:$0xff] %v4568_v30  ;;  %v4430_v3 = vmul.f32 %v5030_v47, %v7438_v38  ;;  %v5032_v22 = vadd.f32 %v4311_v17, %v7353_v51  ;;  %v4313_v35 = vpop.f32.mrb[99].mxu0 }
 0x3b1   : > { %4633 = vst [vmem:[%s7464_s23 + $0xf8] sm:$0xff] %v4569_v19  ;;  %v4431_v56 = vmul.f32 %v5031_v6, %v7442_v48  ;;  %v5033_v49 = vadd.f32 %v4313_v35, %v7355_v63 }
 0x3b2   : > { %v4506_v36 = vadd.f32 %v7445_v20, %v4430_v3  ;;  %v4432_v52 = vmul.f32 %v5032_v22, %v7438_v38 }
 0x3b3   : > { %v4507_v58 = vadd.f32 %v7449_v43, %v4431_v56  ;;  %v4433_v15 = vmul.f32 %v5033_v49, %v7442_v48  ;;  %v7843_v49 = vld [vmem:[#allocation9_spill] sm:$0xff] }
 0x3b4   : > { %v4570_v29 = vmax.f32 %v4506_v36, 0.0  ;;  %v4508_v37 = vadd.f32 %v7445_v20, %v4432_v52 }
 0x3b5   : > { %v4571_v51 = vmax.f32 %v4507_v58, 0.0  ;;  %v4509_v34 = vadd.f32 %v7449_v43, %v4433_v15  ;;  %v4317_v12 = vpop.f32.mrb[100].mxu0  ;;  %v7844_v15 = vld [vmem:[#allocation10_spill] sm:$0xff] }
 0x3b6   : > { %4634 = vst [vmem:[%s7464_s23 + $0x100] sm:$0xff] %v4570_v29  ;;  %v4572_v53 = vmax.f32 %v4508_v37, 0.0  ;;  %v5034_v63 = vadd.f32 %v4317_v12, %v7359_v8  ;;  %v4319_v31 = vpop.f32.mrb[101].mxu0 }
 0x3b7   : > { %4635 = vst [vmem:[%s7464_s23 + $0x108] sm:$0xff] %v4571_v51  ;;  %v4573_v40 = vmax.f32 %v4509_v34, 0.0  ;;  %v5035_v27 = vadd.f32 %v4319_v31, %v7361_v55  ;;  %v4321_v59 = vpop.f32.mrb[102].mxu0 }
 0x3b8   : > { %4636 = vst [vmem:[%s7464_s23 + $0x110] sm:$0xff] %v4572_v53  ;;  %v4434_v41 = vmul.f32 %v5034_v63, %v7438_v38  ;;  %v5036_v28 = vadd.f32 %v4321_v59, %v7363_v54  ;;  %v4323_v4 = vpop.f32.mrb[103].mxu0 }
 0x3b9   : > { %4637 = vst [vmem:[%s7464_s23 + $0x118] sm:$0xff] %v4573_v40  ;;  %v4435_v21 = vmul.f32 %v5035_v27, %v7442_v48  ;;  %v5037_v9 = vadd.f32 %v4323_v4, %v7365_v33 }
 0x3ba   : > { %v4510_v8 = vadd.f32 %v7445_v20, %v4434_v41  ;;  %v4436_v5 = vmul.f32 %v5036_v28, %v7438_v38  ;;  %v7845_v28 = vld [vmem:[#allocation8_spill] sm:$0xff] }
 0x3bb   : > { %v4511_v55 = vadd.f32 %v7449_v43, %v4435_v21  ;;  %v4437_v14 = vmul.f32 %v5037_v9, %v7442_v48 }
 0x3bc   : > { %v4574_v23 = vmax.f32 %v4510_v8, 0.0  ;;  %v4512_v16 = vadd.f32 %v7445_v20, %v4436_v5  ;;  %v7846_v8 = vld [vmem:[#allocation14_spill] sm:$0xff] }
 0x3bd   : > { %v4575_v54 = vmax.f32 %v4511_v55, 0.0  ;;  %v4513_v46 = vadd.f32 %v7449_v43, %v4437_v14  ;;  %v4327_v11 = vpop.f32.mrb[104].mxu0 }
 0x3be   : > { %4638 = vst [vmem:[%s7464_s23 + $0x120] sm:$0xff] %v4574_v23  ;;  %v4576_v26 = vmax.f32 %v4512_v16, 0.0  ;;  %v5038_v33 = vadd.f32 %v4327_v11, %v7369_v62  ;;  %v4329_v18 = vpop.f32.mrb[105].mxu0  ;;  %v7847_v23 = vld [vmem:[#allocation12_spill] sm:$0xff] }
 0x3bf   : > { %4639 = vst [vmem:[%s7464_s23 + $0x128] sm:$0xff] %v4575_v54  ;;  %v4577_v45 = vmax.f32 %v4513_v46, 0.0  ;;  %v5039_v13 = vadd.f32 %v4329_v18, %v7371_v57  ;;  %v4331_v39 = vpop.f32.mrb[106].mxu0 }
 0x3c0   : > { %4640 = vst [vmem:[%s7464_s23 + $0x130] sm:$0xff] %v4576_v26  ;;  %v4438_v61 = vmul.f32 %v5038_v33, %v7438_v38  ;;  %v5040_v10 = vadd.f32 %v4331_v39, %v7373_v25  ;;  %v4333_v24 = vpop.f32.mrb[107].mxu0 }
 0x3c1   : > { %4641 = vst [vmem:[%s7464_s23 + $0x138] sm:$0xff] %v4577_v45  ;;  %v4439_v60 = vmul.f32 %v5039_v13, %v7442_v48  ;;  %v5041_v2 = vadd.f32 %v4333_v24, %v7375_v0 }
 0x3c2   : > { %v4514_v62 = vadd.f32 %v7445_v20, %v4438_v61  ;;  %v4440_v7 = vmul.f32 %v5040_v10, %v7438_v38  ;;  %v7848_v61 = vld [vmem:[#allocation13_spill] sm:$0xff] }
 0x3c3   : > { %v4515_v57 = vadd.f32 %v7449_v43, %v4439_v60  ;;  %v4441_v32 = vmul.f32 %v5041_v2, %v7442_v48  ;;  %v7849_v2 = vld [vmem:[#allocation11_spill] sm:$0xff] }
 0x3c4   : > { %v4578_v30 = vmax.f32 %v4514_v62, 0.0  ;;  %v4516_v47 = vadd.f32 %v7445_v20, %v4440_v7 }
 0x3c5   : > { %v4579_v25 = vmax.f32 %v4515_v57, 0.0  ;;  %v4517_v42 = vadd.f32 %v7449_v43, %v4441_v32  ;;  %v4337_v19 = vpop.f32.mrb[108].mxu0  ;;  %v7850_v32 = vld [vmem:[#allocation18_spill] sm:$0xff] }
 0x3c6   : > { %4642 = vst [vmem:[%s7464_s23 + $0x140] sm:$0xff] %v4578_v30  ;;  %v4580_v6 = vmax.f32 %v4516_v47, 0.0  ;;  %v5042_v0 = vadd.f32 %v4337_v19, %v7379_v1  ;;  %v4339_v17 = vpop.f32.mrb[109].mxu0 }
 0x3c7   : > { %4643 = vst [vmem:[%s7464_s23 + $0x148] sm:$0xff] %v4579_v25  ;;  %v4581_v3 = vmax.f32 %v4517_v42, 0.0  ;;  %v5043_v22 = vadd.f32 %v4339_v17, %v7381_v50  ;;  %v4341_v35 = vpop.f32.mrb[110].mxu0  ;;  %v7851_v42 = vld [vmem:[#allocation15_spill] sm:$0xff] }
 0x3c8   : > { %4644 = vst [vmem:[%s7464_s23 + $0x150] sm:$0xff] %v4580_v6  ;;  %v4442_v56 = vmul.f32 %v5042_v0, %v7438_v38  ;;  %v5044_v36 = vadd.f32 %v4341_v35, %v7843_v49  ;;  %v4343_v52 = vpop.f32.mrb[111].mxu0 }
 0x3c9   : > { %4645 = vst [vmem:[%s7464_s23 + $0x158] sm:$0xff] %v4581_v3  ;;  %v4443_v58 = vmul.f32 %v5043_v22, %v7442_v48  ;;  %v5045_v29 = vadd.f32 %v4343_v52, %v7844_v15 }
 0x3ca   : > { %v4518_v1 = vadd.f32 %v7445_v20, %v4442_v56  ;;  %v4444_v37 = vmul.f32 %v5044_v36, %v7438_v38 }
 0x3cb   : > { %v4519_v50 = vadd.f32 %v7449_v43, %v4443_v58  ;;  %v4445_v51 = vmul.f32 %v5045_v29, %v7442_v48  ;;  %v7852_v58 = vld [vmem:[#allocation16_spill] sm:$0xff] }
 0x3cc   : > { %v4582_v34 = vmax.f32 %v4518_v1, 0.0  ;;  %v4520_v12 = vadd.f32 %v7445_v20, %v4444_v37  ;;  %v7853_v37 = vld [vmem:[#allocation17_spill] sm:$0xff] }
 0x3cd   : > { %v4583_v53 = vmax.f32 %v4519_v50, 0.0  ;;  %v4521_v63 = vadd.f32 %v7449_v43, %v4445_v51  ;;  %v4347_v31 = vpop.f32.mrb[112].mxu0 }
 0x3ce   : > { %4646 = vst [vmem:[%s7464_s23 + $0x160] sm:$0xff] %v4582_v34  ;;  %v4584_v40 = vmax.f32 %v4520_v12, 0.0  ;;  %v5046_v27 = vadd.f32 %v4347_v31, %v7389_v44  ;;  %v4349_v59 = vpop.f32.mrb[113].mxu0  ;;  %v7854_v12 = vld [vmem:[#allocation20_spill] sm:$0xff] }
 0x3cf   : > { %4647 = vst [vmem:[%s7464_s23 + $0x168] sm:$0xff] %v4583_v53  ;;  %v4585_v41 = vmax.f32 %v4521_v63, 0.0  ;;  %v5047_v4 = vadd.f32 %v4349_v59, %v7845_v28  ;;  %v4351_v21 = vpop.f32.mrb[114].mxu0 }
 0x3d0   : > { %4648 = vst [vmem:[%s7464_s23 + $0x170] sm:$0xff] %v4584_v40  ;;  %v4446_v9 = vmul.f32 %v5046_v27, %v7438_v38  ;;  %v5048_v5 = vadd.f32 %v4351_v21, %v7846_v8  ;;  %v4353_v55 = vpop.f32.mrb[115].mxu0  ;;  %v7855_v40 = vld [vmem:[#allocation19_spill] sm:$0xff] }
 0x3d1   : > { %4649 = vst [vmem:[%s7464_s23 + $0x178] sm:$0xff] %v4585_v41  ;;  %v4447_v14 = vmul.f32 %v5047_v4, %v7442_v48  ;;  %v5049_v16 = vadd.f32 %v4353_v55, %v7847_v23  ;;  %v7856_v23 = vld [vmem:[#allocation22_spill] sm:$0xff] }
 0x3d2   : > { %v4522_v44 = vadd.f32 %v7445_v20, %v4446_v9  ;;  %v4448_v54 = vmul.f32 %v5048_v5, %v7438_v38 }
 0x3d3   : > { %v4523_v46 = vadd.f32 %v7449_v43, %v4447_v14  ;;  %v4449_v11 = vmul.f32 %v5049_v16, %v7442_v48 }
 0x3d4   : > { %v4586_v26 = vmax.f32 %v4522_v44, 0.0  ;;  %v4524_v33 = vadd.f32 %v7445_v20, %v4448_v54 }
 0x3d5   : > { %v4587_v18 = vmax.f32 %v4523_v46, 0.0  ;;  %v4525_v45 = vadd.f32 %v7449_v43, %v4449_v11  ;;  %v4357_v13 = vpop.f32.mrb[116].mxu0  ;;  %v7857_v46 = vld [vmem:[#allocation21_spill] sm:$0xff] }
 0x3d6   : > { %4650 = vst [vmem:[%s7464_s23 + $0x180] sm:$0xff] %v4586_v26  ;;  %v4588_v39 = vmax.f32 %v4524_v33, 0.0  ;;  %v5050_v10 = vadd.f32 %v4357_v13, %v7848_v61  ;;  %v4359_v24 = vpop.f32.mrb[117].mxu0  ;;  %v7859_v61 = vld [vmem:[#allocation24_spill] sm:$0xff] }
 0x3d7   : > { %4651 = vst [vmem:[%s7464_s23 + $0x188] sm:$0xff] %v4587_v18  ;;  %v4589_v60 = vmax.f32 %v4525_v45, 0.0  ;;  %v5051_v62 = vadd.f32 %v4359_v24, %v7849_v2  ;;  %v4361_v7 = vpop.f32.mrb[118].mxu0  ;;  %v7858_v18 = vld [vmem:[#allocation23_spill] sm:$0xff] }
 0x3d8   : > { %4652 = vst [vmem:[%s7464_s23 + $0x190] sm:$0xff] %v4588_v39  ;;  %v4450_v57 = vmul.f32 %v5050_v10, %v7438_v38  ;;  %v5052_v30 = vadd.f32 %v4361_v7, %v7850_v32  ;;  %v4363_v47 = vpop.f32.mrb[119].mxu0 }
 0x3d9   : > { %4653 = vst [vmem:[%s7464_s23 + $0x198] sm:$0xff] %v4589_v60  ;;  %v4451_v25 = vmul.f32 %v5051_v62, %v7442_v48  ;;  %v5053_v19 = vadd.f32 %v4363_v47, %v7851_v42 }
 0x3da   : > { %v4526_v6 = vadd.f32 %v7445_v20, %v4450_v57  ;;  %v4452_v0 = vmul.f32 %v5052_v30, %v7438_v38 }
 0x3db   : > { %v4527_v17 = vadd.f32 %v7449_v43, %v4451_v25  ;;  %v4453_v3 = vmul.f32 %v5053_v19, %v7442_v48 }
 0x3dc   : > { %v4590_v22 = vmax.f32 %v4526_v6, 0.0  ;;  %v4528_v35 = vadd.f32 %v7445_v20, %v4452_v0 }
 0x3dd   : > { %v4591_v56 = vmax.f32 %v4527_v17, 0.0  ;;  %v4529_v49 = vadd.f32 %v7449_v43, %v4453_v3  ;;  %v4367_v36 = vpop.f32.mrb[120].mxu0 }
 0x3de   : > { %4654 = vst [vmem:[%s7464_s23 + $0x1a0] sm:$0xff] %v4590_v22  ;;  %v4592_v52 = vmax.f32 %v4528_v35, 0.0  ;;  %v5054_v15 = vadd.f32 %v4367_v36, %v7852_v58  ;;  %v4369_v29 = vpop.f32.mrb[121].mxu0 }
 0x3df   : > { %4655 = vst [vmem:[%s7464_s23 + $0x1a8] sm:$0xff] %v4591_v56  ;;  %v4593_v1 = vmax.f32 %v4529_v49, 0.0  ;;  %v5055_v50 = vadd.f32 %v4369_v29, %v7853_v37  ;;  %v4371_v51 = vpop.f32.mrb[122].mxu0 }
 0x3e0   : > { %4656 = vst [vmem:[%s7464_s23 + $0x1b0] sm:$0xff] %v4592_v52  ;;  %v4454_v34 = vmul.f32 %v5054_v15, %v7438_v38  ;;  %v5056_v53 = vadd.f32 %v4371_v51, %v7854_v12  ;;  %v4373_v63 = vpop.f32.mrb[123].mxu0 }
 0x3e1   : > { %4657 = vst [vmem:[%s7464_s23 + $0x1b8] sm:$0xff] %v4593_v1  ;;  %v4455_v31 = vmul.f32 %v5055_v50, %v7442_v48  ;;  %v5057_v27 = vadd.f32 %v4373_v63, %v7855_v40 }
 0x3e2   : > { %v4530_v59 = vadd.f32 %v7445_v20, %v4454_v34  ;;  %v4456_v41 = vmul.f32 %v5056_v53, %v7438_v38 }
 0x3e3   : > { %v4531_v28 = vadd.f32 %v7449_v43, %v4455_v31  ;;  %v4457_v4 = vmul.f32 %v5057_v27, %v7442_v48 }
 0x3e4   : > { %v4594_v21 = vmax.f32 %v4530_v59, 0.0  ;;  %v4532_v9 = vadd.f32 %v7445_v20, %v4456_v41 }
 0x3e5   : > { %v4595_v8 = vmax.f32 %v4531_v28, 0.0  ;;  %v4533_v5 = vadd.f32 %v7449_v43, %v4457_v4  ;;  %v4377_v55 = vpop.f32.mrb[124].mxu0 }
 0x3e6   : > { %4658 = vst [vmem:[%s7464_s23 + $0x1c0] sm:$0xff] %v4594_v21  ;;  %v4596_v14 = vmax.f32 %v4532_v9, 0.0  ;;  %v5058_v16 = vadd.f32 %v4377_v55, %v7856_v23  ;;  %v4379_v44 = vpop.f32.mrb[125].mxu0 }
 0x3e7   : > { %4659 = vst [vmem:[%s7464_s23 + $0x1c8] sm:$0xff] %v4595_v8  ;;  %v4597_v54 = vmax.f32 %v4533_v5, 0.0  ;;  %v5059_v11 = vadd.f32 %v4379_v44, %v7857_v46  ;;  %v4381_v26 = vpop.f32.mrb[126].mxu0 }
 0x3e8   : > { %4660 = vst [vmem:[%s7464_s23 + $0x1d0] sm:$0xff] %v4596_v14  ;;  %v4458_v33 = vmul.f32 %v5058_v16, %v7438_v38  ;;  %v5060_v45 = vadd.f32 %v4381_v26, %v7858_v18  ;;  %v4383_v13 = vpop.f32.mrb[127].mxu0 }
 0x3e9   : > { %4661 = vst [vmem:[%s7464_s23 + $0x1d8] sm:$0xff] %v4597_v54  ;;  %v4459_v39 = vmul.f32 %v5059_v11, %v7442_v48  ;;  %v5061_v10 = vadd.f32 %v4383_v13, %v7859_v61 }
 0x3ea   : > { %v4534_v24 = vadd.f32 %v7445_v20, %v4458_v33  ;;  %v4460_v60 = vmul.f32 %v5060_v45, %v7438_v38 }
 0x3eb   : > { %v4535_v2 = vadd.f32 %v7449_v43, %v4459_v39  ;;  %v4461_v62 = vmul.f32 %v5061_v10, %v7442_v48 }
 0x3ec   : > { %v4598_v7 = vmax.f32 %v4534_v24, 0.0  ;;  %v4536_v57 = vadd.f32 %v7445_v20, %v4460_v60 }
 0x3ed   : > { %v4599_v32 = vmax.f32 %v4535_v2, 0.0  ;;  %v4537_v30 = vadd.f32 %v7449_v43, %v4461_v62 }
 0x3ee   : > { %4662 = vst [vmem:[%s7464_s23 + $0x1e0] sm:$0xff] %v4598_v7  ;;  %v4600_v47 = vmax.f32 %v4536_v57, 0.0 }
 0x3ef   : > { %4663 = vst [vmem:[%s7464_s23 + $0x1e8] sm:$0xff] %v4599_v32  ;;  %v4601_v38 = vmax.f32 %v4537_v30, 0.0 }
 0x3f0   : > { %4664 = vst [vmem:[%s7464_s23 + $0x1f0] sm:$0xff] %v4600_v47 }
 0x3f1   : > { %4665 = vst [vmem:[%s7464_s23 + $0x1f8] sm:$0xff] %v4601_v38 }
 0x3f2   : > { %5487 = shalt.err (!%p5484_p5)
}
 0x3f3   : > { %s5488_s21 = scalar_lea.hbm %s7712_s15, 8192  ;;  %s5492_s23 = scalar_lea.hbm %s7774_s7, 16384 }
 0x3f4   : > { %p5489_p6 = scmp.ne.s32.totalorder %s7712_s15, %s5488_s21  ;;  %p5493_p10 = scmp.lt.u32.totalorder %s7712_s15, %s7774_s7 }
 0x3f5   : > { %p5494_p11 = scmp.lt.u32.totalorder %s5492_s23, %s5488_s21  ;;  %p5496_p13 = scmp.lt.u32.totalorder %s5488_s21, %s7712_s15 }
 0x3f6   : > { %p5490_p7 = pnand %p5489_p6, %p5638_p4 }
 0x3f7   : > { %p5495_p12 = por %p5494_p11, %p5493_p10 }
 0x3f8   : > { %p5491_p9 = pneg %p5490_p7 }
 0x3f9   : > { %p5497_p0 = por %p5496_p13, %p5495_p12 }
 0x3fb   : > { %p5498_p1 = pnand %p5497_p0, %p5491_p9 }
 0x3fd   : > { %5501 = shalt.err (!%p5498_p1)
}
 0x3fe   : > { %s5556_s10 = smov 256   ;;  %s5557_s16 = smov 16  }
 0x3ff   : > { %5190 = dma.vmem_to_hbm [thread:$0]  (%p5638_p4), %s7714_s20, 8192, %s7712_s15, %s7721_s27, %s5556_s10, %s5556_s10, %s5557_s16  }
 0x400 PF: > { %p5196_p2 = scmp.ge.s32.totalorder %s5552_s29, 2  ;;  %s4698_s17 = sand.u32 1, %s5532_s24  }
 0x401   : > { %s4699_s18 = scalar_lea.sflag [#allocation4], %s4698_s17 }
 0x402   : > { %p5193_p3 = pnand %p5196_p2, %p5645_p8 }
 0x404   : > { %5527 = dma.done.wait (!%p5193_p3), %s4699_s18, 8192  }
 0x405   : > { %5529 = vsyncadd (!%p5193_p3), %s4699_s18, 4294959104  ;;  %s20_s29 = sadd.s32 1, %s5552_s29   ;;  %s7860_s24 = smov %s5536_s25 }
 0x406   : > { %p17_p5 = scmp.ge.s32.totalorder %s20_s29, 4   ;;  %s7861_s25 = smov %s5540_s26 }
 0x407   : > { %s7862_s26 = smov %s5651_s14  ;;  %s7863_s27 = smov %s5548_s28 }
 0x408   : > { %s7864_s28 = smov %s7866_s9  ;;  %19 = sbr.rel (!%p17_p5) target bundleno = 4 (0x4), region = 86 }
 0x40f   :  { %4704 = vsyncpa [#allocation4], 1 }
 0x410   :  { %4706 = vsyncpa [#allocation4 + $0x1], 1 }

</bundles_post_ra>
